<compile_context>
chip_gen: v6e
topology: v6e:2x2x1
jax: 0.10.0
libtpu: 0.0.40
codegen_flags: <defaults>
</compile_context>

<pallas_src>
import functools

import jax
import jax.numpy as jnp
import numpy as np
from jax.experimental import pallas as pl
from jax.experimental.pallas import tpu as pltpu


def scorer_kernel(x_ref, w1_ref, b1_ref, w2_ref, bn_scale_ref, bn_shift_ref, w3_ref,
                  out_ref, *, seq_len):
    m, _ = x_ref.shape                       # m = tb * seq_len rows in this block
    tb = m // seq_len
    h2_dim = w2_ref.shape[1]

    # Layer 1: Linear(word_dim -> hidden) + Dropout(id) + ReLU.  bf16 MXU, f32 accumulate.
    h1 = jnp.dot(x_ref[...], w1_ref[...], preferred_element_type=jnp.float32)
    h1 = jnp.maximum(h1 + b1_ref[...], 0.0)                         # (m, H) f32

    # Layer 2: Linear(hidden -> hidden//2) with the eval-mode BN affine folded past W2:
    #   relu((scale*h + shift) @ W2 + b2) == relu(scale*(h @ W2) + (shift*colsum(W2) + b2))
    h2 = jnp.dot(h1.astype(w2_ref.dtype), w2_ref[...], preferred_element_type=jnp.float32)
    h2 = h2.reshape(tb, seq_len, h2_dim)                            # tile-aligned sublane split
    h2 = h2 * bn_scale_ref[...][None] + bn_shift_ref[...][None]     # per-position affine (f32)
    h2 = jnp.maximum(h2, 0.0)

    # Layer 3: Linear(H2 -> 1) fused with the mean over the sequence (1/S pre-folded into W3).
    p = h2 * w3_ref[...][None]                                      # (tb, S, H2)
    per_pos = jnp.sum(p, axis=2)                                    # (tb, S)  per-position score
    scores = jnp.sum(per_pos, axis=1)                               # (tb,)    per-sequence score
    out_ref[...] = scores[None, None, :].astype(out_ref.dtype)      # lane-dense (1, 1, tb) store


def score_sequences(x_emb, params, *, rows_target=4096):
    """x_emb: (N, S, D) word+pos embedded activations. Returns (N,) f32 scores."""
    w1, b1, bn_scale, bn_shift, w2, b2, w3, b3 = params
    N, S, D = x_emb.shape
    H = w1.shape[1]
    H2 = w2.shape[1]

    # Sequences per grid block: ~rows_target MXU rows per step; tb is a multiple of 128 so the
    # (1, 1, tb) output block is lane-dense, capped near N to bound padding waste.
    tb = max(1, rows_target // max(S, 1))
    tb = ((tb + 127) // 128) * 128
    tb = min(tb, ((N + 127) // 128) * 128)
    nb = -(-N // tb)
    if nb > 1 and nb % 2:
        nb += 1                                    # v7x: even block count -> both TCs balanced
    n_pad = nb * tb

    # bf16 matmul operands (f32 accumulation in-kernel); activations as a 2-D (N*S, D) slab.
    x = x_emb.astype(jnp.bfloat16)
    if n_pad != N:
        x = jnp.pad(x, ((0, n_pad - N), (0, 0), (0, 0)))
    x = x.reshape(n_pad * S, D)
    w1_bf = w1.astype(jnp.bfloat16)
    w2_bf = w2.astype(jnp.bfloat16)

    # Fold the eval-mode BN affine past W2 (exact) and 1/S into W3; b3 is added post-kernel.
    w2_colsum = jnp.sum(w2, axis=0, keepdims=True)                  # (1, H2)
    bn_shift_w2 = (bn_shift @ w2_colsum + b2).astype(jnp.float32)   # (S, H2)
    bn_scale_f = bn_scale.astype(jnp.float32)                       # (S, 1)
    w3_row = (w3.reshape(1, H2) / S).astype(jnp.float32)            # (1, H2), mean folded in
    b1_f = b1.astype(jnp.float32)                                   # (1, H)

    out = pl.pallas_call(
        functools.partial(scorer_kernel, seq_len=S),
        out_shape=jax.ShapeDtypeStruct((nb, 1, tb), jnp.float32),
        grid_spec=pltpu.PrefetchScalarGridSpec(
            num_scalar_prefetch=0,
            grid=(nb,),
            in_specs=[
                pl.BlockSpec((tb * S, D), lambda b: (b, 0)),   # streamed activations (bf16)
                pl.BlockSpec((D, H),      lambda b: (0, 0)),   # W1 (resident)
                pl.BlockSpec((1, H),      lambda b: (0, 0)),   # b1
                pl.BlockSpec((H, H2),     lambda b: (0, 0)),   # W2
                pl.BlockSpec((S, 1),      lambda b: (0, 0)),   # BN scale (per position)
                pl.BlockSpec((S, H2),     lambda b: (0, 0)),   # BN shift folded past W2 (+ b2)
                pl.BlockSpec((1, H2),     lambda b: (0, 0)),   # W3 row with 1/S folded in
            ],
            out_specs=pl.BlockSpec((1, 1, tb), lambda b: (b, 0, 0)),
        ),
        compiler_params=pltpu.CompilerParams(
            dimension_semantics=("parallel",),
            vmem_limit_bytes=48 * 1024 * 1024),   # headroom for large blocks; < v7x 64 MiB VMEM
    )(x, w1_bf, b1_f, w2_bf, bn_scale_f, bn_shift_w2, w3_row)

    return out.reshape(n_pad)[:N] + b3.reshape(())   # final bias added once in the wrapper


def simple_scorer_forward(seq1, seq2, word_emb, pos_emb, params, seq_len):
    # Embedding gather + positional add (XLA glue), materialized in bf16 so the kernel's
    # dominant HBM stream is half-width.  Both sequences are scored in ONE pallas_call.
    pe = jnp.take(pos_emb, jnp.arange(seq_len), axis=0).astype(jnp.bfloat16)    # (S, D)
    seqs = jnp.concatenate([seq1, seq2], axis=0)                                # (2B, S)
    x = jnp.take(word_emb.astype(jnp.bfloat16), seqs, axis=0) + pe[None, :, :]  # (2B, S, D) bf16
    scores = score_sequences(x, params)                                         # (2B,) f32
    B = seq1.shape[0]
    return jnp.squeeze(scores[:B]), jnp.squeeze(scores[B:])


def _ref_classifier(x, params):
    """Pure-JAX f32 reference of the classifier + mean, for verification."""
    w1, b1, bn_scale, bn_shift, w2, b2, w3, b3 = params
    h = jnp.maximum(x @ w1 + b1, 0.0)
    h = h * bn_scale[None, :, :] + bn_shift[None, :, :]
    h = jnp.maximum(h @ w2 + b2, 0.0)
    h = h @ w3 + b3[0, 0]
    return jnp.mean(h, axis=1)[:, 0]


if __name__ == "__main__":
    # Small shapes consistent with the module's forward.
    B, S, D, H = 2, 8, 32, 32     # batch, seq_len, word_dim, hidden_dim
    H2 = H // 2
    VOCAB = 100

    key = jax.random.PRNGKey(0)
    k = jax.random.split(key, 10)

    word_emb = jax.random.normal(k[0], (VOCAB, D), jnp.float32) * 0.5
    pos_emb = jax.random.normal(k[1], (S, D), jnp.float32) * 0.5

    # Deterministic classifier parameters (synthetic, not a checkpoint load).
    w1 = jax.random.normal(k[2], (D, H), jnp.float32) * 0.1
    b1 = jax.random.normal(k[3], (1, H), jnp.float32) * 0.1
    w2 = jax.random.normal(k[4], (H, H2), jnp.float32) * 0.1
    b2 = jax.random.normal(k[5], (1, H2), jnp.float32) * 0.1
    w3 = jax.random.normal(k[6], (H2, 1), jnp.float32) * 0.1
    b3 = jax.random.normal(k[7], (1, 1), jnp.float32) * 0.1

    # BatchNorm1d(seq_len) eval-mode params (PyTorch defaults): gamma=1, beta=0,
    # running_mean=0, running_var=1, eps=1e-5 -> folded per-position scale/shift.
    eps = 1e-5
    gamma = jnp.ones((S,), jnp.float32)
    beta = jnp.zeros((S,), jnp.float32)
    run_mean = jnp.zeros((S,), jnp.float32)
    run_var = jnp.ones((S,), jnp.float32)
    bn_scale = (gamma / jnp.sqrt(run_var + eps)).reshape(S, 1)
    bn_shift = (beta - run_mean * gamma / jnp.sqrt(run_var + eps)).reshape(S, 1)

    params = (w1, b1, bn_scale, bn_shift, w2, b2, w3, b3)

    seq1 = jax.random.randint(k[8], (B, S), 0, VOCAB)
    seq2 = jax.random.randint(k[9], (B, S), 0, VOCAB)

    out1, out2 = simple_scorer_forward(seq1, seq2, word_emb, pos_emb, params, S)
    out1, out2 = jax.block_until_ready((out1, out2))

    # Verify against a pure-JAX f32 reference of the same forward (tolerance loosened for
    # the bf16 matmul operands; accumulation and elementwise math are f32 in the kernel).
    pe = pos_emb[jnp.arange(S)]
    ref1 = _ref_classifier(jnp.take(word_emb, seq1, axis=0) + pe[None], params)
    ref2 = _ref_classifier(jnp.take(word_emb, seq2, axis=0) + pe[None], params)
    np.testing.assert_allclose(np.asarray(out1), np.asarray(ref1), rtol=2e-2, atol=2e-2)
    np.testing.assert_allclose(np.asarray(out2), np.asarray(ref2), rtol=2e-2, atol=2e-2)

    print("KERNEL_OK")
</pallas_src>

<mosaic_0001>
module attributes {stable_mosaic.version = 11 : i64} {
  func.func @scorer_kernel(%arg0: i32, %arg1: memref<1024x32xbf16, #tpu.memory_space<vmem>>, %arg2: memref<32x32xbf16, #tpu.memory_space<vmem>>, %arg3: memref<1x32xf32, #tpu.memory_space<vmem>>, %arg4: memref<32x16xbf16, #tpu.memory_space<vmem>>, %arg5: memref<8x1xf32, #tpu.memory_space<vmem>>, %arg6: memref<8x16xf32, #tpu.memory_space<vmem>>, %arg7: memref<1x16xf32, #tpu.memory_space<vmem>>, %arg8: memref<1x1x128xf32, #tpu.memory_space<vmem>>) attributes {dimension_semantics = [#tpu.dimension_semantics<parallel>], iteration_bounds = array<i64: 1>, scalar_prefetch = 0 : i64, scratch_operands = 0 : i64, tpu.core_type = #tpu.core_type<tc>, window_params = [{transform_indices = @transform_0, window_bounds = array<i64: 1024, 32>}, {pipeline_mode = #tpu.pipeline_mode<synchronous>, transform_indices = @transform_1, window_bounds = array<i64: 32, 32>}, {pipeline_mode = #tpu.pipeline_mode<synchronous>, transform_indices = @transform_2, window_bounds = array<i64: 1, 32>}, {pipeline_mode = #tpu.pipeline_mode<synchronous>, transform_indices = @transform_3, window_bounds = array<i64: 32, 16>}, {pipeline_mode = #tpu.pipeline_mode<synchronous>, transform_indices = @transform_4, window_bounds = array<i64: 8, 1>}, {pipeline_mode = #tpu.pipeline_mode<synchronous>, transform_indices = @transform_5, window_bounds = array<i64: 8, 16>}, {pipeline_mode = #tpu.pipeline_mode<synchronous>, transform_indices = @transform_6, window_bounds = array<i64: 1, 16>}, {transform_indices = @transform_7, window_bounds = array<i64: 1, 1, 128>}]} {
    %c0 = arith.constant 0 : index
    %c0_0 = arith.constant 0 : index
    %0 = vector.load %arg1[%c0, %c0_0] : memref<1024x32xbf16, #tpu.memory_space<vmem>>, vector<1024x32xbf16>
    %c0_1 = arith.constant 0 : index
    %c0_2 = arith.constant 0 : index
    %1 = vector.load %arg2[%c0_1, %c0_2] : memref<32x32xbf16, #tpu.memory_space<vmem>>, vector<32x32xbf16>
    %cst = arith.constant dense<0.000000e+00> : vector<1024x32xf32>
    %2 = tpu.matmul %0, %1, %cst {dimension_numbers = #tpu.dot_dimension_numbers<[1], [0], [0], [1], [0, 0, 1, 1], [], []>} : vector<1024x32xbf16>, vector<32x32xbf16>, vector<1024x32xf32> -> vector<1024x32xf32>
    %c0_3 = arith.constant 0 : index
    %c0_4 = arith.constant 0 : index
    %3 = vector.load %arg3[%c0_3, %c0_4] : memref<1x32xf32, #tpu.memory_space<vmem>>, vector<1x32xf32>
    %4 = vector.broadcast %3 : vector<1x32xf32> to vector<1024x32xf32>
    %5 = arith.addf %2, %4 : vector<1024x32xf32>
    %cst_5 = arith.constant 0.000000e+00 : f32
    %6 = vector.broadcast %cst_5 : f32 to vector<1024x32xf32>
    %7 = arith.maximumf %5, %6 : vector<1024x32xf32>
    %8 = arith.truncf %7 : vector<1024x32xf32> to vector<1024x32xbf16>
    %c0_6 = arith.constant 0 : index
    %c0_7 = arith.constant 0 : index
    %9 = vector.load %arg4[%c0_6, %c0_7] : memref<32x16xbf16, #tpu.memory_space<vmem>>, vector<32x16xbf16>
    %cst_8 = arith.constant dense<0.000000e+00> : vector<1024x16xf32>
    %10 = tpu.matmul %8, %9, %cst_8 {dimension_numbers = #tpu.dot_dimension_numbers<[1], [0], [0], [1], [0, 0, 1, 1], [], []>} : vector<1024x32xbf16>, vector<32x16xbf16>, vector<1024x16xf32> -> vector<1024x16xf32>
    %11 = vector.shape_cast %10 : vector<1024x16xf32> to vector<128x8x16xf32>
    %c0_9 = arith.constant 0 : index
    %c0_10 = arith.constant 0 : index
    %12 = vector.load %arg5[%c0_9, %c0_10] : memref<8x1xf32, #tpu.memory_space<vmem>>, vector<8x1xf32>
    %13 = vector.shape_cast %12 : vector<8x1xf32> to vector<1x8x1xf32>
    %14 = vector.broadcast %13 : vector<1x8x1xf32> to vector<128x8x16xf32>
    %15 = arith.mulf %11, %14 : vector<128x8x16xf32>
    %c0_11 = arith.constant 0 : index
    %c0_12 = arith.constant 0 : index
    %16 = vector.load %arg6[%c0_11, %c0_12] : memref<8x16xf32, #tpu.memory_space<vmem>>, vector<8x16xf32>
    %17 = vector.shape_cast %16 : vector<8x16xf32> to vector<1x8x16xf32>
    %18 = vector.broadcast %17 : vector<1x8x16xf32> to vector<128x8x16xf32>
    %19 = arith.addf %15, %18 : vector<128x8x16xf32>
    %cst_13 = arith.constant 0.000000e+00 : f32
    %20 = vector.broadcast %cst_13 : f32 to vector<128x8x16xf32>
    %21 = arith.maximumf %19, %20 : vector<128x8x16xf32>
    %c0_14 = arith.constant 0 : index
    %c0_15 = arith.constant 0 : index
    %22 = vector.load %arg7[%c0_14, %c0_15] : memref<1x16xf32, #tpu.memory_space<vmem>>, vector<1x16xf32>
    %23 = vector.shape_cast %22 : vector<1x16xf32> to vector<1x1x16xf32>
    %24 = vector.broadcast %23 : vector<1x1x16xf32> to vector<128x8x16xf32>
    %25 = arith.mulf %21, %24 : vector<128x8x16xf32>
    %cst_16 = arith.constant dense<0.000000e+00> : vector<128x8xf32>
    %26 = vector.multi_reduction <add>, %25, %cst_16 [2] : vector<128x8x16xf32> to vector<128x8xf32>
    %cst_17 = arith.constant dense<0.000000e+00> : vector<128xf32>
    %27 = vector.multi_reduction <add>, %26, %cst_17 [1] : vector<128x8xf32> to vector<128xf32>
    %28 = vector.shape_cast %27 : vector<128xf32> to vector<1x1x128xf32>
    %c0_18 = arith.constant 0 : index
    %c0_19 = arith.constant 0 : index
    %c0_20 = arith.constant 0 : index
    %29 = vector.load %arg8[%c0_18, %c0_19, %c0_20] : memref<1x1x128xf32, #tpu.memory_space<vmem>>, vector<1x1x128xf32>
    tpu.vector_store %arg8[%c0_18, %c0_19, %c0_20], %28 {strides = array<i32>} : memref<1x1x128xf32, #tpu.memory_space<vmem>>, vector<1x1x128xf32>,
    return
  }
  func.func @transform_0(%arg0: i32) -> (i32, i32) {
    %c0_i32 = arith.constant 0 : i32
    %c0_i32_0 = arith.constant 0 : i32
    return %arg0, %c0_i32 : i32, i32
  }
  func.func @transform_1(%arg0: i32) -> (i32, i32) {
    %c0_i32 = arith.constant 0 : i32
    %c0_i32_0 = arith.constant 0 : i32
    %c0_i32_1 = arith.constant 0 : i32
    return %c0_i32, %c0_i32_0 : i32, i32
  }
  func.func @transform_2(%arg0: i32) -> (i32, i32) {
    %c0_i32 = arith.constant 0 : i32
    %c0_i32_0 = arith.constant 0 : i32
    %c0_i32_1 = arith.constant 0 : i32
    return %c0_i32, %c0_i32_0 : i32, i32
  }
  func.func @transform_3(%arg0: i32) -> (i32, i32) {
    %c0_i32 = arith.constant 0 : i32
    %c0_i32_0 = arith.constant 0 : i32
    %c0_i32_1 = arith.constant 0 : i32
    return %c0_i32, %c0_i32_0 : i32, i32
  }
  func.func @transform_4(%arg0: i32) -> (i32, i32) {
    %c0_i32 = arith.constant 0 : i32
    %c0_i32_0 = arith.constant 0 : i32
    %c0_i32_1 = arith.constant 0 : i32
    return %c0_i32, %c0_i32_0 : i32, i32
  }
  func.func @transform_5(%arg0: i32) -> (i32, i32) {
    %c0_i32 = arith.constant 0 : i32
    %c0_i32_0 = arith.constant 0 : i32
    %c0_i32_1 = arith.constant 0 : i32
    return %c0_i32, %c0_i32_0 : i32, i32
  }
  func.func @transform_6(%arg0: i32) -> (i32, i32) {
    %c0_i32 = arith.constant 0 : i32
    %c0_i32_0 = arith.constant 0 : i32
    %c0_i32_1 = arith.constant 0 : i32
    return %c0_i32, %c0_i32_0 : i32, i32
  }
  func.func @transform_7(%arg0: i32) -> (i32, i32, i32) {
    %c0_i32 = arith.constant 0 : i32
    %c0_i32_0 = arith.constant 0 : i32
    %c0_i32_1 = arith.constant 0 : i32
    return %arg0, %c0_i32, %c0_i32_0 : i32, i32, i32
  }
}

</mosaic_0001>

<bundles_post_ra>
// kernel: tpu_custom_call.1
= control target key start
LH: loop header
LB: loop body
LE: loop exit
PB: predicated region body
PF: predicated region fallthrough
CT: control target
= control target key end

     0   :  { %vm499_vm0 = vcmask 261120   ;;  %s6238_s0 = inlined_call_operand.vmem [shape: bf16[1024,32], index: 0, kind: input, shape index: {}]   ;;  %s6239_s1 = inlined_call_operand.vmem [shape: bf16[32,32], index: 1, kind: input, shape index: {}]   ;;  %s6240_s2 = inlined_call_operand.vmem [shape: f32[1,32], index: 2, kind: input, shape index: {}]   ;;  %s6241_s3 = inlined_call_operand.vmem [shape: bf16[32,16], index: 3, kind: input, shape index: {}]   ;;  %s6242_s4 = inlined_call_operand.vmem [shape: f32[8,1], index: 4, kind: input, shape index: {}]   ;;  %s6243_s5 = inlined_call_operand.vmem [shape: f32[8,16], index: 5, kind: input, shape index: {}]   ;;  %s6244_s6 = inlined_call_operand.vmem [shape: f32[1,16], index: 6, kind: input, shape index: {}]   ;;  %s6245_s7 = inlined_call_operand.hbm [shape: f32[1,1,128], index: 7, kind: output, shape index: {}]  }
   0x1   :  { %v4657_v0 = vld [vmem:[%s6239_s1 + $0x8] sm:$0xff]   ;;  %v4658_v1 = vld [vmem:[%s6239_s1] sm:$0xff]   ;;  %v4661_v4 = vld [vmem:[%s6238_s0 + $0x10] sm:$0xff]  }
   0x2   :  { %4390 = vmatprep.subr.bf16.mxu0 %v4657_v0  ;;  %v4659_v2 = vld [vmem:[%s6238_s0] sm:$0xff]   ;;  %v4660_v3 = vld [vmem:[%s6238_s0 + $0x8] sm:$0xff]   ;;  %v4662_v5 = vld [vmem:[%s6238_s0 + $0x18] sm:$0xff]  }
   0x3   :  { %4391 = vmatpush3.bf16.msra.mxu0 %v4657_v0  ;;  %4394 = vmatprep.mubr.msk.bf16.mxu0 %vm499_vm0, %v4659_v2  ;;  %v4663_v6 = vld [vmem:[%s6238_s0 + $0x20] sm:$0xff]   ;;  %v4664_v7 = vld [vmem:[%s6238_s0 + $0x28] sm:$0xff]   ;;  %v4665_v8 = vld [vmem:[%s6238_s0 + $0x30] sm:$0xff]  }
   0x4   :  { %4392 = vmatprep.subr.bf16.mxu0 %v4658_v1  ;;  %v4666_v9 = vld [vmem:[%s6238_s0 + $0x38] sm:$0xff]   ;;  %v4667_v10 = vld [vmem:[%s6238_s0 + $0x40] sm:$0xff]   ;;  %v4668_v11 = vld [vmem:[%s6238_s0 + $0x48] sm:$0xff]  }
   0x5   :  { %v4669_v12 = vld [vmem:[%s6238_s0 + $0x50] sm:$0xff]   ;;  %v4670_v13 = vld [vmem:[%s6238_s0 + $0x58] sm:$0xff]   ;;  %v4671_v14 = vld [vmem:[%s6238_s0 + $0x60] sm:$0xff]  }
   0x6   :  { %v4672_v15 = vld [vmem:[%s6238_s0 + $0x68] sm:$0xff]   ;;  %v4673_v16 = vld [vmem:[%s6238_s0 + $0x70] sm:$0xff]   ;;  %v4674_v17 = vld [vmem:[%s6238_s0 + $0x78] sm:$0xff]  }
   0x7   :  { %4393 = vmatpush3.bf16.msra.mxu0 %v4658_v1 }
   0xa   :  { %4395 = vmatmul.mubr.msk.bf16.vlgmr.msra.gmra.mxu0 %vm499_vm0, %v4660_v3 }
   0xb   :  { %4398 = vmatprep.mubr.msk.bf16.mxu0 %vm499_vm0, %v4661_v4 }
  0x12   :  { %4399 = vmatmul.mubr.msk.bf16.gmra.mxu0 %vm499_vm0, %v4662_v5 }
  0x13   :  { %4402 = vmatprep.mubr.msk.bf16.mxu0 %vm499_vm0, %v4663_v6 }
  0x1a   :  { %4403 = vmatmul.mubr.msk.bf16.gmra.mxu0 %vm499_vm0, %v4664_v7 }
  0x1b   :  { %4406 = vmatprep.mubr.msk.bf16.mxu0 %vm499_vm0, %v4665_v8 }
  0x22   :  { %4407 = vmatmul.mubr.msk.bf16.gmra.mxu0 %vm499_vm0, %v4666_v9 }
  0x23   :  { %4410 = vmatprep.mubr.msk.bf16.mxu0 %vm499_vm0, %v4667_v10 }
  0x2a   :  { %4411 = vmatmul.mubr.msk.bf16.gmra.mxu0 %vm499_vm0, %v4668_v11 }
  0x2b   :  { %4414 = vmatprep.mubr.msk.bf16.mxu0 %vm499_vm0, %v4669_v12 }
  0x32   :  { %4415 = vmatmul.mubr.msk.bf16.gmra.mxu0 %vm499_vm0, %v4670_v13 }
  0x33   :  { %4418 = vmatprep.mubr.msk.bf16.mxu0 %vm499_vm0, %v4671_v14 }
  0x3a   :  { %4419 = vmatmul.mubr.msk.bf16.gmra.mxu0 %vm499_vm0, %v4672_v15 }
  0x3b   :  { %4422 = vmatprep.mubr.msk.bf16.mxu0 %vm499_vm0, %v4673_v16 }
  0x3c   :  { %12 = vsyncpa [#allocation3], 0  ;;  %v4675_v18 = vld [vmem:[%s6238_s0 + $0x80] sm:$0xff]   ;;  %v4676_v19 = vld [vmem:[%s6238_s0 + $0x88] sm:$0xff]   ;;  %v4752_v43 = vmov 0   ;;  %vm2708_vm1 = vcmask 130048  }
  0x3d   :  { %v4677_v20 = vld [vmem:[%s6238_s0 + $0x90] sm:$0xff]   ;;  %v4678_v21 = vld [vmem:[%s6238_s0 + $0x98] sm:$0xff]   ;;  %v4709_v22 = vld [vmem:[%s6241_s3 + $0x8] sm:$0xff]   ;;  %4656 = vset.pattern.permute.xlu0 %v4752_v43  ;;  %vm3735_vm2 = vcmask 1041409   ;;  %vm3737_vm3 = vcmask 1042434   ;;  %vm3739_vm4 = vcmask 1043459  }
  0x3e   :  { %v4679_v23 = vld [vmem:[%s6238_s0 + $0xa0] sm:$0xff]   ;;  %4522 = vmatprep.subr.bf16.mxu1 %v4709_v22  ;;  %v4680_v25 = vld [vmem:[%s6238_s0 + $0xa8] sm:$0xff]   ;;  %v4681_v26 = vld [vmem:[%s6238_s0 + $0xb0] sm:$0xff]   ;;  %vm3741_vm5 = vcmask 1044484   ;;  %vm3743_vm6 = vcmask 1045509   ;;  %vm3745_vm7 = vcmask 1046534  }
  0x3f   :  { %4523 = vmatpush3.bf16.msra.mxu1 %v4709_v22  ;;  %v4712_v24 = vld [vmem:[%s6241_s3] sm:$0xff]   ;;  %v4682_v27 = vld [vmem:[%s6238_s0 + $0xb8] sm:$0xff]   ;;  %v4684_v29 = vld [vmem:[%s6238_s0 + $0xc8] sm:$0xff]   ;;  %vm3747_vm8 = vcmask 1047559   ;;  %vm3870_vm9 = vcmask 64512   ;;  %vm3944_vm10 = vcmask 130112  }
  0x40   :  { %4524 = vmatprep.subr.bf16.mxu1 %v4712_v24  ;;  %v4683_v28 = vld [vmem:[%s6238_s0 + $0xc0] sm:$0xff]   ;;  %v4685_v30 = vld [vmem:[%s6238_s0 + $0xd0] sm:$0xff]   ;;  %v4686_v31 = vld [vmem:[%s6238_s0 + $0xd8] sm:$0xff]   ;;  %vm3951_vm11 = vcmask 195712   ;;  %vm3958_vm12 = vcmask 261312   ;;  %vm3965_vm13 = vcmask 326912  }
  0x41   :  { %v4687_v32 = vld [vmem:[%s6238_s0 + $0xe0] sm:$0xff]   ;;  %v4688_v33 = vld [vmem:[%s6238_s0 + $0xe8] sm:$0xff]   ;;  %v4689_v34 = vld [vmem:[%s6238_s0 + $0xf0] sm:$0xff]   ;;  %vm3972_vm14 = vcmask 392512   ;;  %vm3979_vm15 = vcmask 458112  }
  0x42   :  { %4423 = vmatmul.mubr.msk.bf16.gmra.mxu0 %vm499_vm0, %v4674_v17  ;;  %v4690_v35 = vld [vmem:[%s6238_s0 + $0xf8] sm:$0xff]   ;;  %v4691_v36 = vld [vmem:[%s6238_s0 + $0x100] sm:$0xff]   ;;  %v4692_v37 = vld [vmem:[%s6238_s0 + $0x108] sm:$0xff]  }
  0x43   :  { %4426 = vmatprep.mubr.msk.bf16.mxu0 %vm499_vm0, %v4675_v18  ;;  %4525 = vmatpush3.bf16.msra.mxu1 %v4712_v24  ;;  %v4693_v38 = vld [vmem:[%s6238_s0 + $0x110] sm:$0xff]   ;;  %v4694_v39 = vld [vmem:[%s6238_s0 + $0x118] sm:$0xff]   ;;  %v4695_v40 = vld [vmem:[%s6238_s0 + $0x120] sm:$0xff]  }
  0x44   :  { %v4696_v41 = vld [vmem:[%s6238_s0 + $0x128] sm:$0xff]   ;;  %v4697_v42 = vld [vmem:[%s6238_s0 + $0x130] sm:$0xff]   ;;  %v2182_v44 = vld [vmem:[%s6242_s4] sm:$0xff] }
  0x45   :  { %2185 = vperm.xlu0 %4656, %v2182_v44   ;;  %v4698_v45 = vld [vmem:[%s6238_s0 + $0x138] sm:$0xff]   ;;  %v4699_v46 = vld [vmem:[%s6238_s0 + $0x140] sm:$0xff]   ;;  %v4700_v47 = vld [vmem:[%s6238_s0 + $0x148] sm:$0xff]  }
  0x46   :  { %v4701_v48 = vld [vmem:[%s6238_s0 + $0x150] sm:$0xff]   ;;  %v4702_v49 = vld [vmem:[%s6238_s0 + $0x158] sm:$0xff]   ;;  %v4703_v50 = vld [vmem:[%s6238_s0 + $0x160] sm:$0xff]  }
  0x47   :  { %v4704_v51 = vld [vmem:[%s6238_s0 + $0x168] sm:$0xff]   ;;  %v4705_v52 = vld [vmem:[%s6238_s0 + $0x170] sm:$0xff]   ;;  %v4706_v53 = vld [vmem:[%s6238_s0 + $0x178] sm:$0xff]  }
  0x48   :  { %v4707_v54 = vld [vmem:[%s6238_s0 + $0x180] sm:$0xff]   ;;  %v4708_v55 = vld [vmem:[%s6238_s0 + $0x188] sm:$0xff]   ;;  %v4710_v56 = vld [vmem:[%s6238_s0 + $0x190] sm:$0xff]  }
  0x49   :  { %v5016_v59 = vld [vmem:[%s6240_s2] ss:$0 sm:$0xff]  ;;  %v4711_v61 = vld [vmem:[%s6238_s0 + $0x198] sm:$0xff]   ;;  %v4714_v14 = vld [vmem:[%s6238_s0 + $0x1a8] sm:$0xff]  }
  0x4a   :  { %4427 = vmatmul.mubr.msk.bf16.gmra.mxu0 %vm499_vm0, %v4676_v19  ;;  %v4713_v0 = vld [vmem:[%s6238_s0 + $0x1a0] sm:$0xff]   ;;  %v4715_v17 = vld [vmem:[%s6238_s0 + $0x1b0] sm:$0xff]  }
  0x4b   :  { %4430 = vmatprep.mubr.msk.bf16.mxu0 %vm499_vm0, %v4677_v20 }
  0x52   :  { %4431 = vmatmul.mubr.msk.bf16.gmra.mxu0 %vm499_vm0, %v4678_v21 }
  0x53   :  { %4434 = vmatprep.mubr.msk.bf16.mxu0 %vm499_vm0, %v4679_v23 }
  0x5a   :  { %4435 = vmatmul.mubr.msk.bf16.gmra.mxu0 %vm499_vm0, %v4680_v25 }
  0x5b   :  { %4438 = vmatprep.mubr.msk.bf16.mxu0 %vm499_vm0, %v4681_v26 }
  0x62   :  { %4439 = vmatmul.mubr.msk.bf16.gmra.mxu0 %vm499_vm0, %v4682_v27 }
  0x63   :  { %4442 = vmatprep.mubr.msk.bf16.mxu0 %vm499_vm0, %v4683_v28 }
  0x6a   :  { %4443 = vmatmul.mubr.msk.bf16.gmra.mxu0 %vm499_vm0, %v4684_v29 }
  0x6b   :  { %4446 = vmatprep.mubr.msk.bf16.mxu0 %vm499_vm0, %v4685_v30 }
  0x72   :  { %4447 = vmatmul.mubr.msk.bf16.gmra.mxu0 %vm499_vm0, %v4686_v31  ;;  %v4716_v31 = vld [vmem:[%s6238_s0 + $0x1b8] sm:$0xff]  }
  0x73   :  { %4450 = vmatprep.mubr.msk.bf16.mxu0 %vm499_vm0, %v4687_v32 }
  0x7a   :  { %4451 = vmatmul.mubr.msk.bf16.gmra.mxu0 %vm499_vm0, %v4688_v33  ;;  %v4717_v33 = vld [vmem:[%s6238_s0 + $0x1c0] sm:$0xff]  }
  0x7b   :  { %4454 = vmatprep.mubr.msk.bf16.mxu0 %vm499_vm0, %v4689_v34 }
  0x82   :  { %4455 = vmatmul.mubr.msk.bf16.gmra.mxu0 %vm499_vm0, %v4690_v35 }
  0x83   :  { %4458 = vmatprep.mubr.msk.bf16.mxu0 %vm499_vm0, %v4691_v36 }
  0x8a   :  { %4459 = vmatmul.mubr.msk.bf16.gmra.mxu0 %vm499_vm0, %v4692_v37 }
  0x8b   :  { %4462 = vmatprep.mubr.msk.bf16.mxu0 %vm499_vm0, %v4693_v38 }
  0x92   :  { %4463 = vmatmul.mubr.msk.bf16.gmra.mxu0 %vm499_vm0, %v4694_v39 }
  0x93   :  { %4466 = vmatprep.mubr.msk.bf16.mxu0 %vm499_vm0, %v4695_v40 }
  0x9a   :  { %4467 = vmatmul.mubr.msk.bf16.gmra.mxu0 %vm499_vm0, %v4696_v41 }
  0x9b   :  { %4470 = vmatprep.mubr.msk.bf16.mxu0 %vm499_vm0, %v4697_v42 }
  0xa2   :  { %4471 = vmatmul.mubr.msk.bf16.gmra.mxu0 %vm499_vm0, %v4698_v45 }
  0xa3   :  { %4474 = vmatprep.mubr.msk.bf16.mxu0 %vm499_vm0, %v4699_v46 }
  0xaa   :  { %4475 = vmatmul.mubr.msk.bf16.gmra.mxu0 %vm499_vm0, %v4700_v47  ;;  %v4718_v47 = vld [vmem:[%s6238_s0 + $0x1c8] sm:$0xff]  }
  0xab   :  { %4478 = vmatprep.mubr.msk.bf16.mxu0 %vm499_vm0, %v4701_v48 }
  0xb2   :  { %4479 = vmatmul.mubr.msk.bf16.gmra.mxu0 %vm499_vm0, %v4702_v49  ;;  %v4719_v49 = vld [vmem:[%s6238_s0 + $0x1d0] sm:$0xff]  }
  0xb3   :  { %4482 = vmatprep.mubr.msk.bf16.mxu0 %vm499_vm0, %v4703_v50 }
  0xba   :  { %4483 = vmatmul.mubr.msk.bf16.gmra.mxu0 %vm499_vm0, %v4704_v51 }
  0xbb   :  { %4486 = vmatprep.mubr.msk.bf16.mxu0 %vm499_vm0, %v4705_v52 }
  0xc2   :  { %4487 = vmatmul.mubr.msk.bf16.gmra.mxu0 %vm499_vm0, %v4706_v53 }
  0xc3   :  { %4490 = vmatprep.mubr.msk.bf16.mxu0 %vm499_vm0, %v4707_v54 }
  0xca   :  { %v4396_v57 = vpop.f32.mrf.mxu0  ;;  %4491 = vmatmul.mubr.msk.bf16.gmra.mxu0 %vm499_vm0, %v4708_v55 }
  0xcb   :  { %4494 = vmatprep.mubr.msk.bf16.mxu0 %vm499_vm0, %v4710_v56  ;;  %v735_v1 = vadd.f32 %v4396_v57, %v5016_v59 }
  0xcc   :  { %v726_v58 = vpop.f32.mrf.mxu0 }
  0xcd   :  { %v727_v62 = vadd.f32 %v5016_v59, %v726_v58  ;;  %v1239_v8 = vmax.f32 %v735_v1, 0.0 }
  0xce   :  { %v4397_v60 = vpop.f32.mrf.mxu0 }
  0xcf   :  { %v738_v63 = vadd.f32 %v4397_v60, %v5016_v59  ;;  %v1237_v6 = vmax.f32 %v727_v62, 0.0 }
  0xd0   :  { %v729_v2 = vpop.f32.mrf.mxu0 }
  0xd1   :  { %v730_v3 = vadd.f32 %v5016_v59, %v729_v2  ;;  %v1240_v4 = vmax.f32 %v738_v63, 0.0  ;;  %v4721_v2 = vld [vmem:[%s6238_s0 + $0x1e0] sm:$0xff]  }
  0xd2   :  { %v4400_v5 = vpop.f32.mrf.mxu0  ;;  %4495 = vmatmul.mubr.msk.bf16.gmra.mxu0 %vm499_vm0, %v4711_v61 }
  0xd3   :  { %v1238_v7 = vmax.f32 %v730_v3, 0.0  ;;  %4498 = vmatprep.mubr.msk.bf16.mxu0 %vm499_vm0, %v4713_v0  ;;  %v1366_v11 = vpack.c.bf16 %v1240_v4, %v1239_v8  ;;  %v751_v12 = vadd.f32 %v4400_v5, %v5016_v59  ;;  %v4720_v0 = vld [vmem:[%s6238_s0 + $0x1d8] sm:$0xff]  }
  0xd4   :  { %v742_v9 = vpop.f32.mrf.mxu0 }
  0xd5   :  { %v1365_v10 = vpack.c.bf16 %v1238_v7, %v1237_v6  ;;  %v743_v15 = vadd.f32 %v5016_v59, %v742_v9  ;;  %v1243_v20 = vmax.f32 %v751_v12, 0.0 }
  0xd6   :  { %v4401_v13 = vpop.f32.mrf.mxu0 }
  0xd7   :  { %v754_v16 = vadd.f32 %v4401_v13, %v5016_v59  ;;  %4526 = vmatprep.mubr.msk.bf16.mxu1 %vm499_vm0, %v1365_v10  ;;  %v1241_v23 = vmax.f32 %v743_v15, 0.0 }
  0xd8   :  { %v745_v18 = vpop.f32.mrf.mxu0  ;;  %4527 = vmatmul.mubr.msk.bf16.vlgmr.msra.gmra.mxu1 %vm499_vm0, %v1366_v11 }
  0xd9   :  { %v746_v19 = vadd.f32 %v5016_v59, %v745_v18  ;;  %v1244_v21 = vmax.f32 %v754_v16, 0.0  ;;  %v4722_v16 = vld [vmem:[%s6238_s0 + $0x1e8] sm:$0xff]   ;;  %v4723_v18 = vld [vmem:[%s6238_s0 + $0x1f0] sm:$0xff]  }
  0xda   :  { %v4404_v22 = vpop.f32.mrf.mxu0  ;;  %4499 = vmatmul.mubr.msk.bf16.gmra.mxu0 %vm499_vm0, %v4714_v14 }
  0xdb   :  { %v1242_v24 = vmax.f32 %v746_v19, 0.0  ;;  %4502 = vmatprep.mubr.msk.bf16.mxu0 %vm499_vm0, %v4715_v17  ;;  %v767_v25 = vadd.f32 %v4404_v22, %v5016_v59  ;;  %v1368_v29 = vpack.c.bf16 %v1244_v21, %v1243_v20 }
  0xdc   :  { %v758_v26 = vpop.f32.mrf.mxu0 }
  0xdd   :  { %v1367_v27 = vpack.c.bf16 %v1242_v24, %v1241_v23  ;;  %v759_v28 = vadd.f32 %v5016_v59, %v758_v26  ;;  %v1247_v34 = vmax.f32 %v767_v25, 0.0 }
  0xde   :  { %v4405_v30 = vpop.f32.mrf.mxu0 }
  0xdf   :  { %v770_v32 = vadd.f32 %v4405_v30, %v5016_v59  ;;  %4530 = vmatprep.mubr.msk.bf16.mxu1 %vm499_vm0, %v1367_v27  ;;  %v1245_v36 = vmax.f32 %v759_v28, 0.0 }
  0xe0   :  { %v761_v35 = vpop.f32.mrf.mxu0  ;;  %4531 = vmatmul.mubr.msk.bf16.gmra.mxu1 %vm499_vm0, %v1368_v29 }
  0xe1   :  { %v1248_v37 = vmax.f32 %v770_v32, 0.0  ;;  %v762_v38 = vadd.f32 %v5016_v59, %v761_v35  ;;  %v4724_v32 = vld [vmem:[%s6238_s0 + $0x1f8] sm:$0xff]  }
  0xe2   :  { %v4408_v39 = vpop.f32.mrf.mxu0  ;;  %4503 = vmatmul.mubr.msk.bf16.gmra.mxu0 %vm499_vm0, %v4716_v31 }
  0xe3   :  { %v1246_v40 = vmax.f32 %v762_v38, 0.0  ;;  %4506 = vmatprep.mubr.msk.bf16.mxu0 %vm499_vm0, %v4717_v33  ;;  %v1370_v41 = vpack.c.bf16 %v1248_v37, %v1247_v34  ;;  %v783_v42 = vadd.f32 %v4408_v39, %v5016_v59 }
  0xe4   :  { %v774_v43 = vpop.f32.mrf.mxu0 }
  0xe5   :  { %v1369_v44 = vpack.c.bf16 %v1246_v40, %v1245_v36  ;;  %v775_v45 = vadd.f32 %v5016_v59, %v774_v43  ;;  %v1251_v50 = vmax.f32 %v783_v42, 0.0 }
  0xe6   :  { %v4409_v46 = vpop.f32.mrf.mxu0 }
  0xe7   :  { %v786_v48 = vadd.f32 %v4409_v46, %v5016_v59  ;;  %4534 = vmatprep.mubr.msk.bf16.mxu1 %vm499_vm0, %v1369_v44  ;;  %v1249_v52 = vmax.f32 %v775_v45, 0.0 }
  0xe8   :  { %v777_v51 = vpop.f32.mrf.mxu0  ;;  %4535 = vmatmul.mubr.msk.bf16.gmra.mxu1 %vm499_vm0, %v1370_v41 }
  0xe9   :  { %v1252_v53 = vmax.f32 %v786_v48, 0.0  ;;  %v778_v54 = vadd.f32 %v5016_v59, %v777_v51 }
  0xea   :  { %v4412_v55 = vpop.f32.mrf.mxu0  ;;  %4507 = vmatmul.mubr.msk.bf16.gmra.mxu0 %vm499_vm0, %v4718_v47 }
  0xeb   :  { %v1250_v56 = vmax.f32 %v778_v54, 0.0  ;;  %4510 = vmatprep.mubr.msk.bf16.mxu0 %vm499_vm0, %v4719_v49  ;;  %v1372_v57 = vpack.c.bf16 %v1252_v53, %v1251_v50  ;;  %v799_v58 = vadd.f32 %v4412_v55, %v5016_v59 }
  0xec   :  { %v790_v60 = vpop.f32.mrf.mxu0 }
  0xed   :  { %v1371_v61 = vpack.c.bf16 %v1250_v56, %v1249_v52  ;;  %v791_v62 = vadd.f32 %v5016_v59, %v790_v60  ;;  %v1255_v3 = vmax.f32 %v799_v58, 0.0 }
  0xee   :  { %v4413_v63 = vpop.f32.mrf.mxu0 }
  0xef   :  { %v802_v1 = vadd.f32 %v4413_v63, %v5016_v59  ;;  %4538 = vmatprep.mubr.msk.bf16.mxu1 %vm499_vm0, %v1371_v61  ;;  %v1253_v5 = vmax.f32 %v791_v62, 0.0 }
  0xf0   :  { %v793_v4 = vpop.f32.mrf.mxu0  ;;  %4539 = vmatmul.mubr.msk.bf16.gmra.mxu1 %vm499_vm0, %v1372_v57 }
  0xf1   :  { %v1256_v6 = vmax.f32 %v802_v1, 0.0  ;;  %v794_v7 = vadd.f32 %v5016_v59, %v793_v4 }
  0xf2   :  { %v4416_v8 = vpop.f32.mrf.mxu0  ;;  %4511 = vmatmul.mubr.msk.bf16.gmra.mxu0 %vm499_vm0, %v4720_v0 }
  0xf3   :  { %v1254_v9 = vmax.f32 %v794_v7, 0.0  ;;  %4514 = vmatprep.mubr.msk.bf16.mxu0 %vm499_vm0, %v4721_v2  ;;  %v1374_v10 = vpack.c.bf16 %v1256_v6, %v1255_v3  ;;  %v815_v11 = vadd.f32 %v4416_v8, %v5016_v59 }
  0xf4   :  { %v806_v12 = vpop.f32.mrf.mxu0 }
  0xf5   :  { %v1373_v13 = vpack.c.bf16 %v1254_v9, %v1253_v5  ;;  %v807_v14 = vadd.f32 %v5016_v59, %v806_v12  ;;  %v1259_v19 = vmax.f32 %v815_v11, 0.0 }
  0xf6   :  { %v4417_v15 = vpop.f32.mrf.mxu0 }
  0xf7   :  { %v818_v17 = vadd.f32 %v4417_v15, %v5016_v59  ;;  %4542 = vmatprep.mubr.msk.bf16.mxu1 %vm499_vm0, %v1373_v13  ;;  %v1257_v21 = vmax.f32 %v807_v14, 0.0 }
  0xf8   :  { %v809_v20 = vpop.f32.mrf.mxu0  ;;  %4543 = vmatmul.mubr.msk.bf16.gmra.mxu1 %vm499_vm0, %v1374_v10 }
  0xf9   :  { %v1260_v22 = vmax.f32 %v818_v17, 0.0  ;;  %v810_v23 = vadd.f32 %v5016_v59, %v809_v20 }
  0xfa   :  { %v4420_v24 = vpop.f32.mrf.mxu0  ;;  %4515 = vmatmul.mubr.msk.bf16.gmra.mxu0 %vm499_vm0, %v4722_v16 }
  0xfb   :  { %v1258_v25 = vmax.f32 %v810_v23, 0.0  ;;  %4518 = vmatprep.mubr.msk.bf16.mxu0 %vm499_vm0, %v4723_v18  ;;  %v1376_v26 = vpack.c.bf16 %v1260_v22, %v1259_v19  ;;  %v831_v27 = vadd.f32 %v4420_v24, %v5016_v59 }
  0xfc   :  { %v822_v28 = vpop.f32.mrf.mxu0 }
  0xfd   :  { %v1375_v29 = vpack.c.bf16 %v1258_v25, %v1257_v21  ;;  %v823_v30 = vadd.f32 %v5016_v59, %v822_v28  ;;  %v1263_v34 = vmax.f32 %v831_v27, 0.0 }
  0xfe   :  { %v4421_v31 = vpop.f32.mrf.mxu0 }
  0xff   :  { %v834_v33 = vadd.f32 %v4421_v31, %v5016_v59  ;;  %4546 = vmatprep.mubr.msk.bf16.mxu1 %vm499_vm0, %v1375_v29  ;;  %v1261_v36 = vmax.f32 %v823_v30, 0.0 }
 0x100   :  { %v825_v35 = vpop.f32.mrf.mxu0  ;;  %4547 = vmatmul.mubr.msk.bf16.gmra.mxu1 %vm499_vm0, %v1376_v26 }
 0x101   :  { %v1264_v37 = vmax.f32 %v834_v33, 0.0  ;;  %v826_v38 = vadd.f32 %v5016_v59, %v825_v35 }
 0x102   :  { %v4424_v39 = vpop.f32.mrf.mxu0  ;;  %4519 = vmatmul.mubr.msk.bf16.gmra.mxu0 %vm499_vm0, %v4724_v32 }
 0x103   :  { %v1262_v40 = vmax.f32 %v826_v38, 0.0  ;;  %v1378_v41 = vpack.c.bf16 %v1264_v37, %v1263_v34  ;;  %v847_v42 = vadd.f32 %v4424_v39, %v5016_v59 }
 0x104   :  { %v838_v43 = vpop.f32.mrf.mxu0 }
 0x105   :  { %v1377_v44 = vpack.c.bf16 %v1262_v40, %v1261_v36  ;;  %v839_v45 = vadd.f32 %v5016_v59, %v838_v43  ;;  %v1267_v48 = vmax.f32 %v847_v42, 0.0 }
 0x106   :  { %v4425_v46 = vpop.f32.mrf.mxu0 }
 0x107   :  { %v850_v47 = vadd.f32 %v4425_v46, %v5016_v59  ;;  %4550 = vmatprep.mubr.msk.bf16.mxu1 %vm499_vm0, %v1377_v44  ;;  %v1265_v50 = vmax.f32 %v839_v45, 0.0 }
 0x108   :  { %v841_v49 = vpop.f32.mrf.mxu0  ;;  %4551 = vmatmul.mubr.msk.bf16.gmra.mxu1 %vm499_vm0, %v1378_v41 }
 0x109   :  { %v1268_v51 = vmax.f32 %v850_v47, 0.0  ;;  %v842_v52 = vadd.f32 %v5016_v59, %v841_v49 }
 0x10a   :  { %v4428_v53 = vpop.f32.mrf.mxu0 }
 0x10b   :  { %v1266_v54 = vmax.f32 %v842_v52, 0.0  ;;  %v1380_v55 = vpack.c.bf16 %v1268_v51, %v1267_v48  ;;  %v863_v56 = vadd.f32 %v4428_v53, %v5016_v59 }
 0x10c   :  { %v854_v57 = vpop.f32.mrf.mxu0 }
 0x10d   :  { %v1379_v58 = vpack.c.bf16 %v1266_v54, %v1265_v50  ;;  %v855_v60 = vadd.f32 %v5016_v59, %v854_v57  ;;  %v1271_v63 = vmax.f32 %v863_v56, 0.0 }
 0x10e   :  { %v4429_v61 = vpop.f32.mrf.mxu0 }
 0x10f   :  { %v866_v62 = vadd.f32 %v4429_v61, %v5016_v59  ;;  %4554 = vmatprep.mubr.msk.bf16.mxu1 %vm499_vm0, %v1379_v58  ;;  %v1269_v1 = vmax.f32 %v855_v60, 0.0 }
 0x110   :  { %v857_v0 = vpop.f32.mrf.mxu0  ;;  %4555 = vmatmul.mubr.msk.bf16.gmra.mxu1 %vm499_vm0, %v1380_v55 }
 0x111   :  { %v1272_v2 = vmax.f32 %v866_v62, 0.0  ;;  %v858_v3 = vadd.f32 %v5016_v59, %v857_v0 }
 0x112   :  { %v4432_v4 = vpop.f32.mrf.mxu0 }
 0x113   :  { %v1270_v5 = vmax.f32 %v858_v3, 0.0  ;;  %v1382_v6 = vpack.c.bf16 %v1272_v2, %v1271_v63  ;;  %v879_v7 = vadd.f32 %v4432_v4, %v5016_v59 }
 0x114   :  { %v870_v8 = vpop.f32.mrf.mxu0 }
 0x115   :  { %v1381_v9 = vpack.c.bf16 %v1270_v5, %v1269_v1  ;;  %v871_v10 = vadd.f32 %v5016_v59, %v870_v8  ;;  %v1275_v13 = vmax.f32 %v879_v7, 0.0 }
 0x116   :  { %v4433_v11 = vpop.f32.mrf.mxu0 }
 0x117   :  { %v882_v12 = vadd.f32 %v4433_v11, %v5016_v59  ;;  %4558 = vmatprep.mubr.msk.bf16.mxu1 %vm499_vm0, %v1381_v9  ;;  %v1273_v15 = vmax.f32 %v871_v10, 0.0 }
 0x118   :  { %v873_v14 = vpop.f32.mrf.mxu0  ;;  %4559 = vmatmul.mubr.msk.bf16.gmra.mxu1 %vm499_vm0, %v1382_v6 }
 0x119   :  { %v1276_v16 = vmax.f32 %v882_v12, 0.0  ;;  %v874_v17 = vadd.f32 %v5016_v59, %v873_v14 }
 0x11a   :  { %v4436_v18 = vpop.f32.mrf.mxu0 }
 0x11b   :  { %v1274_v19 = vmax.f32 %v874_v17, 0.0  ;;  %v1384_v20 = vpack.c.bf16 %v1276_v16, %v1275_v13  ;;  %v895_v21 = vadd.f32 %v4436_v18, %v5016_v59 }
 0x11c   :  { %v886_v22 = vpop.f32.mrf.mxu0 }
 0x11d   :  { %v1383_v23 = vpack.c.bf16 %v1274_v19, %v1273_v15  ;;  %v887_v24 = vadd.f32 %v5016_v59, %v886_v22  ;;  %v1279_v27 = vmax.f32 %v895_v21, 0.0 }
 0x11e   :  { %v4437_v25 = vpop.f32.mrf.mxu0 }
 0x11f   :  { %v898_v26 = vadd.f32 %v4437_v25, %v5016_v59  ;;  %4562 = vmatprep.mubr.msk.bf16.mxu1 %vm499_vm0, %v1383_v23  ;;  %v1277_v29 = vmax.f32 %v887_v24, 0.0 }
 0x120   :  { %v889_v28 = vpop.f32.mrf.mxu0  ;;  %4563 = vmatmul.mubr.msk.bf16.gmra.mxu1 %vm499_vm0, %v1384_v20 }
 0x121   :  { %v1280_v30 = vmax.f32 %v898_v26, 0.0  ;;  %v890_v31 = vadd.f32 %v5016_v59, %v889_v28 }
 0x122   :  { %v4440_v32 = vpop.f32.mrf.mxu0 }
 0x123   :  { %v1278_v33 = vmax.f32 %v890_v31, 0.0  ;;  %v1386_v34 = vpack.c.bf16 %v1280_v30, %v1279_v27  ;;  %v911_v35 = vadd.f32 %v4440_v32, %v5016_v59 }
 0x124   :  { %v902_v36 = vpop.f32.mrf.mxu0 }
 0x125   :  { %v1385_v37 = vpack.c.bf16 %v1278_v33, %v1277_v29  ;;  %v903_v38 = vadd.f32 %v5016_v59, %v902_v36  ;;  %v1283_v41 = vmax.f32 %v911_v35, 0.0 }
 0x126   :  { %v4441_v39 = vpop.f32.mrf.mxu0 }
 0x127   :  { %v914_v40 = vadd.f32 %v4441_v39, %v5016_v59  ;;  %4566 = vmatprep.mubr.msk.bf16.mxu1 %vm499_vm0, %v1385_v37  ;;  %v1281_v43 = vmax.f32 %v903_v38, 0.0 }
 0x128   :  { %v905_v42 = vpop.f32.mrf.mxu0  ;;  %4567 = vmatmul.mubr.msk.bf16.gmra.mxu1 %vm499_vm0, %v1386_v34 }
 0x129   :  { %v1284_v44 = vmax.f32 %v914_v40, 0.0  ;;  %v906_v45 = vadd.f32 %v5016_v59, %v905_v42 }
 0x12a   :  { %v4444_v46 = vpop.f32.mrf.mxu0 }
 0x12b   :  { %v1282_v47 = vmax.f32 %v906_v45, 0.0  ;;  %v1388_v48 = vpack.c.bf16 %v1284_v44, %v1283_v41  ;;  %v927_v49 = vadd.f32 %v4444_v46, %v5016_v59 }
 0x12c   :  { %v918_v50 = vpop.f32.mrf.mxu0 }
 0x12d   :  { %v1387_v51 = vpack.c.bf16 %v1282_v47, %v1281_v43  ;;  %v919_v52 = vadd.f32 %v5016_v59, %v918_v50  ;;  %v1287_v55 = vmax.f32 %v927_v49, 0.0 }
 0x12e   :  { %v4445_v53 = vpop.f32.mrf.mxu0 }
 0x12f   :  { %v930_v54 = vadd.f32 %v4445_v53, %v5016_v59  ;;  %4570 = vmatprep.mubr.msk.bf16.mxu1 %vm499_vm0, %v1387_v51  ;;  %v1285_v57 = vmax.f32 %v919_v52, 0.0 }
 0x130   :  { %v921_v56 = vpop.f32.mrf.mxu0  ;;  %4571 = vmatmul.mubr.msk.bf16.gmra.mxu1 %vm499_vm0, %v1388_v48 }
 0x131   :  { %v1288_v58 = vmax.f32 %v930_v54, 0.0  ;;  %v922_v60 = vadd.f32 %v5016_v59, %v921_v56 }
 0x132   :  { %v4448_v61 = vpop.f32.mrf.mxu0 }
 0x133   :  { %v1286_v62 = vmax.f32 %v922_v60, 0.0  ;;  %v1390_v63 = vpack.c.bf16 %v1288_v58, %v1287_v55  ;;  %v943_v0 = vadd.f32 %v4448_v61, %v5016_v59 }
 0x134   :  { %v934_v1 = vpop.f32.mrf.mxu0 }
 0x135   :  { %v1389_v2 = vpack.c.bf16 %v1286_v62, %v1285_v57  ;;  %v935_v3 = vadd.f32 %v5016_v59, %v934_v1  ;;  %v1291_v6 = vmax.f32 %v943_v0, 0.0 }
 0x136   :  { %v4449_v4 = vpop.f32.mrf.mxu0 }
 0x137   :  { %v946_v5 = vadd.f32 %v4449_v4, %v5016_v59  ;;  %4574 = vmatprep.mubr.msk.bf16.mxu1 %vm499_vm0, %v1389_v2  ;;  %v1289_v8 = vmax.f32 %v935_v3, 0.0 }
 0x138   :  { %v937_v7 = vpop.f32.mrf.mxu0  ;;  %4575 = vmatmul.mubr.msk.bf16.gmra.mxu1 %vm499_vm0, %v1390_v63 }
 0x139   :  { %v1292_v9 = vmax.f32 %v946_v5, 0.0  ;;  %v938_v10 = vadd.f32 %v5016_v59, %v937_v7 }
 0x13a   :  { %v4452_v11 = vpop.f32.mrf.mxu0 }
 0x13b   :  { %v1290_v12 = vmax.f32 %v938_v10, 0.0  ;;  %v1392_v13 = vpack.c.bf16 %v1292_v9, %v1291_v6  ;;  %v959_v14 = vadd.f32 %v4452_v11, %v5016_v59 }
 0x13c   :  { %v950_v15 = vpop.f32.mrf.mxu0 }
 0x13d   :  { %v1391_v16 = vpack.c.bf16 %v1290_v12, %v1289_v8  ;;  %v951_v17 = vadd.f32 %v5016_v59, %v950_v15  ;;  %v1295_v20 = vmax.f32 %v959_v14, 0.0 }
 0x13e   :  { %v4453_v18 = vpop.f32.mrf.mxu0 }
 0x13f   :  { %v962_v19 = vadd.f32 %v4453_v18, %v5016_v59  ;;  %4578 = vmatprep.mubr.msk.bf16.mxu1 %vm499_vm0, %v1391_v16  ;;  %v1293_v22 = vmax.f32 %v951_v17, 0.0 }
 0x140   :  { %v953_v21 = vpop.f32.mrf.mxu0  ;;  %4579 = vmatmul.mubr.msk.bf16.gmra.mxu1 %vm499_vm0, %v1392_v13 }
 0x141   :  { %v1296_v23 = vmax.f32 %v962_v19, 0.0  ;;  %v954_v24 = vadd.f32 %v5016_v59, %v953_v21 }
 0x142   :  { %v4456_v25 = vpop.f32.mrf.mxu0 }
 0x143   :  { %v1294_v26 = vmax.f32 %v954_v24, 0.0  ;;  %v1394_v27 = vpack.c.bf16 %v1296_v23, %v1295_v20  ;;  %v975_v28 = vadd.f32 %v4456_v25, %v5016_v59 }
 0x144   :  { %v966_v29 = vpop.f32.mrf.mxu0 }
 0x145   :  { %v1393_v30 = vpack.c.bf16 %v1294_v26, %v1293_v22  ;;  %v967_v31 = vadd.f32 %v5016_v59, %v966_v29  ;;  %v1299_v34 = vmax.f32 %v975_v28, 0.0 }
 0x146   :  { %v4457_v32 = vpop.f32.mrf.mxu0 }
 0x147   :  { %v978_v33 = vadd.f32 %v4457_v32, %v5016_v59  ;;  %4582 = vmatprep.mubr.msk.bf16.mxu1 %vm499_vm0, %v1393_v30  ;;  %v1297_v36 = vmax.f32 %v967_v31, 0.0 }
 0x148   :  { %v969_v35 = vpop.f32.mrf.mxu0  ;;  %4583 = vmatmul.mubr.msk.bf16.gmra.mxu1 %vm499_vm0, %v1394_v27 }
 0x149   :  { %v1300_v37 = vmax.f32 %v978_v33, 0.0  ;;  %v970_v38 = vadd.f32 %v5016_v59, %v969_v35 }
 0x14a   :  { %v4460_v39 = vpop.f32.mrf.mxu0 }
 0x14b   :  { %v1298_v40 = vmax.f32 %v970_v38, 0.0  ;;  %v1396_v41 = vpack.c.bf16 %v1300_v37, %v1299_v34  ;;  %v991_v42 = vadd.f32 %v4460_v39, %v5016_v59 }
 0x14c   :  { %v982_v43 = vpop.f32.mrf.mxu0 }
 0x14d   :  { %v1395_v44 = vpack.c.bf16 %v1298_v40, %v1297_v36  ;;  %v983_v45 = vadd.f32 %v5016_v59, %v982_v43  ;;  %v1303_v48 = vmax.f32 %v991_v42, 0.0 }
 0x14e   :  { %v4461_v46 = vpop.f32.mrf.mxu0 }
 0x14f   :  { %v994_v47 = vadd.f32 %v4461_v46, %v5016_v59  ;;  %4586 = vmatprep.mubr.msk.bf16.mxu1 %vm499_vm0, %v1395_v44  ;;  %v1301_v50 = vmax.f32 %v983_v45, 0.0 }
 0x150   :  { %v985_v49 = vpop.f32.mrf.mxu0  ;;  %4587 = vmatmul.mubr.msk.bf16.gmra.mxu1 %vm499_vm0, %v1396_v41 }
 0x151   :  { %v1304_v51 = vmax.f32 %v994_v47, 0.0  ;;  %v986_v52 = vadd.f32 %v5016_v59, %v985_v49 }
 0x152   :  { %v4464_v53 = vpop.f32.mrf.mxu0 }
 0x153   :  { %v1302_v54 = vmax.f32 %v986_v52, 0.0  ;;  %v1398_v55 = vpack.c.bf16 %v1304_v51, %v1303_v48  ;;  %v1007_v56 = vadd.f32 %v4464_v53, %v5016_v59 }
 0x154   :  { %v998_v57 = vpop.f32.mrf.mxu0 }
 0x155   :  { %v1397_v58 = vpack.c.bf16 %v1302_v54, %v1301_v50  ;;  %v999_v60 = vadd.f32 %v5016_v59, %v998_v57  ;;  %v1307_v63 = vmax.f32 %v1007_v56, 0.0 }
 0x156   :  { %v4465_v61 = vpop.f32.mrf.mxu0 }
 0x157   :  { %v1010_v62 = vadd.f32 %v4465_v61, %v5016_v59  ;;  %4590 = vmatprep.mubr.msk.bf16.mxu1 %vm499_vm0, %v1397_v58  ;;  %v1305_v1 = vmax.f32 %v999_v60, 0.0 }
 0x158   :  { %v1001_v0 = vpop.f32.mrf.mxu0  ;;  %4591 = vmatmul.mubr.msk.bf16.gmra.mxu1 %vm499_vm0, %v1398_v55 }
 0x159   :  { %v1308_v2 = vmax.f32 %v1010_v62, 0.0  ;;  %v1002_v3 = vadd.f32 %v5016_v59, %v1001_v0 }
 0x15a   :  { %v4468_v4 = vpop.f32.mrf.mxu0 }
 0x15b   :  { %v1306_v5 = vmax.f32 %v1002_v3, 0.0  ;;  %v1400_v6 = vpack.c.bf16 %v1308_v2, %v1307_v63  ;;  %v1023_v7 = vadd.f32 %v4468_v4, %v5016_v59 }
 0x15c   :  { %v1014_v8 = vpop.f32.mrf.mxu0 }
 0x15d   :  { %v1399_v9 = vpack.c.bf16 %v1306_v5, %v1305_v1  ;;  %v1015_v10 = vadd.f32 %v5016_v59, %v1014_v8  ;;  %v1311_v13 = vmax.f32 %v1023_v7, 0.0 }
 0x15e   :  { %v4469_v11 = vpop.f32.mrf.mxu0 }
 0x15f   :  { %v1026_v12 = vadd.f32 %v4469_v11, %v5016_v59  ;;  %4594 = vmatprep.mubr.msk.bf16.mxu1 %vm499_vm0, %v1399_v9  ;;  %v1309_v15 = vmax.f32 %v1015_v10, 0.0 }
 0x160   :  { %v1017_v14 = vpop.f32.mrf.mxu0  ;;  %4595 = vmatmul.mubr.msk.bf16.gmra.mxu1 %vm499_vm0, %v1400_v6 }
 0x161   :  { %v1312_v16 = vmax.f32 %v1026_v12, 0.0  ;;  %v1018_v17 = vadd.f32 %v5016_v59, %v1017_v14 }
 0x162   :  { %v4472_v18 = vpop.f32.mrf.mxu0 }
 0x163   :  { %v1310_v19 = vmax.f32 %v1018_v17, 0.0  ;;  %v1402_v20 = vpack.c.bf16 %v1312_v16, %v1311_v13  ;;  %v1039_v21 = vadd.f32 %v4472_v18, %v5016_v59 }
 0x164   :  { %v1030_v22 = vpop.f32.mrf.mxu0 }
 0x165   :  { %v1401_v23 = vpack.c.bf16 %v1310_v19, %v1309_v15  ;;  %v1031_v24 = vadd.f32 %v5016_v59, %v1030_v22  ;;  %v1315_v27 = vmax.f32 %v1039_v21, 0.0 }
 0x166   :  { %v4473_v25 = vpop.f32.mrf.mxu0 }
 0x167   :  { %v1042_v26 = vadd.f32 %v4473_v25, %v5016_v59  ;;  %4598 = vmatprep.mubr.msk.bf16.mxu1 %vm499_vm0, %v1401_v23  ;;  %v1313_v29 = vmax.f32 %v1031_v24, 0.0 }
 0x168   :  { %v1033_v28 = vpop.f32.mrf.mxu0  ;;  %4599 = vmatmul.mubr.msk.bf16.gmra.mxu1 %vm499_vm0, %v1402_v20 }
 0x169   :  { %v1316_v30 = vmax.f32 %v1042_v26, 0.0  ;;  %v1034_v31 = vadd.f32 %v5016_v59, %v1033_v28 }
 0x16a   :  { %v4476_v32 = vpop.f32.mrf.mxu0 }
 0x16b   :  { %v1314_v33 = vmax.f32 %v1034_v31, 0.0  ;;  %v1404_v34 = vpack.c.bf16 %v1316_v30, %v1315_v27  ;;  %v1055_v35 = vadd.f32 %v4476_v32, %v5016_v59 }
 0x16c   :  { %v1046_v36 = vpop.f32.mrf.mxu0 }
 0x16d   :  { %v1403_v37 = vpack.c.bf16 %v1314_v33, %v1313_v29  ;;  %v1047_v38 = vadd.f32 %v5016_v59, %v1046_v36  ;;  %v1319_v41 = vmax.f32 %v1055_v35, 0.0 }
 0x16e   :  { %v4477_v39 = vpop.f32.mrf.mxu0 }
 0x16f   :  { %v1058_v40 = vadd.f32 %v4477_v39, %v5016_v59  ;;  %4602 = vmatprep.mubr.msk.bf16.mxu1 %vm499_vm0, %v1403_v37  ;;  %v1317_v43 = vmax.f32 %v1047_v38, 0.0 }
 0x170   :  { %v1049_v42 = vpop.f32.mrf.mxu0  ;;  %4603 = vmatmul.mubr.msk.bf16.gmra.mxu1 %vm499_vm0, %v1404_v34 }
 0x171   :  { %v1320_v44 = vmax.f32 %v1058_v40, 0.0  ;;  %v1050_v45 = vadd.f32 %v5016_v59, %v1049_v42 }
 0x172   :  { %v4480_v46 = vpop.f32.mrf.mxu0 }
 0x173   :  { %v1318_v47 = vmax.f32 %v1050_v45, 0.0  ;;  %v1406_v48 = vpack.c.bf16 %v1320_v44, %v1319_v41  ;;  %v1071_v49 = vadd.f32 %v4480_v46, %v5016_v59 }
 0x174   :  { %v1062_v50 = vpop.f32.mrf.mxu0 }
 0x175   :  { %v1405_v51 = vpack.c.bf16 %v1318_v47, %v1317_v43  ;;  %v1063_v52 = vadd.f32 %v5016_v59, %v1062_v50  ;;  %v1323_v55 = vmax.f32 %v1071_v49, 0.0  ;;  %v5220_v47 = vpop.permute.xlu0 %2185 }
 0x176   :  { %v4481_v53 = vpop.f32.mrf.mxu0 }
 0x177   :  { %v1074_v54 = vadd.f32 %v4481_v53, %v5016_v59  ;;  %4606 = vmatprep.mubr.msk.bf16.mxu1 %vm499_vm0, %v1405_v51  ;;  %v1321_v57 = vmax.f32 %v1063_v52, 0.0  ;;  %v5227_v52 = vld [vmem:[%s6243_s5] sm:$0xff] }
 0x178   :  { %v1065_v56 = vpop.f32.mrf.mxu0  ;;  %4607 = vmatmul.mubr.msk.bf16.gmra.mxu1 %vm499_vm0, %v1406_v48 }
 0x179   :  { %v1324_v58 = vmax.f32 %v1074_v54, 0.0  ;;  %v1066_v60 = vadd.f32 %v5016_v59, %v1065_v56 }
 0x17a   :  { %v4484_v61 = vpop.f32.mrf.mxu0 }
 0x17b   :  { %v1322_v62 = vmax.f32 %v1066_v60, 0.0  ;;  %v1408_v63 = vpack.c.bf16 %v1324_v58, %v1323_v55  ;;  %v1087_v0 = vadd.f32 %v4484_v61, %v5016_v59 }
 0x17c   :  { %v1078_v1 = vpop.f32.mrf.mxu0 }
 0x17d   :  { %v1407_v2 = vpack.c.bf16 %v1322_v62, %v1321_v57  ;;  %v1079_v3 = vadd.f32 %v5016_v59, %v1078_v1  ;;  %v1327_v6 = vmax.f32 %v1087_v0, 0.0 }
 0x17e   :  { %v4485_v4 = vpop.f32.mrf.mxu0 }
 0x17f   :  { %v1090_v5 = vadd.f32 %v4485_v4, %v5016_v59  ;;  %4610 = vmatprep.mubr.msk.bf16.mxu1 %vm499_vm0, %v1407_v2  ;;  %v1325_v8 = vmax.f32 %v1079_v3, 0.0  ;;  %v5238_v3 = vld [vmem:[%s6244_s6] ss:$0 sm:$0xff] }
 0x180   :  { %v1081_v7 = vpop.f32.mrf.mxu0  ;;  %4611 = vmatmul.mubr.msk.bf16.gmra.mxu1 %vm499_vm0, %v1408_v63 }
 0x181   :  { %v1328_v9 = vmax.f32 %v1090_v5, 0.0  ;;  %v1082_v10 = vadd.f32 %v5016_v59, %v1081_v7 }
 0x182   :  { %v4488_v11 = vpop.f32.mrf.mxu0 }
 0x183   :  { %v1326_v12 = vmax.f32 %v1082_v10, 0.0  ;;  %v1410_v13 = vpack.c.bf16 %v1328_v9, %v1327_v6  ;;  %v1103_v14 = vadd.f32 %v4488_v11, %v5016_v59 }
 0x184   :  { %v1094_v15 = vpop.f32.mrf.mxu0 }
 0x185   :  { %v1409_v16 = vpack.c.bf16 %v1326_v12, %v1325_v8  ;;  %v1095_v17 = vadd.f32 %v5016_v59, %v1094_v15  ;;  %v1331_v20 = vmax.f32 %v1103_v14, 0.0 }
 0x186   :  { %v4489_v18 = vpop.f32.mrf.mxu0 }
 0x187   :  { %v1106_v19 = vadd.f32 %v4489_v18, %v5016_v59  ;;  %4614 = vmatprep.mubr.msk.bf16.mxu1 %vm499_vm0, %v1409_v16  ;;  %v1329_v22 = vmax.f32 %v1095_v17, 0.0 }
 0x188   :  { %v1097_v21 = vpop.f32.mrf.mxu0  ;;  %4615 = vmatmul.mubr.msk.bf16.gmra.mxu1 %vm499_vm0, %v1410_v13 }
 0x189   :  { %v1332_v23 = vmax.f32 %v1106_v19, 0.0  ;;  %v1098_v24 = vadd.f32 %v5016_v59, %v1097_v21 }
 0x18a   :  { %v4492_v25 = vpop.f32.mrf.mxu0 }
 0x18b   :  { %v1330_v26 = vmax.f32 %v1098_v24, 0.0  ;;  %v1412_v27 = vpack.c.bf16 %v1332_v23, %v1331_v20  ;;  %v1119_v28 = vadd.f32 %v4492_v25, %v5016_v59 }
 0x18c   :  { %v1110_v29 = vpop.f32.mrf.mxu0 }
 0x18d   :  { %v1411_v30 = vpack.c.bf16 %v1330_v26, %v1329_v22  ;;  %v1111_v31 = vadd.f32 %v5016_v59, %v1110_v29  ;;  %v1335_v34 = vmax.f32 %v1119_v28, 0.0 }
 0x18e   :  { %v4493_v32 = vpop.f32.mrf.mxu0 }
 0x18f   :  { %v1122_v33 = vadd.f32 %v4493_v32, %v5016_v59  ;;  %4618 = vmatprep.mubr.msk.bf16.mxu1 %vm499_vm0, %v1411_v30  ;;  %v1333_v36 = vmax.f32 %v1111_v31, 0.0 }
 0x190   :  { %v1113_v35 = vpop.f32.mrf.mxu0  ;;  %4619 = vmatmul.mubr.msk.bf16.gmra.mxu1 %vm499_vm0, %v1412_v27 }
 0x191   :  { %v1336_v37 = vmax.f32 %v1122_v33, 0.0  ;;  %v1114_v38 = vadd.f32 %v5016_v59, %v1113_v35 }
 0x192   :  { %v4496_v39 = vpop.f32.mrf.mxu0 }
 0x193   :  { %v1334_v40 = vmax.f32 %v1114_v38, 0.0  ;;  %v1414_v41 = vpack.c.bf16 %v1336_v37, %v1335_v34  ;;  %v1135_v42 = vadd.f32 %v4496_v39, %v5016_v59 }
 0x194   :  { %v1126_v43 = vpop.f32.mrf.mxu0 }
 0x195   :  { %v1413_v44 = vpack.c.bf16 %v1334_v40, %v1333_v36  ;;  %v1127_v45 = vadd.f32 %v5016_v59, %v1126_v43  ;;  %v1339_v49 = vmax.f32 %v1135_v42, 0.0 }
 0x196   :  { %v4497_v46 = vpop.f32.mrf.mxu0 }
 0x197   :  { %v1138_v48 = vadd.f32 %v4497_v46, %v5016_v59  ;;  %4622 = vmatprep.mubr.msk.bf16.mxu1 %vm499_vm0, %v1413_v44  ;;  %v1337_v53 = vmax.f32 %v1127_v45, 0.0 }
 0x198   :  { %v1129_v50 = vpop.f32.mrf.mxu0  ;;  %v4528_v51 = vpop.f32.mrf.mxu1  ;;  %4623 = vmatmul.mubr.msk.bf16.gmra.mxu1 %vm499_vm0, %v1414_v41 }
 0x199   :  { %v1340_v54 = vmax.f32 %v1138_v48, 0.0  ;;  %v1130_v55 = vadd.f32 %v5016_v59, %v1129_v50  ;;  %v2190_v56 = vmul.f32 %v4528_v51, %v5220_v47 }
 0x19a   :  { %v4500_v57 = vpop.f32.mrf.mxu0  ;;  %v1671_v58 = vpop.f32.mrf.mxu1 }
 0x19b   :  { %v1338_v60 = vmax.f32 %v1130_v55, 0.0  ;;  %v2319_v61 = vadd.f32 %v5227_v52, %v2190_v56  ;;  %v1151_v62 = vadd.f32 %v4500_v57, %v5016_v59  ;;  %v1416_v63 = vpack.c.bf16 %v1340_v54, %v1339_v49 }
 0x19c   :  { %v2188_v0 = vmul.f32 %v5220_v47, %v1671_v58  ;;  %v1142_v1 = vpop.f32.mrf.mxu0  ;;  %v4529_v2 = vpop.f32.mrf.mxu1 }
 0x19d   :  { %v1415_v4 = vpack.c.bf16 %v1338_v60, %v1337_v53  ;;  %v2447_v5 = vmax.f32 %v2319_v61, 0.0  ;;  %v1143_v6 = vadd.f32 %v5016_v59, %v1142_v1  ;;  %v2191_v8 = vmul.f32 %v4529_v2, %v5220_v47 }
 0x19e   :  { %v2317_v7 = vadd.f32 %v5227_v52, %v2188_v0  ;;  %v4501_v9 = vpop.f32.mrf.mxu0  ;;  %v1674_v10 = vpop.f32.mrf.mxu1  ;;  %v1343_v11 = vmax.f32 %v1151_v62, 0.0 }
 0x19f   :  { %v1154_v12 = vadd.f32 %v4501_v9, %v5016_v59  ;;  %v2189_v13 = vmul.f32 %v5220_v47, %v1674_v10  ;;  %4626 = vmatprep.mubr.msk.bf16.mxu1 %vm499_vm0, %v1415_v4  ;;  %v2582_v14 = vmul.f32 %v5238_v3, %v2447_v5  ;;  %v1341_v16 = vmax.f32 %v1143_v6, 0.0 }
 0x1a0   :  { %v2445_v15 = vmax.f32 %v2317_v7, 0.0  ;;  %v2320_v17 = vadd.f32 %v5227_v52, %v2191_v8  ;;  %v1145_v18 = vpop.f32.mrf.mxu0  ;;  %v4532_v19 = vpop.f32.mrf.mxu1  ;;  %4627 = vmatmul.mubr.msk.bf16.gmra.mxu1 %vm499_vm0, %v1416_v63 }
 0x1a1   :  { %v1344_v20 = vmax.f32 %v1154_v12, 0.0  ;;  %v2318_v21 = vadd.f32 %v5227_v52, %v2189_v13  ;;  %v1146_v22 = vadd.f32 %v5016_v59, %v1145_v18  ;;  %v2194_v23 = vmul.f32 %v4532_v19, %v5220_v47 }
 0x1a2   :  { %v2448_v24 = vmax.f32 %v2320_v17, 0.0  ;;  %v4504_v25 = vpop.f32.mrf.mxu0  ;;  %v2715_v26 = vsel %vm2708_vm1, %v2582_v14, 0.0  ;;  %v1687_v27 = vpop.f32.mrf.mxu1  ;;  %v2580_v28 = vmul.f32 %v5238_v3, %v2445_v15 }
 0x1a3   :  { %v1418_v29 = vpack.c.bf16 %v1344_v20, %v1343_v11  ;;  %v2446_v30 = vmax.f32 %v2318_v21, 0.0  ;;  %v1342_v31 = vmax.f32 %v1146_v22, 0.0  ;;  %v2323_v32 = vadd.f32 %v5227_v52, %v2194_v23  ;;  %2716 = vadd.xlane.f32.xlu1 %v2715_v26 }
 0x1a4   :  { %v1167_v33 = vadd.f32 %v4504_v25, %v5016_v59  ;;  %v2192_v34 = vmul.f32 %v5220_v47, %v1687_v27  ;;  %v1158_v35 = vpop.f32.mrf.mxu0  ;;  %v2709_v36 = vsel %vm2708_vm1, %v2580_v28, 0.0  ;;  %v4533_v37 = vpop.f32.mrf.mxu1  ;;  %v2583_v38 = vmul.f32 %v5238_v3, %v2448_v24 }
 0x1a5   :  { %v1417_v39 = vpack.c.bf16 %v1342_v31, %v1341_v16  ;;  %v2451_v40 = vmax.f32 %v2323_v32, 0.0  ;;  %v1159_v41 = vadd.f32 %v5016_v59, %v1158_v35  ;;  %2710 = vadd.xlane.f32.xlu0 %v2709_v36  ;;  %v2195_v43 = vmul.f32 %v4533_v37, %v5220_v47 }
 0x1a6   :  { %v2321_v42 = vadd.f32 %v5227_v52, %v2192_v34  ;;  %v4505_v44 = vpop.f32.mrf.mxu0  ;;  %v2718_v45 = vsel %vm2708_vm1, %v2583_v38, 0.0  ;;  %v1690_v46 = vpop.f32.mrf.mxu1  ;;  %v2581_v48 = vmul.f32 %v5238_v3, %v2446_v30  ;;  %v1347_v51 = vmax.f32 %v1167_v33, 0.0 }
 0x1a7   :  { %v1170_v49 = vadd.f32 %v4505_v44, %v5016_v59  ;;  %2719 = vadd.xlane.f32.xlu1 %v2718_v45  ;;  %v2193_v50 = vmul.f32 %v5220_v47, %v1690_v46  ;;  %4630 = vmatprep.mubr.msk.bf16.mxu1 %vm499_vm0, %v1417_v39  ;;  %v1345_v56 = vmax.f32 %v1159_v41, 0.0  ;;  %v2324_v60 = vadd.f32 %v5227_v52, %v2195_v43 }
 0x1a8   :  { %v1161_v53 = vpop.f32.mrf.mxu0  ;;  %v4536_v54 = vpop.f32.mrf.mxu1  ;;  %4631 = vmatmul.mubr.msk.bf16.gmra.mxu1 %vm499_vm0, %v1418_v29  ;;  %v2449_v55 = vmax.f32 %v2321_v42, 0.0  ;;  %v2712_v63 = vsel %vm2708_vm1, %v2581_v48, 0.0  ;;  %v2586_v1 = vmul.f32 %v5238_v3, %v2451_v40 }
 0x1a9   :  { %v1348_v57 = vmax.f32 %v1170_v49, 0.0  ;;  %v1162_v58 = vadd.f32 %v5016_v59, %v1161_v53  ;;  %v2198_v61 = vmul.f32 %v4536_v54, %v5220_v47  ;;  %v2322_v2 = vadd.f32 %v5227_v52, %v2193_v50  ;;  %v5278_v59 = vld [vmem:[%s6240_s2] ss:$0 sm:$0xff] }
 0x1aa   :  { %v4508_v62 = vpop.f32.mrf.mxu0  ;;  %v1703_v0 = vpop.f32.mrf.mxu1  ;;  %v2584_v12 = vmul.f32 %v5238_v3, %v2449_v55  ;;  %v2452_v13 = vmax.f32 %v2324_v60, 0.0  ;;  %v2727_v17 = vsel %vm2708_vm1, %v2586_v1, 0.0 }
 0x1ab   :  { %v1346_v4 = vmax.f32 %v1162_v58, 0.0  ;;  %2713 = vadd.xlane.f32.xlu1 %v2712_v63  ;;  %v1420_v5 = vpack.c.bf16 %v1348_v57, %v1347_v51  ;;  %v2327_v6 = vadd.f32 %v5227_v52, %v2198_v61  ;;  %v1183_v7 = vadd.f32 %v5278_v59, %v4508_v62 }
 0x1ac   :  { %v1174_v8 = vpop.f32.mrf.mxu0  ;;  %v4537_v9 = vpop.f32.mrf.mxu1  ;;  %v2196_v15 = vmul.f32 %v5220_v47, %v1703_v0  ;;  %v2450_v19 = vmax.f32 %v2322_v2, 0.0  ;;  %v2721_v29 = vsel %vm2708_vm1, %v2584_v12, 0.0  ;;  %v2587_v35 = vmul.f32 %v5238_v3, %v2452_v13 }
 0x1ad   :  { %v1419_v10 = vpack.c.bf16 %v1346_v4, %v1345_v56  ;;  %v1175_v11 = vadd.f32 %v5278_v59, %v1174_v8  ;;  %v2455_v14 = vmax.f32 %v2327_v6, 0.0  ;;  %v2199_v20 = vmul.f32 %v4537_v9, %v5220_v47 }
 0x1ae   :  { %v4509_v16 = vpop.f32.mrf.mxu0  ;;  %v1706_v18 = vpop.f32.mrf.mxu1  ;;  %v1351_v22 = vmax.f32 %v1183_v7, 0.0  ;;  %v2325_v30 = vadd.f32 %v5227_v52, %v2196_v15  ;;  %v2585_v38 = vmul.f32 %v5238_v3, %v2450_v19  ;;  %v2730_v54 = vsel %vm2708_vm1, %v2587_v35, 0.0 }
 0x1af   :  { %v1186_v21 = vadd.f32 %v5278_v59, %v4509_v16  ;;  %2728 = vadd.xlane.f32.xlu1 %v2727_v17  ;;  %4634 = vmatprep.mubr.msk.bf16.mxu1 %vm499_vm0, %v1419_v10  ;;  %v2590_v25 = vmul.f32 %v5238_v3, %v2455_v14  ;;  %v1349_v26 = vmax.f32 %v1175_v11, 0.0  ;;  %v2328_v36 = vadd.f32 %v5227_v52, %v2199_v20 }
 0x1b0   :  { %v1177_v23 = vpop.f32.mrf.mxu0  ;;  %v4540_v24 = vpop.f32.mrf.mxu1  ;;  %4635 = vmatmul.mubr.msk.bf16.gmra.mxu1 %vm499_vm0, %v1420_v5  ;;  %v2197_v40 = vmul.f32 %v5220_v47, %v1706_v18  ;;  %v2453_v49 = vmax.f32 %v2325_v30, 0.0  ;;  %v2724_v58 = vsel %vm2708_vm1, %v2585_v38, 0.0 }
 0x1b1   :  { %v1352_v27 = vmax.f32 %v1186_v21, 0.0  ;;  %v1178_v28 = vadd.f32 %v5278_v59, %v1177_v23  ;;  %v2202_v31 = vmul.f32 %v4540_v24, %v5220_v47  ;;  %v2739_v33 = vsel %vm2708_vm1, %v2590_v25, 0.0 }
 0x1b2   :  { %v4512_v32 = vpop.f32.mrf.mxu0  ;;  %v1719_v34 = vpop.f32.mrf.mxu1  ;;  %2740 = vadd.xlane.f32.xlu0 %v2739_v33  ;;  %v2456_v60 = vmax.f32 %v2328_v36, 0.0  ;;  %v2326_v61 = vadd.f32 %v5227_v52, %v2197_v40  ;;  %v2588_v11 = vmul.f32 %v5238_v3, %v2453_v49 }
 0x1b3   :  { %v1350_v37 = vmax.f32 %v1178_v28, 0.0  ;;  %2722 = vadd.xlane.f32.xlu1 %v2721_v29  ;;  %v1422_v39 = vpack.c.bf16 %v1352_v27, %v1351_v22  ;;  %v2331_v41 = vadd.f32 %v5227_v52, %v2202_v31  ;;  %v2200_v42 = vmul.f32 %v5220_v47, %v1719_v34 }
 0x1b4   :  { %v1190_v43 = vpop.f32.mrf.mxu0  ;;  %v4541_v44 = vpop.f32.mrf.mxu1  ;;  %v1199_v46 = vadd.f32 %v5278_v59, %v4512_v32  ;;  %v2454_v16 = vmax.f32 %v2326_v61, 0.0  ;;  %v2591_v21 = vmul.f32 %v5238_v3, %v2456_v60  ;;  %v2733_v29 = vsel %vm2708_vm1, %v2588_v11, 0.0 }
 0x1b5   :  { %v1421_v45 = vpack.c.bf16 %v1350_v37, %v1349_v26  ;;  %v1191_v48 = vadd.f32 %v5278_v59, %v1190_v43  ;;  %v2459_v50 = vmax.f32 %v2331_v41, 0.0  ;;  %v2329_v51 = vadd.f32 %v5227_v52, %v2200_v42 }
 0x1b6   :  { %v4513_v53 = vpop.f32.mrf.mxu0  ;;  %v1722_v55 = vpop.f32.mrf.mxu1  ;;  %v2203_v56 = vmul.f32 %v4541_v44, %v5220_v47  ;;  %v1355_v2 = vmax.f32 %v1199_v46, 0.0 }
 0x1b7   :  { %v1202_v57 = vadd.f32 %v5278_v59, %v4513_v53  ;;  %2731 = vadd.xlane.f32.xlu1 %v2730_v54  ;;  %4638 = vmatprep.mubr.msk.bf16.mxu1 %vm499_vm0, %v1421_v45  ;;  %v2457_v62 = vmax.f32 %v2329_v51, 0.0  ;;  %v2594_v1 = vmul.f32 %v5238_v3, %v2459_v50  ;;  %v1353_v4 = vmax.f32 %v1191_v48, 0.0 }
 0x1b8   :  { %v1193_v63 = vpop.f32.mrf.mxu0  ;;  %v4544_v0 = vpop.f32.mrf.mxu1  ;;  %4639 = vmatmul.mubr.msk.bf16.gmra.mxu1 %vm499_vm0, %v1422_v39  ;;  %v2332_v13 = vadd.f32 %v5227_v52, %v2203_v56  ;;  %v2201_v14 = vmul.f32 %v5220_v47, %v1722_v55  ;;  %v2742_v39 = vsel %vm2708_vm1, %v2591_v21, 0.0  ;;  %v2589_v50 = vmul.f32 %v5238_v3, %v2454_v16 }
 0x1b9   :  { %v1356_v5 = vmax.f32 %v1202_v57, 0.0  ;;  %v1194_v6 = vadd.f32 %v5278_v59, %v1193_v63  ;;  %v2206_v7 = vmul.f32 %v4544_v0, %v5220_v47  ;;  %v2751_v9 = vsel %vm2708_vm1, %v2594_v1, 0.0 }
 0x1ba   :  { %v4516_v8 = vpop.f32.mrf.mxu0  ;;  %v1735_v10 = vpop.f32.mrf.mxu1  ;;  %v2592_v12 = vmul.f32 %v5238_v3, %v2457_v62  ;;  %2752 = vadd.xlane.f32.xlu0 %v2751_v9  ;;  %v2460_v32 = vmax.f32 %v2332_v13, 0.0  ;;  %v2330_v33 = vadd.f32 %v5227_v52, %v2201_v14 }
 0x1bb   :  { %v1354_v15 = vmax.f32 %v1194_v6, 0.0  ;;  %2725 = vadd.xlane.f32.xlu1 %v2724_v58  ;;  %v2335_v17 = vadd.f32 %v5227_v52, %v2206_v7  ;;  %v2204_v18 = vmul.f32 %v5220_v47, %v1735_v10  ;;  %v1424_v22 = vpack.c.bf16 %v1356_v5, %v1355_v2 }
 0x1bc   :  { %v1206_v19 = vpop.f32.mrf.mxu0  ;;  %v4545_v20 = vpop.f32.mrf.mxu1  ;;  %v1215_v24 = vadd.f32 %v5278_v59, %v4516_v8  ;;  %v2745_v30 = vsel %vm2708_vm1, %v2592_v12, 0.0  ;;  %v2458_v53 = vmax.f32 %v2330_v33, 0.0  ;;  %v2595_v55 = vmul.f32 %v5238_v3, %v2460_v32 }
 0x1bd   :  { %v1423_v23 = vpack.c.bf16 %v1354_v15, %v1353_v4  ;;  %v1207_v25 = vadd.f32 %v5278_v59, %v1206_v19  ;;  %v2463_v26 = vmax.f32 %v2335_v17, 0.0  ;;  %v2333_v27 = vadd.f32 %v5227_v52, %v2204_v18 }
 0x1be   :  { %v4517_v28 = vpop.f32.mrf.mxu0  ;;  %v1738_v31 = vpop.f32.mrf.mxu1  ;;  %2746 = vadd.xlane.f32.xlu0 %v2745_v30  ;;  %v2207_v36 = vmul.f32 %v4545_v20, %v5220_v47  ;;  %v1359_v41 = vmax.f32 %v1215_v24, 0.0  ;;  %v2736_v7 = vsel %vm2708_vm1, %v2589_v50, 0.0  ;;  %v2754_v11 = vsel %vm2708_vm1, %v2595_v55, 0.0 }
 0x1bf   :  { %v1218_v34 = vadd.f32 %v5278_v59, %v4517_v28  ;;  %2734 = vadd.xlane.f32.xlu1 %v2733_v29  ;;  %v2461_v35 = vmax.f32 %v2333_v27, 0.0  ;;  %4642 = vmatprep.mubr.msk.bf16.mxu1 %vm499_vm0, %v1423_v23  ;;  %v2598_v40 = vmul.f32 %v5238_v3, %v2463_v26  ;;  %v1357_v42 = vmax.f32 %v1207_v25, 0.0 }
 0x1c0   :  { %v1209_v37 = vpop.f32.mrf.mxu0  ;;  %v4548_v38 = vpop.f32.mrf.mxu1  ;;  %4643 = vmatmul.mubr.msk.bf16.gmra.mxu1 %vm499_vm0, %v1424_v22  ;;  %v2336_v56 = vadd.f32 %v5227_v52, %v2207_v36  ;;  %v2205_v57 = vmul.f32 %v5220_v47, %v1738_v31  ;;  %v2593_v12 = vmul.f32 %v5238_v3, %v2458_v53 }
 0x1c1   :  { %v1360_v43 = vmax.f32 %v1218_v34, 0.0  ;;  %v1210_v44 = vadd.f32 %v5278_v59, %v1209_v37  ;;  %v2210_v45 = vmul.f32 %v4548_v38, %v5220_v47  ;;  %v2763_v48 = vsel %vm2708_vm1, %v2598_v40, 0.0 }
 0x1c2   :  { %v4520_v46 = vpop.f32.mrf.mxu0  ;;  %v1751_v49 = vpop.f32.mrf.mxu1  ;;  %v2596_v51 = vmul.f32 %v5238_v3, %v2461_v35  ;;  %2764 = vadd.xlane.f32.xlu0 %v2763_v48  ;;  %v2464_v13 = vmax.f32 %v2336_v56, 0.0  ;;  %v2334_v14 = vadd.f32 %v5227_v52, %v2205_v57 }
 0x1c3   :  { %v1358_v54 = vmax.f32 %v1210_v44, 0.0  ;;  %2743 = vadd.xlane.f32.xlu1 %v2742_v39  ;;  %v2339_v58 = vadd.f32 %v5227_v52, %v2210_v45  ;;  %v2208_v60 = vmul.f32 %v5220_v47, %v1751_v49  ;;  %v1426_v63 = vpack.c.bf16 %v1360_v43, %v1359_v41 }
 0x1c4   :  { %v1222_v61 = vpop.f32.mrf.mxu0  ;;  %v4549_v62 = vpop.f32.mrf.mxu1  ;;  %v1231_v1 = vadd.f32 %v5278_v59, %v4520_v46  ;;  %v2757_v8 = vsel %vm2708_vm1, %v2596_v51, 0.0  ;;  %v2462_v30 = vmax.f32 %v2334_v14, 0.0  ;;  %v2599_v32 = vmul.f32 %v5238_v3, %v2464_v13 }
 0x1c5   :  { %v1425_v0 = vpack.c.bf16 %v1358_v54, %v1357_v42  ;;  %v1223_v2 = vadd.f32 %v5278_v59, %v1222_v61  ;;  %v2467_v4 = vmax.f32 %v2339_v58, 0.0  ;;  %v2337_v5 = vadd.f32 %v5227_v52, %v2208_v60 }
 0x1c6   :  { %v4521_v6 = vpop.f32.mrf.mxu0  ;;  %v1754_v9 = vpop.f32.mrf.mxu1  ;;  %2758 = vadd.xlane.f32.xlu0 %v2757_v8  ;;  %v1363_v19 = vmax.f32 %v1231_v1, 0.0  ;;  %v2211_v23 = vmul.f32 %v4549_v62, %v5220_v47  ;;  %v2748_v39 = vsel %vm2708_vm1, %v2593_v12, 0.0  ;;  %v2766_v48 = vsel %vm2708_vm1, %v2599_v32, 0.0 }
 0x1c7   :  { %v1234_v10 = vadd.f32 %v5278_v59, %v4521_v6  ;;  %2737 = vadd.xlane.f32.xlu1 %v2736_v7  ;;  %v2465_v15 = vmax.f32 %v2337_v5, 0.0  ;;  %4646 = vmatprep.mubr.msk.bf16.mxu1 %vm499_vm0, %v1425_v0  ;;  %v2602_v18 = vmul.f32 %v5238_v3, %v2467_v4  ;;  %v1361_v20 = vmax.f32 %v1223_v2, 0.0 }
 0x1c8   :  { %v1225_v16 = vpop.f32.mrf.mxu0  ;;  %v4552_v17 = vpop.f32.mrf.mxu1  ;;  %4647 = vmatmul.mubr.msk.bf16.gmra.mxu1 %vm499_vm0, %v1426_v63  ;;  %v2209_v34 = vmul.f32 %v5220_v47, %v1754_v9  ;;  %v2340_v37 = vadd.f32 %v5227_v52, %v2211_v23  ;;  %v2597_v49 = vmul.f32 %v5238_v3, %v2462_v30 }
 0x1c9   :  { %v1364_v21 = vmax.f32 %v1234_v10, 0.0  ;;  %v1226_v22 = vadd.f32 %v5278_v59, %v1225_v16  ;;  %v2214_v24 = vmul.f32 %v4552_v17, %v5220_v47  ;;  %v2775_v25 = vsel %vm2708_vm1, %v2602_v18, 0.0 }
 0x1ca   :  { %v1767_v26 = vpop.f32.mrf.mxu1  ;;  %v2600_v27 = vmul.f32 %v5238_v3, %v2465_v15  ;;  %2776 = vadd.xlane.f32.xlu0 %v2775_v25  ;;  %v2338_v45 = vadd.f32 %v5227_v52, %v2209_v34  ;;  %v2468_v50 = vmax.f32 %v2340_v37, 0.0  ;;  %v2760_v1 = vsel %vm2708_vm1, %v2597_v49, 0.0 }
 0x1cb   :  { %v1362_v28 = vmax.f32 %v1226_v22, 0.0  ;;  %2755 = vadd.xlane.f32.xlu1 %v2754_v11  ;;  %v2212_v29 = vmul.f32 %v5220_v47, %v1767_v26  ;;  %v2343_v31 = vadd.f32 %v5227_v52, %v2214_v24  ;;  %v1428_v33 = vpack.c.bf16 %v1364_v21, %v1363_v19 }
 0x1cc   :  { %v4553_v59 = vpop.f32.mrf.mxu1  ;;  %v2769_v40 = vsel %vm2708_vm1, %v2600_v27, 0.0  ;;  %v2466_v60 = vmax.f32 %v2338_v45, 0.0  ;;  %v2603_v5 = vmul.f32 %v5238_v3, %v2468_v50 }
 0x1cd   :  { %v1427_v35 = vpack.c.bf16 %v1362_v28, %v1361_v20  ;;  %v2341_v36 = vadd.f32 %v5227_v52, %v2212_v29  ;;  %v2471_v38 = vmax.f32 %v2343_v31, 0.0  ;;  %v2215_v51 = vmul.f32 %v4553_v59, %v5220_v47 }
 0x1ce   :  { %v1770_v41 = vpop.f32.mrf.mxu1  ;;  %2770 = vadd.xlane.f32.xlu0 %v2769_v40  ;;  %v2601_v12 = vmul.f32 %v5238_v3, %v2466_v60  ;;  %v2778_v15 = vsel %vm2708_vm1, %v2603_v5, 0.0 }
 0x1cf   :  { %v2469_v42 = vmax.f32 %v2341_v36, 0.0  ;;  %2749 = vadd.xlane.f32.xlu1 %v2748_v39  ;;  %4650 = vmatprep.mubr.msk.bf16.mxu1 %vm499_vm0, %v1427_v35  ;;  %v2606_v44 = vmul.f32 %v5238_v3, %v2471_v38  ;;  %v2213_v61 = vmul.f32 %v5220_v47, %v1770_v41  ;;  %v2344_v0 = vadd.f32 %v5227_v52, %v2215_v51 }
 0x1d0   :  { %v4556_v43 = vpop.f32.mrf.mxu1  ;;  %4651 = vmatmul.mubr.msk.bf16.gmra.mxu1 %vm499_vm0, %v1428_v33  ;;  %v2772_v24 = vsel %vm2708_vm1, %v2601_v12, 0.0  ;;  %vm3986_vm0 = vcmask 523712  }
 0x1d1   :  { %v2218_v46 = vmul.f32 %v4556_v43, %v5220_v47  ;;  %v2787_v53 = vsel %vm2708_vm1, %v2606_v44, 0.0  ;;  %v2604_v55 = vmul.f32 %v5238_v3, %v2469_v42  ;;  %v2342_v9 = vadd.f32 %v5227_v52, %v2213_v61 }
 0x1d2   :  { %v1783_v54 = vpop.f32.mrf.mxu1  ;;  %2788 = vadd.xlane.f32.xlu0 %v2787_v53  ;;  %v2472_v13 = vmax.f32 %v2344_v0, 0.0 }
 0x1d3   :  { %v2347_v56 = vadd.f32 %v5227_v52, %v2218_v46  ;;  %2767 = vadd.xlane.f32.xlu1 %v2766_v48  ;;  %v2216_v57 = vmul.f32 %v5220_v47, %v1783_v54  ;;  %v2781_v2 = vsel %vm2708_vm1, %v2604_v55, 0.0  ;;  %v2470_v21 = vmax.f32 %v2342_v9, 0.0 }
 0x1d4   :  { %v4557_v58 = vpop.f32.mrf.mxu1  ;;  %v2607_v29 = vmul.f32 %v5238_v3, %v2472_v13 }
 0x1d5   :  { %v2475_v62 = vmax.f32 %v2347_v56, 0.0  ;;  %v2345_v63 = vadd.f32 %v5227_v52, %v2216_v57  ;;  %v2219_v14 = vmul.f32 %v4557_v58, %v5220_v47  ;;  %v2605_v35 = vmul.f32 %v5238_v3, %v2470_v21 }
 0x1d6   :  { %v1786_v4 = vpop.f32.mrf.mxu1  ;;  %2782 = vadd.xlane.f32.xlu0 %v2781_v2  ;;  %v2790_v38 = vsel %vm2708_vm1, %v2607_v29, 0.0 }
 0x1d7   :  { %v2473_v6 = vmax.f32 %v2345_v63, 0.0  ;;  %2761 = vadd.xlane.f32.xlu1 %v2760_v1  ;;  %v2610_v7 = vmul.f32 %v5238_v3, %v2475_v62  ;;  %v2348_v25 = vadd.f32 %v5227_v52, %v2219_v14  ;;  %v2217_v26 = vmul.f32 %v5220_v47, %v1786_v4 }
 0x1d8   :  { %v4560_v8 = vpop.f32.mrf.mxu1  ;;  %v2784_v48 = vsel %vm2708_vm1, %v2605_v35, 0.0 }
 0x1d9   :  { %v2222_v10 = vmul.f32 %v4560_v8, %v5220_v47  ;;  %v2799_v11 = vsel %vm2708_vm1, %v2610_v7, 0.0  ;;  %v2608_v17 = vmul.f32 %v5238_v3, %v2473_v6  ;;  %v2476_v36 = vmax.f32 %v2348_v25, 0.0 }
 0x1da   :  { %v1799_v16 = vpop.f32.mrf.mxu1  ;;  %2800 = vadd.xlane.f32.xlu0 %v2799_v11  ;;  %v2346_v37 = vadd.f32 %v5227_v52, %v2217_v26 }
 0x1db   :  { %v2351_v18 = vadd.f32 %v5227_v52, %v2222_v10  ;;  %2779 = vadd.xlane.f32.xlu1 %v2778_v15  ;;  %v2220_v19 = vmul.f32 %v5220_v47, %v1799_v16  ;;  %v2793_v27 = vsel %vm2708_vm1, %v2608_v17, 0.0  ;;  %v2611_v54 = vmul.f32 %v5238_v3, %v2476_v36 }
 0x1dc   :  { %v4561_v20 = vpop.f32.mrf.mxu1  ;;  %v2474_v49 = vmax.f32 %v2346_v37, 0.0 }
 0x1dd   :  { %v2479_v22 = vmax.f32 %v2351_v18, 0.0  ;;  %v2349_v23 = vadd.f32 %v5227_v52, %v2220_v19  ;;  %v2223_v32 = vmul.f32 %v4561_v20, %v5220_v47  ;;  %v2802_v0 = vsel %vm2708_vm1, %v2611_v54, 0.0 }
 0x1de   :  { %v1802_v28 = vpop.f32.mrf.mxu1  ;;  %2794 = vadd.xlane.f32.xlu0 %v2793_v27  ;;  %v2609_v2 = vmul.f32 %v5238_v3, %v2474_v49 }
 0x1df   :  { %v2477_v30 = vmax.f32 %v2349_v23, 0.0  ;;  %2773 = vadd.xlane.f32.xlu1 %v2772_v24  ;;  %v2614_v31 = vmul.f32 %v5238_v3, %v2479_v22  ;;  %v2352_v44 = vadd.f32 %v5227_v52, %v2223_v32  ;;  %v2221_v50 = vmul.f32 %v5220_v47, %v1802_v28 }
 0x1e0   :  { %v4564_v59 = vpop.f32.mrf.mxu1  ;;  %v2796_v14 = vsel %vm2708_vm1, %v2609_v2, 0.0 }
 0x1e1   :  { %v2226_v33 = vmul.f32 %v4564_v59, %v5220_v47  ;;  %v2811_v34 = vsel %vm2708_vm1, %v2614_v31, 0.0  ;;  %v2612_v40 = vmul.f32 %v5238_v3, %v2477_v30  ;;  %v2480_v58 = vmax.f32 %v2352_v44, 0.0 }
 0x1e2   :  { %v1815_v39 = vpop.f32.mrf.mxu1  ;;  %2812 = vadd.xlane.f32.xlu0 %v2811_v34  ;;  %v2350_v63 = vadd.f32 %v5227_v52, %v2221_v50 }
 0x1e3   :  { %v2355_v41 = vadd.f32 %v5227_v52, %v2226_v33  ;;  %2791 = vadd.xlane.f32.xlu1 %v2790_v38  ;;  %v2224_v42 = vmul.f32 %v5220_v47, %v1815_v39  ;;  %v2805_v51 = vsel %vm2708_vm1, %v2612_v40, 0.0  ;;  %v2615_v11 = vmul.f32 %v5238_v3, %v2480_v58 }
 0x1e4   :  { %v4565_v43 = vpop.f32.mrf.mxu1  ;;  %v2478_v12 = vmax.f32 %v2350_v63, 0.0 }
 0x1e5   :  { %v2483_v45 = vmax.f32 %v2355_v41, 0.0  ;;  %v2353_v46 = vadd.f32 %v5227_v52, %v2224_v42  ;;  %v2227_v60 = vmul.f32 %v4565_v43, %v5220_v47  ;;  %v2814_v22 = vsel %vm2708_vm1, %v2615_v11, 0.0 }
 0x1e6   :  { %v1818_v53 = vpop.f32.mrf.mxu1  ;;  %2806 = vadd.xlane.f32.xlu0 %v2805_v51  ;;  %v2613_v27 = vmul.f32 %v5238_v3, %v2478_v12 }
 0x1e7   :  { %v2481_v55 = vmax.f32 %v2353_v46, 0.0  ;;  %2785 = vadd.xlane.f32.xlu1 %v2784_v48  ;;  %v2618_v56 = vmul.f32 %v5238_v3, %v2483_v45  ;;  %v2356_v8 = vadd.f32 %v5227_v52, %v2227_v60  ;;  %v2225_v13 = vmul.f32 %v5220_v47, %v1818_v53 }
 0x1e8   :  { %v4568_v57 = vpop.f32.mrf.mxu1  ;;  %v2808_v37 = vsel %vm2708_vm1, %v2613_v27, 0.0 }
 0x1e9   :  { %v2230_v61 = vmul.f32 %v4568_v57, %v5220_v47  ;;  %v2823_v62 = vsel %vm2708_vm1, %v2618_v56, 0.0  ;;  %v2616_v4 = vmul.f32 %v5238_v3, %v2481_v55  ;;  %v2484_v20 = vmax.f32 %v2356_v8, 0.0 }
 0x1ea   :  { %v1831_v1 = vpop.f32.mrf.mxu1  ;;  %2824 = vadd.xlane.f32.xlu0 %v2823_v62  ;;  %v2354_v24 = vadd.f32 %v5227_v52, %v2225_v13 }
 0x1eb   :  { %v2359_v5 = vadd.f32 %v5227_v52, %v2230_v61  ;;  %2803 = vadd.xlane.f32.xlu1 %v2802_v0  ;;  %v2228_v6 = vmul.f32 %v5220_v47, %v1831_v1  ;;  %v2817_v15 = vsel %vm2708_vm1, %v2616_v4, 0.0  ;;  %v2619_v34 = vmul.f32 %v5238_v3, %v2484_v20 }
 0x1ec   :  { %v4569_v7 = vpop.f32.mrf.mxu1  ;;  %v2482_v35 = vmax.f32 %v2354_v24, 0.0 }
 0x1ed   :  { %v2487_v9 = vmax.f32 %v2359_v5, 0.0  ;;  %v2357_v10 = vadd.f32 %v5227_v52, %v2228_v6  ;;  %v2231_v25 = vmul.f32 %v4569_v7, %v5220_v47  ;;  %v2826_v45 = vsel %vm2708_vm1, %v2619_v34, 0.0 }
 0x1ee   :  { %v1834_v16 = vpop.f32.mrf.mxu1  ;;  %2818 = vadd.xlane.f32.xlu0 %v2817_v15  ;;  %v2617_v51 = vmul.f32 %v5238_v3, %v2482_v35 }
 0x1ef   :  { %v2485_v17 = vmax.f32 %v2357_v10, 0.0  ;;  %2797 = vadd.xlane.f32.xlu1 %v2796_v14  ;;  %v2622_v18 = vmul.f32 %v5238_v3, %v2487_v9  ;;  %v2229_v59 = vmul.f32 %v5220_v47, %v1834_v16  ;;  %v2360_v36 = vadd.f32 %v5227_v52, %v2231_v25 }
 0x1f0   :  { %v4572_v19 = vpop.f32.mrf.mxu1  ;;  %v2820_v63 = vsel %vm2708_vm1, %v2617_v51, 0.0 }
 0x1f1   :  { %v2234_v21 = vmul.f32 %v4572_v19, %v5220_v47  ;;  %v2835_v23 = vsel %vm2708_vm1, %v2622_v18, 0.0  ;;  %v2620_v28 = vmul.f32 %v5238_v3, %v2485_v17  ;;  %v2358_v43 = vadd.f32 %v5227_v52, %v2229_v59 }
 0x1f2   :  { %v1847_v26 = vpop.f32.mrf.mxu1  ;;  %2836 = vadd.xlane.f32.xlu0 %v2835_v23  ;;  %v2488_v48 = vmax.f32 %v2360_v36, 0.0 }
 0x1f3   :  { %v2363_v29 = vadd.f32 %v5227_v52, %v2234_v21  ;;  %2815 = vadd.xlane.f32.xlu1 %v2814_v22  ;;  %v2232_v30 = vmul.f32 %v5220_v47, %v1847_v26  ;;  %v2829_v38 = vsel %vm2708_vm1, %v2620_v28, 0.0  ;;  %v2486_v57 = vmax.f32 %v2358_v43, 0.0 }
 0x1f4   :  { %v4573_v31 = vpop.f32.mrf.mxu1  ;;  %v2623_v2 = vmul.f32 %v5238_v3, %v2488_v48 }
 0x1f5   :  { %v2491_v32 = vmax.f32 %v2363_v29, 0.0  ;;  %v2361_v33 = vadd.f32 %v5227_v52, %v2232_v30  ;;  %v2235_v49 = vmul.f32 %v4573_v31, %v5220_v47  ;;  %v2621_v10 = vmul.f32 %v5238_v3, %v2486_v57 }
 0x1f6   :  { %v1850_v39 = vpop.f32.mrf.mxu1  ;;  %2830 = vadd.xlane.f32.xlu0 %v2829_v38  ;;  %v2838_v13 = vsel %vm2708_vm1, %v2623_v2, 0.0 }
 0x1f7   :  { %v2489_v40 = vmax.f32 %v2361_v33, 0.0  ;;  %2809 = vadd.xlane.f32.xlu1 %v2808_v37  ;;  %v2626_v41 = vmul.f32 %v5238_v3, %v2491_v32  ;;  %v2233_v58 = vmul.f32 %v5220_v47, %v1850_v39  ;;  %v2364_v62 = vadd.f32 %v5227_v52, %v2235_v49 }
 0x1f8   :  { %v4576_v42 = vpop.f32.mrf.mxu1  ;;  %v2832_v22 = vsel %vm2708_vm1, %v2621_v10, 0.0 }
 0x1f9   :  { %v2238_v44 = vmul.f32 %v4576_v42, %v5220_v47  ;;  %v2847_v46 = vsel %vm2708_vm1, %v2626_v41, 0.0  ;;  %v2624_v53 = vmul.f32 %v5238_v3, %v2489_v40  ;;  %v2362_v7 = vadd.f32 %v5227_v52, %v2233_v58 }
 0x1fa   :  { %v1863_v50 = vpop.f32.mrf.mxu1  ;;  %2848 = vadd.xlane.f32.xlu0 %v2847_v46  ;;  %v2492_v11 = vmax.f32 %v2364_v62, 0.0 }
 0x1fb   :  { %v2367_v54 = vadd.f32 %v5227_v52, %v2238_v44  ;;  %2827 = vadd.xlane.f32.xlu1 %v2826_v45  ;;  %v2236_v55 = vmul.f32 %v5220_v47, %v1863_v50  ;;  %v2841_v0 = vsel %vm2708_vm1, %v2624_v53, 0.0  ;;  %v2490_v19 = vmax.f32 %v2362_v7, 0.0 }
 0x1fc   :  { %v4577_v56 = vpop.f32.mrf.mxu1  ;;  %v2627_v27 = vmul.f32 %v5238_v3, %v2492_v11 }
 0x1fd   :  { %v2495_v60 = vmax.f32 %v2367_v54, 0.0  ;;  %v2365_v61 = vadd.f32 %v5227_v52, %v2236_v55  ;;  %v2239_v12 = vmul.f32 %v4577_v56, %v5220_v47  ;;  %v2625_v33 = vmul.f32 %v5238_v3, %v2490_v19 }
 0x1fe   :  { %v1866_v1 = vpop.f32.mrf.mxu1  ;;  %2842 = vadd.xlane.f32.xlu0 %v2841_v0  ;;  %v2850_v36 = vsel %vm2708_vm1, %v2627_v27, 0.0 }
 0x1ff   :  { %v2493_v4 = vmax.f32 %v2365_v61, 0.0  ;;  %2821 = vadd.xlane.f32.xlu1 %v2820_v63  ;;  %v2630_v5 = vmul.f32 %v5238_v3, %v2495_v60  ;;  %v2368_v23 = vadd.f32 %v5227_v52, %v2239_v12  ;;  %v2237_v24 = vmul.f32 %v5220_v47, %v1866_v1 }
 0x200   :  { %v4580_v6 = vpop.f32.mrf.mxu1  ;;  %v2844_v45 = vsel %vm2708_vm1, %v2625_v33, 0.0 }
 0x201   :  { %v2242_v8 = vmul.f32 %v4580_v6, %v5220_v47  ;;  %v2859_v9 = vsel %vm2708_vm1, %v2630_v5, 0.0  ;;  %v2628_v15 = vmul.f32 %v5238_v3, %v2493_v4  ;;  %v2496_v34 = vmax.f32 %v2368_v23, 0.0 }
 0x202   :  { %v1879_v14 = vpop.f32.mrf.mxu1  ;;  %2860 = vadd.xlane.f32.xlu0 %v2859_v9  ;;  %v2366_v35 = vadd.f32 %v5227_v52, %v2237_v24 }
 0x203   :  { %v2371_v16 = vadd.f32 %v5227_v52, %v2242_v8  ;;  %2839 = vadd.xlane.f32.xlu1 %v2838_v13  ;;  %v2240_v17 = vmul.f32 %v5220_v47, %v1879_v14  ;;  %v2853_v25 = vsel %vm2708_vm1, %v2628_v15, 0.0  ;;  %v2631_v51 = vmul.f32 %v5238_v3, %v2496_v34  ;;  %v5513_v8 = vld [vmem:[%s6243_s5] sm:$0xff] }
 0x204   :  { %v4581_v18 = vpop.f32.mrf.mxu1  ;;  %v2494_v46 = vmax.f32 %v2366_v35, 0.0 }
 0x205   :  { %v2499_v20 = vmax.f32 %v2371_v16, 0.0  ;;  %v2369_v21 = vadd.f32 %v5227_v52, %v2240_v17  ;;  %v2243_v31 = vmul.f32 %v4581_v18, %v5220_v47  ;;  %v2862_v62 = vsel %vm2708_vm1, %v2631_v51, 0.0 }
 0x206   :  { %v1882_v26 = vpop.f32.mrf.mxu1  ;;  %2854 = vadd.xlane.f32.xlu0 %v2853_v25  ;;  %v2629_v0 = vmul.f32 %v5238_v3, %v2494_v46  ;;  %v5529_v25 = vld [vmem:[%s6244_s6] ss:$0 sm:$0xff] }
 0x207   :  { %v2497_v28 = vmax.f32 %v2369_v21, 0.0  ;;  %2833 = vadd.xlane.f32.xlu1 %v2832_v22  ;;  %v2634_v29 = vmul.f32 %v5238_v3, %v2499_v20  ;;  %v2372_v42 = vadd.f32 %v5227_v52, %v2243_v31  ;;  %v2241_v48 = vmul.f32 %v5220_v47, %v1882_v26 }
 0x208   :  { %v4584_v30 = vpop.f32.mrf.mxu1  ;;  %v2856_v13 = vsel %vm2708_vm1, %v2629_v0, 0.0 }
 0x209   :  { %v2246_v59 = vmul.f32 %v4584_v30, %v5220_v47  ;;  %v2871_v32 = vsel %vm2708_vm1, %v2634_v29, 0.0  ;;  %v2632_v38 = vmul.f32 %v5238_v3, %v2497_v28  ;;  %v2500_v56 = vmax.f32 %v2372_v42, 0.0 }
 0x20a   :  { %v1895_v37 = vpop.f32.mrf.mxu1  ;;  %2872 = vadd.xlane.f32.xlu0 %v2871_v32  ;;  %v2370_v61 = vadd.f32 %v5227_v52, %v2241_v48 }
 0x20b   :  { %v2375_v39 = vadd.f32 %v5227_v52, %v2246_v59  ;;  %2851 = vadd.xlane.f32.xlu1 %v2850_v36  ;;  %v2244_v40 = vmul.f32 %v5220_v47, %v1895_v37  ;;  %v2865_v49 = vsel %vm2708_vm1, %v2632_v38, 0.0  ;;  %v2635_v10 = vmul.f32 %v5238_v3, %v2500_v56 }
 0x20c   :  { %v4585_v41 = vpop.f32.mrf.mxu1  ;;  %v2498_v11 = vmax.f32 %v2370_v61, 0.0 }
 0x20d   :  { %v2503_v43 = vmax.f32 %v2375_v39, 0.0  ;;  %v2373_v44 = vadd.f32 %v5227_v52, %v2244_v40  ;;  %v2247_v57 = vmul.f32 %v4585_v41, %v5220_v47  ;;  %v2874_v20 = vsel %vm2708_vm1, %v2635_v10, 0.0 }
 0x20e   :  { %v1898_v50 = vpop.f32.mrf.mxu1  ;;  %2866 = vadd.xlane.f32.xlu0 %v2865_v49 }
 0x20f   :  { %v2501_v53 = vmax.f32 %v2373_v44, 0.0  ;;  %2845 = vadd.xlane.f32.xlu1 %v2844_v45  ;;  %v2638_v54 = vmul.f32 %v5238_v3, %v2503_v43  ;;  %v2376_v6 = vadd.f32 %v5227_v52, %v2247_v57  ;;  %v2245_v12 = vmul.f32 %v5220_v47, %v1898_v50 }
 0x210   :  { %v4588_v55 = vpop.f32.mrf.mxu1 }
 0x211   :  { %v2250_v58 = vmul.f32 %v4588_v55, %v5220_v47  ;;  %v2883_v60 = vsel %vm2708_vm1, %v2638_v54, 0.0  ;;  %v2636_v1 = vmul.f32 %v5238_v3, %v2501_v53  ;;  %v2504_v18 = vmax.f32 %v2376_v6, 0.0 }
 0x212   :  { %v1911_v63 = vpop.f32.mrf.mxu1  ;;  %2884 = vadd.xlane.f32.xlu0 %v2883_v60  ;;  %v2374_v22 = vadd.f32 %v5513_v8, %v2245_v12 }
 0x213   :  { %v2379_v2 = vadd.f32 %v5227_v52, %v2250_v58  ;;  %2863 = vadd.xlane.f32.xlu1 %v2862_v62  ;;  %v2248_v4 = vmul.f32 %v5220_v47, %v1911_v63  ;;  %v2877_v14 = vsel %vm2708_vm1, %v2636_v1, 0.0  ;;  %v2639_v32 = vmul.f32 %v5529_v25, %v2504_v18 }
 0x214   :  { %v4589_v5 = vpop.f32.mrf.mxu1  ;;  %v2502_v33 = vmax.f32 %v2374_v22, 0.0 }
 0x215   :  { %v2507_v7 = vmax.f32 %v2379_v2, 0.0  ;;  %v2377_v9 = vadd.f32 %v5513_v8, %v2248_v4  ;;  %v2251_v23 = vmul.f32 %v4589_v5, %v5220_v47  ;;  %v2886_v43 = vsel %vm2708_vm1, %v2639_v32, 0.0 }
 0x216   :  { %v1914_v15 = vpop.f32.mrf.mxu1  ;;  %2878 = vadd.xlane.f32.xlu0 %v2877_v14  ;;  %v2637_v49 = vmul.f32 %v5529_v25, %v2502_v33  ;;  %v3221_v4 = vlaneseq }
 0x217   :  { %v2505_v16 = vmax.f32 %v2377_v9, 0.0  ;;  %2857 = vadd.xlane.f32.xlu1 %v2856_v13  ;;  %v2642_v52 = vmul.f32 %v5238_v3, %v2507_v7  ;;  %v2633_v3 = vmul.f32 %v5529_v25, %v2498_v11  ;;  %v2249_v30 = vmul.f32 %v5220_v47, %v1914_v15 }
 0x218   :  { %v4592_v17 = vpop.f32.mrf.mxu1  ;;  %v2380_v34 = vadd.f32 %v5513_v8, %v2251_v23  ;;  %v2880_v58 = vsel %vm2708_vm1, %v2637_v49, 0.0 }
 0x219   :  { %v2254_v19 = vmul.f32 %v4592_v17, %v5220_v47  ;;  %v2895_v21 = vsel %vm2708_vm1, %v2642_v52, 0.0  ;;  %v2640_v26 = vmul.f32 %v5529_v25, %v2505_v16  ;;  %v2868_v35 = vsel %vm2708_vm1, %v2633_v3, 0.0 }
 0x21a   :  { %v1927_v24 = vpop.f32.mrf.mxu1  ;;  %2896 = vadd.xlane.f32.xlu0 %v2895_v21  ;;  %v2378_v41 = vadd.f32 %v5513_v8, %v2249_v30  ;;  %v2508_v45 = vmax.f32 %v2380_v34, 0.0  ;;  %v5565_v52 = vand.u32 127, %v3221_v4 }
 0x21b   :  { %v2383_v27 = vadd.f32 %v5513_v8, %v2254_v19  ;;  %2875 = vadd.xlane.f32.xlu1 %v2874_v20  ;;  %v2252_v28 = vmul.f32 %v5220_v47, %v1927_v24  ;;  %v2889_v36 = vsel %vm2708_vm1, %v2640_v26, 0.0  ;;  %v5567_v20 = vshrl.u32 %v3221_v4, 7 }
 0x21c   :  { %v4593_v29 = vpop.f32.mrf.mxu1  ;;  %v2506_v55 = vmax.f32 %v2378_v41, 0.0  ;;  %v2643_v62 = vmul.f32 %v5529_v25, %v2508_v45 }
 0x21d   :  { %v2511_v31 = vmax.f32 %v2383_v27, 0.0  ;;  %v2381_v59 = vadd.f32 %v5513_v8, %v2252_v28  ;;  %v2255_v46 = vmul.f32 %v4593_v29, %v5220_v47 }
 0x21e   :  { %v1930_v37 = vpop.f32.mrf.mxu1  ;;  %2890 = vadd.xlane.f32.xlu0 %v2889_v36  ;;  %v2641_v9 = vmul.f32 %v5529_v25, %v2506_v55  ;;  %v2898_v12 = vsel %vm2708_vm1, %v2643_v62, 0.0 }
 0x21f   :  { %v2509_v38 = vmax.f32 %v2381_v59, 0.0  ;;  %2869 = vadd.xlane.f32.xlu1 %v2868_v35  ;;  %v2646_v39 = vmul.f32 %v5529_v25, %v2511_v31  ;;  %v2253_v53 = vmul.f32 %v5220_v47, %v1930_v37  ;;  %v2384_v57 = vadd.f32 %v5513_v8, %v2255_v46 }
 0x220   :  { %v4596_v40 = vpop.f32.mrf.mxu1  ;;  %v2892_v22 = vsel %vm2708_vm1, %v2641_v9, 0.0 }
 0x221   :  { %v2258_v42 = vmul.f32 %v4596_v40, %v5220_v47  ;;  %v2907_v44 = vsel %vm2708_vm1, %v2646_v39, 0.0  ;;  %v2644_v50 = vmul.f32 %v5529_v25, %v2509_v38  ;;  %v2382_v1 = vadd.f32 %v5513_v8, %v2253_v53 }
 0x222   :  { %v1943_v48 = vpop.f32.mrf.mxu1  ;;  %2908 = vadd.xlane.f32.xlu0 %v2907_v44  ;;  %v2512_v10 = vmax.f32 %v2384_v57, 0.0  ;;  %v5586_v40 = vsub.s32 %v5565_v52, %v5567_v20 }
 0x223   :  { %v2387_v51 = vadd.f32 %v5513_v8, %v2258_v42  ;;  %2887 = vadd.xlane.f32.xlu1 %v2886_v43  ;;  %v2901_v60 = vsel %vm2708_vm1, %v2644_v50, 0.0  ;;  %v2256_v11 = vmul.f32 %v5220_v47, %v1943_v48  ;;  %v2510_v16 = vmax.f32 %v2382_v1, 0.0 }
 0x224   :  { %v4597_v54 = vpop.f32.mrf.mxu1  ;;  %v2647_v27 = vmul.f32 %v5529_v25, %v2512_v10 }
 0x225   :  { %v2515_v56 = vmax.f32 %v2387_v51, 0.0  ;;  %v2385_v23 = vadd.f32 %v5513_v8, %v2256_v11  ;;  %v2259_v24 = vmul.f32 %v4597_v54, %v5220_v47  ;;  %v2645_v33 = vmul.f32 %v5529_v25, %v2510_v16 }
 0x226   :  { %v1946_v61 = vpop.f32.mrf.mxu1  ;;  %2902 = vadd.xlane.f32.xlu0 %v2901_v60  ;;  %v2910_v42 = vsel %vm2708_vm1, %v2647_v27, 0.0 }
 0x227   :  { %2881 = vadd.xlane.f32.xlu1 %v2880_v58  ;;  %v2257_v63 = vmul.f32 %v5220_v47, %v1946_v61  ;;  %v2650_v0 = vmul.f32 %v5529_v25, %v2515_v56  ;;  %v2513_v38 = vmax.f32 %v2385_v23, 0.0  ;;  %v2388_v39 = vadd.f32 %v5513_v8, %v2259_v24 }
 0x228   :  { %v4600_v2 = vpop.f32.mrf.mxu1  ;;  %v2904_v55 = vsel %vm2708_vm1, %v2645_v33, 0.0 }
 0x229   :  { %v2386_v5 = vadd.f32 %v5513_v8, %v2257_v63  ;;  %v2262_v6 = vmul.f32 %v4600_v2, %v5220_v47  ;;  %v2919_v7 = vsel %vm2708_vm1, %v2650_v0, 0.0  ;;  %v2516_v56 = vmax.f32 %v2388_v39, 0.0 }
 0x22a   :  { %v1959_v13 = vpop.f32.mrf.mxu1  ;;  %2920 = vadd.xlane.f32.xlu0 %v2919_v7  ;;  %v2648_v61 = vmul.f32 %v5529_v25, %v2513_v38 }
 0x22b   :  { %v2514_v14 = vmax.f32 %v2386_v5, 0.0  ;;  %v2391_v15 = vadd.f32 %v5513_v8, %v2262_v6  ;;  %2899 = vadd.xlane.f32.xlu1 %v2898_v12  ;;  %v2260_v34 = vmul.f32 %v5220_v47, %v1959_v13 }
 0x22c   :  { %v2717_v17 = vpop.xlane.xlu1 %2716  ;;  %v4601_v18 = vpop.f32.mrf.mxu1  ;;  %v2913_v11 = vsel %vm2708_vm1, %v2648_v61, 0.0 }
 0x22d   :  { %v2519_v19 = vmax.f32 %v2391_v15, 0.0  ;;  %v2263_v21 = vmul.f32 %v4601_v18, %v5220_v47  ;;  %v2649_v26 = vmul.f32 %v5529_v25, %v2514_v14  ;;  %v2389_v51 = vadd.f32 %v5513_v8, %v2260_v34 }
 0x22e   :  { %v1962_v3 = vpop.f32.mrf.mxu1  ;;  %v2711_v41 = vpop.xlane.xlu0 %2710  ;;  %v3234_v57 = vrot.slane %v2717_v17, %v5586_v40  ;;  %v2651_v14 = vmul.f32 %v5529_v25, %v2516_v56 }
 0x22f   :  { %v2392_v28 = vadd.f32 %v5513_v8, %v2263_v21  ;;  %2893 = vadd.xlane.f32.xlu1 %v2892_v22  ;;  %v2261_v29 = vmul.f32 %v5220_v47, %v1962_v3  ;;  %v2916_v31 = vsel %vm2708_vm1, %v2649_v26, 0.0  ;;  %v2654_v32 = vmul.f32 %v5529_v25, %v2519_v19 }
 0x230   :  { %v2720_v30 = vpop.xlane.xlu1 %2719  ;;  %v4604_v59 = vpop.f32.mrf.mxu1  ;;  %2917 = vadd.xlane.f32.xlu0 %v2916_v31  ;;  %v3226_v53 = vrot.slane %v2711_v41, %v5586_v40  ;;  %v2517_v7 = vmax.f32 %v2389_v51, 0.0  ;;  %v2922_v26 = vsel %vm2708_vm1, %v2651_v14, 0.0 }
 0x231   :  { %v2520_v35 = vmax.f32 %v2392_v28, 0.0  ;;  %v2390_v36 = vadd.f32 %v5513_v8, %v2261_v29  ;;  %v2266_v37 = vmul.f32 %v4604_v59, %v5220_v47  ;;  %v2931_v48 = vsel %vm2708_vm1, %v2654_v32, 0.0 }
 0x232   :  { %v1975_v43 = vpop.f32.mrf.mxu1  ;;  %v3238_v62 = vrot.slane %v2720_v30, %v5586_v40  ;;  %v2652_v23 = vmul.f32 %v5529_v25, %v2517_v7 }
 0x233   :  { %2911 = vadd.xlane.f32.xlu1 %v2910_v42  ;;  %v2518_v44 = vmax.f32 %v2390_v36, 0.0  ;;  %v2395_v45 = vadd.f32 %v5513_v8, %v2266_v37  ;;  %v2655_v50 = vmul.f32 %v5529_v25, %v2520_v35  ;;  %v2264_v58 = vmul.f32 %v5220_v47, %v1975_v43 }
 0x234   :  { %v2714_v46 = vpop.xlane.xlu1 %2713  ;;  %v4605_v49 = vpop.f32.mrf.mxu1  ;;  %2932 = vadd.xlane.f32.xlu0 %v2931_v48  ;;  %v2925_v37 = vsel %vm2708_vm1, %v2652_v23, 0.0 }
 0x235   :  { %v3230_v54 = vrot.slane %v2714_v46, %v5586_v40  ;;  %v2523_v0 = vmax.f32 %v2395_v45, 0.0  ;;  %v2934_v4 = vsel %vm2708_vm1, %v2655_v50, 0.0  ;;  %v2653_v6 = vmul.f32 %v5529_v25, %v2518_v44 }
 0x236   :  { %v1978_v60 = vpop.f32.mrf.mxu1  ;;  %v2267_v9 = vmul.f32 %v4605_v49, %v5220_v47  ;;  %v2393_v10 = vadd.f32 %v5513_v8, %v2264_v58 }
 0x237   :  { %v3736_v63 = vsel %vm3735_vm2, %v3230_v54, %v3226_v53  ;;  %2905 = vadd.xlane.f32.xlu1 %v2904_v55  ;;  %v2928_v16 = vsel %vm2708_vm1, %v2653_v6, 0.0  ;;  %v2658_v17 = vmul.f32 %v5529_v25, %v2523_v0  ;;  %v2265_v19 = vmul.f32 %v5220_v47, %v1978_v60 }
 0x238   :  { %v3738_v1 = vsel %vm3737_vm3, %v3234_v57, %v3736_v63  ;;  %v5602_v2 = vpop.xlane.xlu1 %2728  ;;  %v4608_v5 = vpop.f32.mrf.mxu1  ;;  %2935 = vadd.xlane.f32.xlu0 %v2934_v4  ;;  %v2396_v18 = vadd.f32 %v5513_v8, %v2267_v9  ;;  %v2521_v24 = vmax.f32 %v2393_v10, 0.0 }
 0x239   :  { %v3740_v13 = vsel %vm3739_vm4, %v3238_v62, %v3738_v1  ;;  %v2270_v27 = vmul.f32 %v4608_v5, %v5220_v47  ;;  %v2943_v33 = vsel %vm2708_vm1, %v2658_v17, 0.0  ;;  %v2394_v35 = vadd.f32 %v5513_v8, %v2265_v19 }
 0x23a   :  { %v1991_v12 = vpop.f32.mrf.mxu1  ;;  %v2524_v34 = vmax.f32 %v2396_v18, 0.0  ;;  %v2656_v42 = vmul.f32 %v5529_v25, %v2521_v24  ;;  %v3250_v55 = vrot.slane %v5602_v2, %v5586_v40 }
 0x23b   :  { %2914 = vadd.xlane.f32.xlu1 %v2913_v11  ;;  %v5621_v30 = vpop.xlane.xlu0 %2740  ;;  %v2399_v43 = vadd.f32 %v5513_v8, %v2270_v27  ;;  %v2268_v44 = vmul.f32 %v5220_v47, %v1991_v12  ;;  %v2522_v54 = vmax.f32 %v2394_v35, 0.0 }
 0x23c   :  { %v2723_v15 = vpop.xlane.xlu1 %2722  ;;  %2929 = vadd.xlane.f32.xlu0 %v2928_v16  ;;  %v4609_v22 = vpop.f32.mrf.mxu1  ;;  %v2659_v58 = vmul.f32 %v5529_v25, %v2524_v34  ;;  %v2937_v62 = vsel %vm2708_vm1, %v2656_v42, 0.0  ;;  %v3266_v35 = vrot.slane %v5621_v30, %v5586_v40 }
 0x23d   :  { %v3242_v21 = vrot.slane %v2723_v15, %v5586_v40  ;;  %v2271_v3 = vmul.f32 %v4609_v22, %v5220_v47  ;;  %v2397_v0 = vadd.f32 %v5513_v8, %v2268_v44  ;;  %v2527_v5 = vmax.f32 %v2399_v43, 0.0 }
 0x23e   :  { %v1994_v29 = vpop.f32.mrf.mxu1  ;;  %v2946_v12 = vsel %vm2708_vm1, %v2659_v58, 0.0  ;;  %v2657_v16 = vmul.f32 %v5529_v25, %v2522_v54 }
 0x23f   :  { %v3742_v28 = vsel %vm3741_vm5, %v3242_v21, %v3740_v13  ;;  %2923 = vadd.xlane.f32.xlu1 %v2922_v26  ;;  %v2400_v31 = vadd.f32 %v5513_v8, %v2271_v3  ;;  %v2269_v59 = vmul.f32 %v5220_v47, %v1994_v29  ;;  %v2525_v18 = vmax.f32 %v2397_v0, 0.0 }
 0x240   :  { %v2732_v32 = vpop.xlane.xlu1 %2731  ;;  %2944 = vadd.xlane.f32.xlu0 %v2943_v33  ;;  %v4612_v36 = vpop.f32.mrf.mxu1 }
 0x241   :  { %v2528_v38 = vmax.f32 %v2400_v31, 0.0  ;;  %v2398_v39 = vadd.f32 %v5513_v8, %v2269_v59  ;;  %v2274_v41 = vmul.f32 %v4612_v36, %v5220_v47  ;;  %v3254_v9 = vrot.slane %v2732_v32, %v5586_v40 }
 0x242   :  { %v2007_v45 = vpop.f32.mrf.mxu1  ;;  %v2940_v31 = vsel %vm2708_vm1, %v2657_v16, 0.0  ;;  %v2660_v34 = vmul.f32 %v5529_v25, %v2525_v18 }
 0x243   :  { %2926 = vadd.xlane.f32.xlu1 %v2925_v37  ;;  %v2526_v46 = vmax.f32 %v2398_v39, 0.0  ;;  %v2403_v48 = vadd.f32 %v5513_v8, %v2274_v41  ;;  %v2272_v49 = vmul.f32 %v5220_v47, %v2007_v45  ;;  %v5635_v51 = vpop.xlane.xlu0 %2752  ;;  %v2663_v53 = vmul.f32 %v5529_v25, %v2528_v38 }
 0x244   :  { %v2726_v50 = vpop.xlane.xlu1 %2725  ;;  %v4613_v57 = vpop.f32.mrf.mxu1 }
 0x245   :  { %v3246_v56 = vrot.slane %v2726_v50, %v5586_v40  ;;  %v2531_v60 = vmax.f32 %v2403_v48, 0.0  ;;  %v2401_v61 = vadd.f32 %v5513_v8, %v2272_v49  ;;  %v2958_v63 = vsel %vm2708_vm1, %v2663_v53, 0.0 }
 0x246   :  { %2959 = vadd.xlane.f32.xlu0 %v2958_v63  ;;  %v2010_v4 = vpop.f32.mrf.mxu1  ;;  %v2661_v2 = vmul.f32 %v5529_v25, %v2526_v46  ;;  %v2275_v10 = vmul.f32 %v4613_v57, %v5220_v47 }
 0x247   :  { %v3744_v1 = vsel %vm3743_vm6, %v3246_v56, %v3742_v28  ;;  %2938 = vadd.xlane.f32.xlu1 %v2937_v62  ;;  %v5648_v7 = vpop.xlane.xlu0 %2746  ;;  %v2529_v14 = vmax.f32 %v2401_v61, 0.0  ;;  %v2666_v17 = vmul.f32 %v5529_v25, %v2531_v60  ;;  %v2273_v22 = vmul.f32 %v5220_v47, %v2010_v4 }
 0x248   :  { %v2735_v6 = vpop.xlane.xlu1 %2734  ;;  %v4616_v11 = vpop.f32.mrf.mxu1  ;;  %v3746_v13 = vsel %vm3745_vm7, %v3250_v55, %v3744_v1  ;;  %v2952_v15 = vsel %vm2708_vm1, %v2661_v2, 0.0  ;;  %v2404_v26 = vadd.f32 %v5513_v8, %v2275_v10  ;;  %v2662_v28 = vmul.f32 %v5529_v25, %v2527_v5 }
 0x249   :  { %v5658_v21 = vsel %vm3747_vm8, %v3254_v9, %v3746_v13  ;;  %v2967_v59 = vsel %vm2708_vm1, %v2666_v17, 0.0  ;;  %v2664_v32 = vmul.f32 %v5529_v25, %v2529_v14  ;;  %v2402_v36 = vadd.f32 %v5513_v8, %v2273_v22 }
 0x24a   :  { %2953 = vadd.xlane.f32.xlu0 %v2952_v15  ;;  %v2023_v19 = vpop.f32.mrf.mxu1  ;;  %v2532_v41 = vmax.f32 %v2404_v26, 0.0  ;;  %v3258_v42 = vrot.slane %v2735_v6, %v5586_v40  ;;  %v2278_v43 = vmul.f32 %v4616_v11, %v5220_v47  ;;  %v2955_v48 = vsel %vm2708_vm1, %v2662_v28, 0.0 }
 0x24b   :  { %2947 = vadd.xlane.f32.xlu1 %v2946_v12  ;;  %v2276_v23 = vmul.f32 %v5220_v47, %v2023_v19  ;;  %v5662_v3 = vpop.xlane.xlu0 %2764  ;;  %v2961_v30 = vsel %vm2708_vm1, %v2664_v32, 0.0  ;;  %v3274_v50 = vrot.slane %v5648_v7, %v5586_v40  ;;  %v2949_v56 = vsel %vm2708_vm1, %v2660_v34, 0.0 }
 0x24c   :  { %v2744_v24 = vpop.xlane.xlu1 %2743  ;;  %v4617_v27 = vpop.f32.mrf.mxu1  ;;  %v2530_v57 = vmax.f32 %v2402_v36, 0.0  ;;  %v2407_v0 = vadd.f32 %v5513_v8, %v2278_v43  ;;  %v2667_v5 = vmul.f32 %v5529_v25, %v2532_v41  ;;  %v3282_v17 = vrot.slane %v5635_v51, %v5586_v40 }
 0x24d   :  { %v2405_v29 = vadd.f32 %v5513_v8, %v2276_v23  ;;  %v3270_v53 = vrot.slane %v2744_v24, %v5586_v40  ;;  %v2279_v1 = vmul.f32 %v4617_v27, %v5220_v47 }
 0x24e   :  { %2968 = vadd.xlane.f32.xlu0 %v2967_v59  ;;  %v2026_v33 = vpop.f32.mrf.mxu1  ;;  %v2535_v18 = vmax.f32 %v2407_v0, 0.0  ;;  %v2970_v26 = vsel %vm2708_vm1, %v2667_v5, 0.0  ;;  %v2665_v28 = vmul.f32 %v5529_v25, %v2530_v57 }
 0x24f   :  { %2941 = vadd.xlane.f32.xlu1 %v2940_v31  ;;  %v2533_v37 = vmax.f32 %v2405_v29, 0.0  ;;  %v5674_v39 = vpop.xlane.xlu0 %2758  ;;  %v2277_v12 = vmul.f32 %v5220_v47, %v2026_v33  ;;  %v2408_v19 = vadd.f32 %v5513_v8, %v2279_v1  ;;  %v3298_v1 = vrot.slane %v5662_v3, %v5586_v40 }
 0x250   :  { %v2738_v38 = vpop.xlane.xlu1 %2737  ;;  %v4620_v45 = vpop.f32.mrf.mxu1 }
 0x251   :  { %v3262_v44 = vrot.slane %v2738_v38, %v5586_v40  ;;  %v2282_v46 = vmul.f32 %v4620_v45, %v5220_v47  ;;  %v2668_v49 = vmul.f32 %v5529_v25, %v2533_v37  ;;  %v2406_v32 = vadd.f32 %v5513_v8, %v2277_v12 }
 0x252   :  { %2962 = vadd.xlane.f32.xlu0 %v2961_v30  ;;  %v2039_v55 = vpop.f32.mrf.mxu1  ;;  %v2536_v37 = vmax.f32 %v2408_v19, 0.0 }
 0x253   :  { %v3749_v54 = vsel %vm3735_vm2, %v3262_v44, %v3258_v42  ;;  %2956 = vadd.xlane.f32.xlu1 %v2955_v48  ;;  %v2411_v60 = vadd.f32 %v5513_v8, %v2282_v46  ;;  %v2280_v61 = vmul.f32 %v5220_v47, %v2039_v55  ;;  %v5691_v63 = vpop.xlane.xlu0 %2776  ;;  %v2973_v9 = vsel %vm2708_vm1, %v2668_v49, 0.0 }
 0x254   :  { %v3750_v58 = vsel %vm3737_vm3, %v3266_v35, %v3749_v54  ;;  %v2756_v62 = vpop.xlane.xlu1 %2755  ;;  %v4621_v4 = vpop.f32.mrf.mxu1  ;;  %v2670_v42 = vmul.f32 %v5529_v25, %v2535_v18  ;;  %v2964_v46 = vsel %vm2708_vm1, %v2665_v28, 0.0  ;;  %v2671_v0 = vmul.f32 %v5529_v25, %v2536_v37 }
 0x255   :  { %v3751_v2 = vsel %vm3739_vm4, %v3270_v53, %v3750_v58  ;;  %v2539_v6 = vmax.f32 %v2411_v60, 0.0  ;;  %v2409_v7 = vadd.f32 %v5513_v8, %v2280_v61  ;;  %v2283_v29 = vmul.f32 %v4621_v4, %v5220_v47 }
 0x256   :  { %v3752_v10 = vsel %vm3741_vm5, %v3274_v50, %v3751_v2  ;;  %2974 = vadd.xlane.f32.xlu0 %v2973_v9  ;;  %v2042_v11 = vpop.f32.mrf.mxu1  ;;  %v3286_v38 = vrot.slane %v2756_v62, %v5586_v40  ;;  %v2534_v53 = vmax.f32 %v2406_v32, 0.0  ;;  %v3290_v58 = vrot.slane %v5674_v39, %v5586_v40 }
 0x257   :  { %2950 = vadd.xlane.f32.xlu1 %v2949_v56  ;;  %v2537_v13 = vmax.f32 %v2409_v7, 0.0  ;;  %v5701_v15 = vpop.xlane.xlu0 %2770  ;;  %v2674_v16 = vmul.f32 %v5529_v25, %v2539_v6  ;;  %v2412_v30 = vadd.f32 %v5513_v8, %v2283_v29  ;;  %v2281_v60 = vmul.f32 %v5220_v47, %v2042_v11 }
 0x258   :  { %v2750_v14 = vpop.xlane.xlu1 %2749  ;;  %v4624_v23 = vpop.f32.mrf.mxu1  ;;  %v2979_v2 = vsel %vm2708_vm1, %v2670_v42, 0.0  ;;  %v3306_v29 = vrot.slane %v5701_v15, %v5586_v40 }
 0x259   :  { %v3278_v22 = vrot.slane %v2750_v14, %v5586_v40  ;;  %v2286_v24 = vmul.f32 %v4624_v23, %v5220_v47  ;;  %v2991_v27 = vsel %vm2708_vm1, %v2674_v16, 0.0  ;;  %v2672_v59 = vmul.f32 %v5529_v25, %v2537_v13 }
 0x25a   :  { %2992 = vadd.xlane.f32.xlu0 %v2991_v27  ;;  %v2055_v51 = vpop.f32.mrf.mxu1  ;;  %v2540_v6 = vmax.f32 %v2412_v30, 0.0  ;;  %v2669_v16 = vmul.f32 %v5529_v25, %v2534_v53  ;;  %v3314_v30 = vrot.slane %v5691_v63, %v5586_v40 }
 0x25b   :  { %v3753_v31 = vsel %vm3743_vm6, %v3278_v22, %v3752_v10  ;;  %2971 = vadd.xlane.f32.xlu1 %v2970_v26  ;;  %v2415_v33 = vadd.f32 %v5513_v8, %v2286_v24  ;;  %v2284_v34 = vmul.f32 %v5220_v47, %v2055_v51  ;;  %v5718_v36 = vpop.xlane.xlu0 %2788  ;;  %v2985_v48 = vsel %vm2708_vm1, %v2672_v59, 0.0 }
 0x25c   :  { %v2768_v35 = vpop.xlane.xlu1 %2767  ;;  %v4625_v41 = vpop.f32.mrf.mxu1  ;;  %v3754_v43 = vsel %vm3745_vm7, %v3282_v17, %v3753_v31  ;;  %v2410_v17 = vadd.f32 %v5513_v8, %v2281_v60  ;;  %v2982_v22 = vsel %vm2708_vm1, %v2671_v0, 0.0  ;;  %v2675_v51 = vmul.f32 %v5529_v25, %v2540_v6 }
 0x25d   :  { %v2543_v44 = vmax.f32 %v2415_v33, 0.0  ;;  %v2413_v45 = vadd.f32 %v5513_v8, %v2284_v34  ;;  %v5728_v50 = vsel %vm3747_vm8, %v3286_v38, %v3754_v43  ;;  %v3302_v7 = vrot.slane %v2768_v35, %v5586_v40 }
 0x25e   :  { %2986 = vadd.xlane.f32.xlu0 %v2985_v48  ;;  %v2058_v49 = vpop.f32.mrf.mxu1  ;;  %v2287_v18 = vmul.f32 %v4625_v41, %v5220_v47  ;;  %v2538_v38 = vmax.f32 %v2410_v17, 0.0  ;;  %v2976_v43 = vsel %vm2708_vm1, %v2669_v16, 0.0 }
 0x25f   :  { %2965 = vadd.xlane.f32.xlu1 %v2964_v46  ;;  %v2541_v54 = vmax.f32 %v2413_v45, 0.0  ;;  %v5730_v56 = vpop.xlane.xlu0 %2782  ;;  %v2678_v57 = vmul.f32 %v5529_v25, %v2543_v44  ;;  %v2285_v59 = vmul.f32 %v5220_v47, %v2058_v49 }
 0x260   :  { %v2762_v55 = vpop.xlane.xlu1 %2761  ;;  %v4628_v62 = vpop.f32.mrf.mxu1  ;;  %v2416_v41 = vadd.f32 %v5513_v8, %v2287_v18 }
 0x261   :  { %v3294_v61 = vrot.slane %v2762_v55, %v5586_v40  ;;  %v2290_v4 = vmul.f32 %v4628_v62, %v5220_v47  ;;  %v3003_v5 = vsel %vm2708_vm1, %v2678_v57, 0.0  ;;  %v2676_v10 = vmul.f32 %v5529_v25, %v2541_v54 }
 0x262   :  { %3004 = vadd.xlane.f32.xlu0 %v3003_v5  ;;  %v2071_v9 = vpop.f32.mrf.mxu1  ;;  %v2414_v55 = vadd.f32 %v5513_v8, %v2285_v59 }
 0x263   :  { %v3756_v39 = vsel %vm3735_vm2, %v3294_v61, %v3290_v58  ;;  %2980 = vadd.xlane.f32.xlu1 %v2979_v2  ;;  %v2419_v3 = vadd.f32 %v5513_v8, %v2290_v4  ;;  %v2288_v12 = vmul.f32 %v5220_v47, %v2071_v9  ;;  %v5749_v14 = vpop.xlane.xlu0 %2800  ;;  %v2997_v28 = vsel %vm2708_vm1, %v2676_v10, 0.0 }
 0x264   :  { %v3757_v11 = vsel %vm3737_vm3, %v3298_v1, %v3756_v39  ;;  %v2780_v13 = vpop.xlane.xlu1 %2779  ;;  %v4629_v19 = vpop.f32.mrf.mxu1  ;;  %v2994_v61 = vsel %vm2708_vm1, %v2675_v51, 0.0  ;;  %v2673_v1 = vmul.f32 %v5529_v25, %v2538_v38  ;;  %v2544_v2 = vmax.f32 %v2416_v41, 0.0 }
 0x265   :  { %v3758_v23 = vsel %vm3739_vm4, %v3302_v7, %v3757_v11  ;;  %v2547_v24 = vmax.f32 %v2419_v3, 0.0  ;;  %v2417_v26 = vadd.f32 %v5513_v8, %v2288_v12  ;;  %v2291_v27 = vmul.f32 %v4629_v19, %v5220_v47 }
 0x266   :  { %2998 = vadd.xlane.f32.xlu0 %v2997_v28  ;;  %v2074_v31 = vpop.f32.mrf.mxu1  ;;  %v3759_v45 = vsel %vm3741_vm5, %v3306_v29, %v3758_v23  ;;  %v3318_v62 = vrot.slane %v2780_v13, %v5586_v40  ;;  %v3330_v10 = vrot.slane %v5718_v36, %v5586_v40  ;;  %v2542_v11 = vmax.f32 %v2414_v55, 0.0 }
 0x267   :  { %2983 = vadd.xlane.f32.xlu1 %v2982_v22  ;;  %v2545_v32 = vmax.f32 %v2417_v26, 0.0  ;;  %v2420_v33 = vadd.f32 %v5513_v8, %v2291_v27  ;;  %v5764_v35 = vpop.xlane.xlu0 %2794  ;;  %v2682_v37 = vmul.f32 %v5529_v25, %v2547_v24  ;;  %v2289_v63 = vmul.f32 %v5220_v47, %v2074_v31 }
 0x268   :  { %v2774_v34 = vpop.xlane.xlu1 %2773  ;;  %v4632_v42 = vpop.f32.mrf.mxu1  ;;  %v3322_v3 = vrot.slane %v5730_v56, %v5586_v40  ;;  %v2988_v23 = vsel %vm2708_vm1, %v2673_v1, 0.0  ;;  %v2679_v56 = vmul.f32 %v5529_v25, %v2544_v2 }
 0x269   :  { %v3310_v15 = vrot.slane %v2774_v34, %v5586_v40  ;;  %v2548_v44 = vmax.f32 %v2420_v33, 0.0  ;;  %v2294_v46 = vmul.f32 %v4632_v42, %v5220_v47  ;;  %v3015_v48 = vsel %vm2708_vm1, %v2682_v37, 0.0 }
 0x26a   :  { %3016 = vadd.xlane.f32.xlu0 %v3015_v48  ;;  %v2087_v53 = vpop.f32.mrf.mxu1  ;;  %v2680_v54 = vmul.f32 %v5529_v25, %v2545_v32  ;;  %v2418_v17 = vadd.f32 %v5513_v8, %v2289_v63  ;;  %v2677_v34 = vmul.f32 %v5529_v25, %v2542_v11 }
 0x26b   :  { %v3760_v49 = vsel %vm3743_vm6, %v3310_v15, %v3759_v45  ;;  %2977 = vadd.xlane.f32.xlu1 %v2976_v43  ;;  %v2423_v57 = vadd.f32 %v5513_v8, %v2294_v46  ;;  %v5779_v60 = vpop.xlane.xlu0 %2812  ;;  %v2683_v7 = vmul.f32 %v5529_v25, %v2548_v44  ;;  %v2292_v18 = vmul.f32 %v5220_v47, %v2087_v53 }
 0x26c   :  { %v2792_v58 = vpop.xlane.xlu1 %2791  ;;  %v4633_v0 = vpop.f32.mrf.mxu1  ;;  %v3761_v4 = vsel %vm3745_vm7, %v3314_v30, %v3760_v49  ;;  %v3009_v6 = vsel %vm2708_vm1, %v2680_v54, 0.0  ;;  %v2546_v37 = vmax.f32 %v2418_v17, 0.0  ;;  %v3006_v45 = vsel %vm2708_vm1, %v2679_v56, 0.0 }
 0x26d   :  { %v2551_v5 = vmax.f32 %v2423_v57, 0.0  ;;  %v5789_v9 = vsel %vm3747_vm8, %v3318_v62, %v3761_v4  ;;  %v3018_v24 = vsel %vm2708_vm1, %v2683_v7, 0.0  ;;  %v3334_v27 = vrot.slane %v2792_v58, %v5586_v40 }
 0x26e   :  { %3010 = vadd.xlane.f32.xlu0 %v3009_v6  ;;  %v2090_v39 = vpop.f32.mrf.mxu1  ;;  %v2421_v38 = vadd.f32 %v5513_v8, %v2292_v18  ;;  %v2295_v41 = vmul.f32 %v4633_v0, %v5220_v47  ;;  %v3000_v63 = vsel %vm2708_vm1, %v2677_v34, 0.0  ;;  %v2681_v0 = vmul.f32 %v5529_v25, %v2546_v37 }
 0x26f   :  { %2995 = vadd.xlane.f32.xlu1 %v2994_v61  ;;  %v2293_v12 = vmul.f32 %v5220_v47, %v2090_v39  ;;  %v5796_v16 = vpop.xlane.xlu0 %2806  ;;  %v2686_v26 = vmul.f32 %v5529_v25, %v2551_v5 }
 0x270   :  { %v2786_v13 = vpop.xlane.xlu1 %2785  ;;  %v4636_v22 = vpop.f32.mrf.mxu1  ;;  %v2549_v58 = vmax.f32 %v2421_v38, 0.0  ;;  %v2424_v61 = vadd.f32 %v5513_v8, %v2295_v41 }
 0x271   :  { %v3326_v19 = vrot.slane %v2786_v13, %v5586_v40  ;;  %v2422_v36 = vadd.f32 %v5513_v8, %v2293_v12  ;;  %v3027_v46 = vsel %vm2708_vm1, %v2686_v26, 0.0  ;;  %v2298_v49 = vmul.f32 %v4636_v22, %v5220_v47 }
 0x272   :  { %3019 = vadd.xlane.f32.xlu0 %v3018_v24  ;;  %v2103_v29 = vpop.f32.mrf.mxu1  ;;  %v3012_v13 = vsel %vm2708_vm1, %v2681_v0, 0.0  ;;  %v2684_v17 = vmul.f32 %v5529_v25, %v2549_v58  ;;  %v2552_v18 = vmax.f32 %v2424_v61, 0.0 }
 0x273   :  { %v3763_v28 = vsel %vm3735_vm2, %v3326_v19, %v3322_v3  ;;  %2989 = vadd.xlane.f32.xlu1 %v2988_v23  ;;  %v2550_v31 = vmax.f32 %v2422_v36, 0.0  ;;  %v2296_v59 = vmul.f32 %v5220_v47, %v2103_v29  ;;  %v5812_v33 = vpop.xlane.xlu0 %2824  ;;  %v2427_v7 = vadd.f32 %v5513_v8, %v2298_v49 }
 0x274   :  { %v3764_v51 = vsel %vm3737_vm3, %v3330_v10, %v3763_v28  ;;  %v5810_v32 = vpop.xlane.xlu1 %2803  ;;  %v4637_v15 = vpop.f32.mrf.mxu1  ;;  %v2687_v37 = vmul.f32 %v5529_v25, %v2552_v18 }
 0x275   :  { %v5818_v42 = vsel %vm3739_vm4, %v3334_v27, %v3764_v51  ;;  %v2425_v43 = vadd.f32 %v5513_v8, %v2296_v59  ;;  %v2299_v44 = vmul.f32 %v4637_v15, %v5220_v47  ;;  %v2685_v30 = vmul.f32 %v5529_v25, %v2550_v31 }
 0x276   :  { %3028 = vadd.xlane.f32.xlu0 %v3027_v46  ;;  %v2106_v48 = vpop.f32.mrf.mxu1  ;;  %v2555_v24 = vmax.f32 %v2427_v7, 0.0  ;;  %v3021_v51 = vsel %vm2708_vm1, %v2684_v17, 0.0  ;;  %v3030_v58 = vsel %vm2708_vm1, %v2687_v37, 0.0 }
 0x277   :  { %3007 = vadd.xlane.f32.xlu1 %v3006_v45  ;;  %v2553_v53 = vmax.f32 %v2425_v43, 0.0  ;;  %v2428_v54 = vadd.f32 %v5513_v8, %v2299_v44  ;;  %v5829_v57 = vpop.xlane.xlu0 %2818  ;;  %v3024_v2 = vsel %vm2708_vm1, %v2685_v30, 0.0  ;;  %v2297_v3 = vmul.f32 %v5220_v47, %v2106_v48 }
 0x278   :  { %v5827_v55 = vpop.xlane.xlu1 %2797  ;;  %v4640_v62 = vpop.f32.mrf.mxu1  ;;  %v2690_v46 = vmul.f32 %v5529_v25, %v2555_v24 }
 0x279   :  { %v2556_v1 = vmax.f32 %v2428_v54, 0.0  ;;  %v2302_v4 = vmul.f32 %v4640_v62, %v5220_v47  ;;  %v2688_v5 = vmul.f32 %v5529_v25, %v2553_v53  ;;  %v2426_v28 = vadd.f32 %v5513_v8, %v2297_v3 }
 0x27a   :  { %3025 = vadd.xlane.f32.xlu0 %v3024_v2  ;;  %v2119_v6 = vpop.f32.mrf.mxu1 }
 0x27b   :  { %3001 = vadd.xlane.f32.xlu1 %v3000_v63  ;;  %v2431_v39 = vadd.f32 %v5513_v8, %v2302_v4  ;;  %v5841_v11 = vpop.xlane.xlu0 %2836  ;;  %v3033_v22 = vsel %vm2708_vm1, %v2688_v5, 0.0  ;;  %v2691_v23 = vmul.f32 %v5529_v25, %v2556_v1  ;;  %v2300_v29 = vmul.f32 %v5220_v47, %v2119_v6 }
 0x27c   :  { %v5839_v10 = vpop.xlane.xlu1 %2815  ;;  %v4641_v12 = vpop.f32.mrf.mxu1  ;;  %v2554_v48 = vmax.f32 %v2426_v28, 0.0  ;;  %v3039_v5 = vsel %vm2708_vm1, %v2690_v46, 0.0 }
 0x27d   :  { %v2559_v19 = vmax.f32 %v2431_v39, 0.0  ;;  %v3042_v34 = vsel %vm2708_vm1, %v2691_v23, 0.0  ;;  %v2429_v30 = vadd.f32 %v5513_v8, %v2300_v29  ;;  %v2303_v49 = vmul.f32 %v4641_v12, %v5220_v47 }
 0x27e   :  { %3034 = vadd.xlane.f32.xlu0 %v3033_v22  ;;  %v2122_v36 = vpop.f32.mrf.mxu1  ;;  %v2689_v12 = vmul.f32 %v5529_v25, %v2554_v48 }
 0x27f   :  { %3013 = vadd.xlane.f32.xlu1 %v3012_v13  ;;  %v2301_v56 = vmul.f32 %v5220_v47, %v2122_v36  ;;  %v5851_v27 = vpop.xlane.xlu0 %2830  ;;  %v2694_v38 = vmul.f32 %v5529_v25, %v2559_v19  ;;  %v2557_v6 = vmax.f32 %v2429_v30, 0.0  ;;  %v2432_v7 = vadd.f32 %v5513_v8, %v2303_v49  ;;  %v5888_v36 = vld [vmem:[%s6243_s5] sm:$0xff] }
 0x280   :  { %v5849_v26 = vpop.xlane.xlu1 %2809  ;;  %v4644_v31 = vpop.f32.mrf.mxu1  ;;  %v3036_v37 = vsel %vm2708_vm1, %v2689_v12, 0.0 }
 0x281   :  { %v2430_v59 = vadd.f32 %v5513_v8, %v2301_v56  ;;  %v3051_v61 = vsel %vm2708_vm1, %v2694_v38, 0.0  ;;  %v2306_v39 = vmul.f32 %v4644_v31, %v5220_v47  ;;  %v2560_v28 = vmax.f32 %v2432_v7, 0.0 }
 0x282   :  { %3043 = vadd.xlane.f32.xlu0 %v3042_v34  ;;  %v2135_v41 = vpop.f32.mrf.mxu1 }
 0x283   :  { %3022 = vadd.xlane.f32.xlu1 %v3021_v51  ;;  %v2558_v15 = vmax.f32 %v2430_v59, 0.0  ;;  %v2304_v43 = vmul.f32 %v5220_v47, %v2135_v41  ;;  %v5863_v45 = vpop.xlane.xlu0 %2848  ;;  %v2435_v29 = vadd.f32 %v5888_v36, %v2306_v39  ;;  %v2692_v59 = vmul.f32 %v5529_v25, %v2557_v6 }
 0x284   :  { %v5861_v44 = vpop.xlane.xlu1 %2827  ;;  %v4645_v53 = vpop.f32.mrf.mxu1 }
 0x285   :  { %v2433_v54 = vadd.f32 %v5513_v8, %v2304_v43  ;;  %v2693_v63 = vmul.f32 %v5529_v25, %v2558_v15  ;;  %v2307_v31 = vmul.f32 %v4645_v53, %v5220_v47  ;;  %v2563_v30 = vmax.f32 %v2435_v29, 0.0 }
 0x286   :  { %3052 = vadd.xlane.f32.xlu0 %v3051_v61  ;;  %v2138_v62 = vpop.f32.mrf.mxu1 }
 0x287   :  { %3031 = vadd.xlane.f32.xlu1 %v3030_v58  ;;  %v2561_v0 = vmax.f32 %v2433_v54, 0.0  ;;  %v2305_v1 = vmul.f32 %v5220_v47, %v2138_v62  ;;  %v5875_v2 = vpop.xlane.xlu0 %2842  ;;  %v3048_v18 = vsel %vm2708_vm1, %v2693_v63, 0.0  ;;  %v2436_v49 = vadd.f32 %v5888_v36, %v2307_v31  ;;  %v5911_v58 = vld [vmem:[%s6244_s6] ss:$0 sm:$0xff]  ;;  %s4753_s6 = smov [#allocation2]  }
 0x288   :  { %v5873_v4 = vpop.xlane.xlu1 %2821  ;;  %v4648_v3 = vpop.f32.mrf.mxu1  ;;  %v3045_v54 = vsel %vm2708_vm1, %v2692_v59, 0.0  ;;  %s4052_s24 = sshll.u32 %s4753_s6, 4  ;;  %s4053_s24 = int_to_ptr.vmem [resolvable:$true] %s4052_s24 }
 0x289   :  { %v2434_v13 = vadd.f32 %v5513_v8, %v2305_v1  ;;  %v2310_v17 = vmul.f32 %v4648_v3, %v5220_v47  ;;  %v2696_v19 = vmul.f32 %v5529_v25, %v2561_v0  ;;  %v3358_v3 = vrot.slane %v5849_v26, %v5586_v40  ;;  %s4730_s25 = scalar_lea.vmem %s4053_s24, 16  ;;  %s4734_s26 = scalar_lea.vmem %s4053_s24, 32 }
 0x28a   :  { %3049 = vadd.xlane.f32.xlu0 %v3048_v18  ;;  %v2151_v22 = vpop.f32.mrf.mxu1  ;;  %v2564_v12 = vmax.f32 %v2436_v49, 0.0  ;;  %v2698_v18 = vmul.f32 %v5911_v58, %v2563_v30  ;;  %v3362_v49 = vrot.slane %v5779_v60, %v5586_v40  ;;  %p4731_p0 = scmp.ne.s32.totalorder %s4053_s24, %s4730_s25  ;;  %p4735_p1 = scmp.lt.s32.totalorder %s4053_s24, %s4053_s24 }
 0x28b   :  { %3040 = vadd.xlane.f32.xlu1 %v3039_v5  ;;  %v2562_v23 = vmax.f32 %v2434_v13, 0.0  ;;  %v2439_v24 = vadd.f32 %v5888_v36, %v2310_v17  ;;  %v5893_v8 = vpop.xlane.xlu0 %2860  ;;  %v3057_v38 = vsel %vm2708_vm1, %v2696_v19, 0.0  ;;  %v2308_v61 = vmul.f32 %v5220_v47, %v2151_v22  ;;  %p4736_p2 = scmp.lt.s32.totalorder %s4734_s26, %s4730_s25 }
 0x28c   :  { %v5891_v56 = vpop.xlane.xlu1 %2839  ;;  %v4649_v51 = vpop.f32.mrf.mxu1 }
 0x28d   :  { %v2567_v34 = vmax.f32 %v2439_v24, 0.0  ;;  %v2697_v41 = vmul.f32 %v5529_v25, %v2562_v23  ;;  %v2695_v25 = vmul.f32 %v5911_v58, %v2560_v28  ;;  %v2311_v13 = vmul.f32 %v4649_v51, %v5220_v47  ;;  %p4737_p3 = por %p4736_p2, %p4735_p1 }
 0x28e   :  { %3058 = vadd.xlane.f32.xlu0 %v3057_v38  ;;  %v2154_v15 = vpop.f32.mrf.mxu1  ;;  %v2437_v19 = vadd.f32 %v5888_v36, %v2308_v61  ;;  %v3354_v24 = vrot.slane %v5796_v16, %v5586_v40  ;;  %v3063_v38 = vsel %vm2708_vm1, %v2698_v18, 0.0  ;;  %v2699_v16 = vmul.f32 %v5911_v58, %v2564_v12 }
 0x28f   :  { %3037 = vadd.xlane.f32.xlu1 %v3036_v37  ;;  %v2309_v43 = vmul.f32 %v5220_v47, %v2154_v15  ;;  %v5904_v48 = vpop.xlane.xlu0 %2854  ;;  %v3060_v63 = vsel %vm2708_vm1, %v2697_v41, 0.0  ;;  %v2702_v0 = vmul.f32 %v5911_v58, %v2567_v34  ;;  %v3054_v22 = vsel %vm2708_vm1, %v2695_v25, 0.0  ;;  %p4738_p4 = pnand %p4737_p3, %p4731_p0 }
 0x290   :  { %v5902_v46 = vpop.xlane.xlu1 %2833  ;;  %v4652_v53 = vpop.f32.mrf.mxu1  ;;  %v3770_v34 = vsel %vm3735_vm2, %v3358_v3, %v3354_v24  ;;  %v2440_v37 = vadd.f32 %v5888_v36, %v2311_v13  ;;  %v2565_v41 = vmax.f32 %v2437_v19, 0.0 }
 0x291   :  { %v2438_v62 = vadd.f32 %v5888_v36, %v2309_v43  ;;  %v2314_v6 = vmul.f32 %v4652_v53, %v5220_v47  ;;  %v3075_v23 = vsel %vm2708_vm1, %v2702_v0, 0.0 }
 0x292   :  { %3061 = vadd.xlane.f32.xlu0 %v3060_v63  ;;  %v2167_v1 = vpop.f32.mrf.mxu1  ;;  %v3771_v63 = vsel %vm3737_vm3, %v3362_v49, %v3770_v34  ;;  %v2568_v0 = vmax.f32 %v2440_v37, 0.0  ;;  %v2700_v3 = vmul.f32 %v5911_v58, %v2565_v41 }
 0x293   :  { %3046 = vadd.xlane.f32.xlu1 %v3045_v54  ;;  %v2566_v5 = vmax.f32 %v2438_v62, 0.0  ;;  %v5921_v39 = vpop.xlane.xlu0 %2872  ;;  %v2443_v29 = vadd.f32 %v5888_v36, %v2314_v6  ;;  %v2312_v15 = vmul.f32 %v5220_v47, %v2167_v1  ;;  %v3366_v62 = vrot.slane %v5839_v10, %v5586_v40 }
 0x294   :  { %v5919_v7 = vpop.xlane.xlu1 %2851  ;;  %v4653_v17 = vpop.f32.mrf.mxu1  ;;  %v3066_v1 = vsel %vm2708_vm1, %v2699_v16, 0.0 }
 0x295   :  { %v2701_v26 = vmul.f32 %v5911_v58, %v2566_v5  ;;  %v2571_v53 = vmax.f32 %v2443_v29, 0.0  ;;  %v2441_v5 = vadd.f32 %v5888_v36, %v2312_v15  ;;  %v2315_v6 = vmul.f32 %v4653_v17, %v5220_v47 }
 0x296   :  { %3076 = vadd.xlane.f32.xlu0 %v3075_v23  ;;  %v2170_v28 = vpop.f32.mrf.mxu1  ;;  %v3772_v12 = vsel %vm3739_vm4, %v3366_v62, %v3771_v63  ;;  %v3418_v17 = vrot.slane %v5904_v48, %v5586_v40  ;;  %v2703_v29 = vmul.f32 %v5911_v58, %v2568_v0  ;;  %v3871_v63 = vsel %vm3870_vm9, %v5658_v21, 0.0 }
 0x297   :  { %3055 = vadd.xlane.f32.xlu1 %v3054_v22  ;;  %v2313_v31 = vmul.f32 %v5220_v47, %v2170_v28  ;;  %v5937_v59 = vpop.xlane.xlu0 %2866  ;;  %v3072_v30 = vsel %vm2708_vm1, %v2701_v26, 0.0  ;;  %v2706_v19 = vmul.f32 %v5911_v58, %v2571_v53  ;;  %v3374_v22 = vrot.slane %v5873_v4, %v5586_v40 }
 0x298   :  { %v5935_v51 = vpop.xlane.xlu1 %2845  ;;  %v3426_v47 = vrot.slane %v5893_v8, %v5586_v40  ;;  %v2569_v24 = vmax.f32 %v2441_v5, 0.0  ;;  %v2444_v28 = vadd.f32 %v5888_v36, %v2315_v6  ;;  %v3069_v26 = vsel %vm2708_vm1, %v2700_v3, 0.0 }
 0x299   :  { %v2442_v43 = vadd.f32 %v5888_v36, %v2313_v31  ;;  %v3370_v31 = vrot.slane %v5829_v57, %v5586_v40  ;;  %v3390_v4 = vrot.slane %v5902_v46, %v5586_v40  ;;  %v3087_v36 = vsel %vm2708_vm1, %v2706_v19, 0.0 }
 0x29a   :  { %3073 = vadd.xlane.f32.xlu0 %v3072_v30  ;;  %v2572_v41 = vmax.f32 %v2444_v28, 0.0  ;;  %v3078_v15 = vsel %vm2708_vm1, %v2703_v29, 0.0  ;;  %v3378_v30 = vrot.slane %v5812_v33, %v5586_v40  ;;  %v3394_v53 = vrot.slane %v5841_v11, %v5586_v40 }
 0x29b   :  { %3064 = vadd.xlane.f32.xlu1 %v3063_v38  ;;  %v2570_v54 = vmax.f32 %v2442_v43, 0.0  ;;  %v5948_v61 = vpop.xlane.xlu0 %2884  ;;  %v3386_v38 = vrot.slane %v5851_v27, %v5586_v40  ;;  %v3773_v16 = vsel %vm3741_vm5, %v3370_v31, %v3772_v12  ;;  %v2704_v43 = vmul.f32 %v5911_v58, %v2569_v24 }
 0x29c   :  { %v2864_v25 = vpop.xlane.xlu1 %2863  ;;  %v3774_v46 = vsel %vm3743_vm6, %v3374_v22, %v3773_v16  ;;  %v3338_v33 = vrot.slane %v5764_v35, %v5586_v40  ;;  %v3342_v0 = vrot.slane %v5827_v55, %v5586_v40  ;;  %v3382_v21 = vrot.slane %v5861_v44, %v5586_v40 }
 0x29d   :  { %v2705_v60 = vmul.f32 %v5911_v58, %v2570_v54  ;;  %v3430_v57 = vrot.slane %v2864_v25, %v5586_v40  ;;  %v3777_v49 = vsel %vm3735_vm2, %v3390_v4, %v3386_v38  ;;  %v3434_v54 = vrot.slane %v5937_v59, %v5586_v40 }
 0x29e   :  { %v3775_v11 = vsel %vm3745_vm7, %v3378_v30, %v3774_v46  ;;  %v3778_v5 = vsel %vm3737_vm3, %v3394_v53, %v3777_v49  ;;  %v3081_v6 = vsel %vm2708_vm1, %v2704_v43, 0.0  ;;  %v3398_v35 = vrot.slane %v5891_v56, %v5586_v40 }
 0x29f   :  { %3067 = vadd.xlane.f32.xlu1 %v3066_v1  ;;  %v5959_v18 = vpop.xlane.xlu0 %2878  ;;  %v3084_v10 = vsel %vm2708_vm1, %v2705_v60, 0.0  ;;  %v2707_v60 = vmul.f32 %v5911_v58, %v2572_v41  ;;  %v3766_v3 = vsel %vm3741_vm5, %v3338_v33, %v5818_v42  ;;  %v3442_v12 = vrot.slane %v5921_v39, %v5586_v40 }
 0x2a0   :  { %v2858_v13 = vpop.xlane.xlu1 %2857  ;;  %3085 = vadd.xlane.f32.xlu0 %v3084_v10  ;;  %v3877_v58 = vsel %vm3870_vm9, %v5789_v9, 0.0  ;;  %v3767_v44 = vsel %vm3743_vm6, %v3342_v0, %v3766_v3  ;;  %v3779_v19 = vsel %vm3739_vm4, %v3398_v35, %v3778_v5  ;;  %v3406_v56 = vrot.slane %v5935_v51, %v5586_v40 }
 0x2a1   :  { %v3422_v23 = vrot.slane %v2858_v13, %v5586_v40  ;;  %v3776_v22 = vsel %vm3747_vm8, %v3382_v21, %v3775_v11  ;;  %v3346_v42 = vrot.slane %v5749_v14, %v5586_v40  ;;  %v3402_v39 = vrot.slane %v5875_v2, %v5586_v40 }
 0x2a2   :  { %v3450_v29 = vrot.slane %v5959_v18, %v5586_v40 }
 0x2a3   :  { %v3784_v8 = vsel %vm3735_vm2, %v3422_v23, %v3418_v17  ;;  %3070 = vadd.xlane.f32.xlu1 %v3069_v26  ;;  %v5979_v37 = vpop.xlane.xlu0 %2896  ;;  %v3350_v23 = vrot.slane %v5810_v32, %v5586_v40  ;;  %v3780_v51 = vsel %vm3741_vm5, %v3402_v39, %v3779_v19  ;;  %v3883_v26 = vsel %vm3870_vm9, %v3776_v22, 0.0 }
 0x2a4   :  { %v3785_v48 = vsel %vm3737_vm3, %v3426_v47, %v3784_v8  ;;  %v2876_v34 = vpop.xlane.xlu1 %2875  ;;  %3088 = vadd.xlane.f32.xlu0 %v3087_v36  ;;  %v3090_v47 = vsel %vm2708_vm1, %v2707_v60, 0.0  ;;  %v3768_v14 = vsel %vm3745_vm7, %v3346_v42, %v3767_v44  ;;  %v3781_v2 = vsel %vm3743_vm6, %v3406_v56, %v3780_v51 }
 0x2a5   :  { %v3786_v27 = vsel %vm3739_vm4, %v3430_v57, %v3785_v48  ;;  %v3446_v17 = vrot.slane %v2876_v34, %v5586_v40  ;;  %v3410_v32 = vrot.slane %v5863_v45, %v5586_v40  ;;  %v3458_v8 = vrot.slane %v5948_v61, %v5586_v40 }
 0x2a6   :  { %v3787_v59 = vsel %vm3741_vm5, %v3434_v54, %v3786_v27  ;;  %v3874_v48 = vsel %vm3870_vm9, %v5728_v50, 0.0  ;;  %v3769_v36 = vsel %vm3747_vm8, %v3350_v23, %v3768_v14  ;;  %v3414_v45 = vrot.slane %v5919_v7, %v5586_v40 }
 0x2a7   :  { %3079 = vadd.xlane.f32.xlu1 %v3078_v15  ;;  %v5997_v62 = vpop.xlane.xlu0 %2890  ;;  %v3782_v57 = vsel %vm3745_vm7, %v3410_v32, %v3781_v2  ;;  %v3880_v50 = vsel %vm3870_vm9, %v3769_v36, 0.0  ;;  %v3474_v7 = vrot.slane %v5979_v37, %v5586_v40  ;;  %vm3993_vm1 = vcmask 589312  }
 0x2a8   :  { %v2870_v25 = vpop.xlane.xlu1 %2869  ;;  %3872 = vadd.xlane.f32.xlu0 %v3871_v63  ;;  %v3783_v15 = vsel %vm3747_vm8, %v3414_v45, %v3782_v57  ;;  %v3466_v43 = vrot.slane %v5997_v62, %v5586_v40 }
 0x2a9   :  { %v3438_v1 = vrot.slane %v2870_v25, %v5586_v40  ;;  %v3886_v54 = vsel %vm3870_vm9, %v3783_v15, 0.0 }
 0x2ab   :  { %v3788_v55 = vsel %vm3743_vm6, %v3438_v1, %v3787_v59  ;;  %3082 = vadd.xlane.f32.xlu1 %v3081_v6  ;;  %v6020_v10 = vpop.xlane.xlu0 %2908 }
 0x2ac   :  { %v2888_v13 = vpop.xlane.xlu1 %2887  ;;  %3878 = vadd.xlane.f32.xlu0 %v3877_v58  ;;  %v3789_v9 = vsel %vm3745_vm7, %v3442_v12, %v3788_v55  ;;  %v3490_v6 = vrot.slane %v6020_v10, %v5586_v40 }
 0x2ad   :  { %v3790_v4 = vsel %vm3747_vm8, %v3446_v17, %v3789_v9  ;;  %v3462_v61 = vrot.slane %v2888_v13, %v5586_v40 }
 0x2ae   :  { %v3889_v16 = vsel %vm3870_vm9, %v3790_v4, 0.0 }
 0x2af   :  { %3091 = vadd.xlane.f32.xlu1 %v3090_v47  ;;  %v2903_v28 = vpop.xlane.xlu0 %2902 }
 0x2b0   :  { %v2882_v24 = vpop.xlane.xlu1 %2881  ;;  %3884 = vadd.xlane.f32.xlu0 %v3883_v26  ;;  %v3482_v5 = vrot.slane %v2903_v28, %v5586_v40 }
 0x2b1   :  { %v3454_v31 = vrot.slane %v2882_v24, %v5586_v40 }
 0x2b3   :  { %v3791_v34 = vsel %vm3735_vm2, %v3454_v31, %v3450_v29  ;;  %3875 = vadd.xlane.f32.xlu1 %v3874_v48  ;;  %v2921_v46 = vpop.xlane.xlu0 %2920 }
 0x2b4   :  { %v3792_v18 = vsel %vm3737_vm3, %v3458_v8, %v3791_v34  ;;  %v2900_v38 = vpop.xlane.xlu1 %2899  ;;  %3890 = vadd.xlane.f32.xlu0 %v3889_v16  ;;  %v3506_v19 = vrot.slane %v2921_v46, %v5586_v40 }
 0x2b5   :  { %v3793_v41 = vsel %vm3739_vm4, %v3462_v61, %v3792_v18  ;;  %v3478_v25 = vrot.slane %v2900_v38, %v5586_v40 }
 0x2b6   :  { %v3794_v27 = vsel %vm3741_vm5, %v3466_v43, %v3793_v41 }
 0x2b7   :  { %3881 = vadd.xlane.f32.xlu1 %v3880_v50 }
 0x2b8   :  { %v2894_v30 = vpop.xlane.xlu1 %2893 }
 0x2b9   :  { %v3470_v49 = vrot.slane %v2894_v30, %v5586_v40  ;;  %v2918_v53 = vpop.xlane.xlu0 %2917 }
 0x2ba   :  { %v3502_v58 = vrot.slane %v2918_v53, %v5586_v40 }
 0x2bb   :  { %v3795_v63 = vsel %vm3743_vm6, %v3470_v49, %v3794_v27  ;;  %3887 = vadd.xlane.f32.xlu1 %v3886_v54 }
 0x2bc   :  { %v2912_v33 = vpop.xlane.xlu1 %2911  ;;  %v3796_v0 = vsel %vm3745_vm7, %v3474_v7, %v3795_v63 }
 0x2bd   :  { %v3797_v62 = vsel %vm3747_vm8, %v3478_v25, %v3796_v0  ;;  %v2933_v1 = vpop.xlane.xlu0 %2932  ;;  %v3494_v21 = vrot.slane %v2912_v33, %v5586_v40 }
 0x2be   :  { %v3892_v11 = vsel %vm3870_vm9, %v3797_v62, 0.0  ;;  %v3522_v2 = vrot.slane %v2933_v1, %v5586_v40 }
 0x2bf   :  { %3893 = vadd.xlane.f32.xlu1 %v3892_v11 }
 0x2c0   :  { %v2906_v37 = vpop.xlane.xlu1 %2905 }
 0x2c1   :  { %v3486_v59 = vrot.slane %v2906_v37, %v5586_v40  ;;  %v2936_v60 = vpop.xlane.xlu0 %2935 }
 0x2c2   :  { %v3526_v32 = vrot.slane %v2936_v60, %v5586_v40 }
 0x2c3   :  { %v3798_v35 = vsel %vm3735_vm2, %v3486_v59, %v3482_v5 }
 0x2c4   :  { %v3799_v55 = vsel %vm3737_vm3, %v3490_v6, %v3798_v35  ;;  %v2915_v3 = vpop.xlane.xlu1 %2914 }
 0x2c5   :  { %v3800_v12 = vsel %vm3739_vm4, %v3494_v21, %v3799_v55  ;;  %v3498_v13 = vrot.slane %v2915_v3, %v5586_v40  ;;  %v2930_v44 = vpop.xlane.xlu0 %2929 }
 0x2c6   :  { %v3518_v24 = vrot.slane %v2930_v44, %v5586_v40 }
 0x2c7   :  { %v3801_v56 = vsel %vm3741_vm5, %v3498_v13, %v3800_v12 }
 0x2c8   :  { %v2924_v10 = vpop.xlane.xlu1 %2923  ;;  %v3802_v22 = vsel %vm3743_vm6, %v3502_v58, %v3801_v56 }
 0x2c9   :  { %v3510_v42 = vrot.slane %v2924_v10, %v5586_v40  ;;  %v3803_v39 = vsel %vm3745_vm7, %v3506_v19, %v3802_v22  ;;  %v2945_v9 = vpop.xlane.xlu0 %2944 }
 0x2ca   :  { %v3538_v38 = vrot.slane %v2945_v9, %v5586_v40 }
 0x2cb   :  { %v3804_v47 = vsel %vm3747_vm8, %v3510_v42, %v3803_v39 }
 0x2cc   :  { %v2927_v17 = vpop.xlane.xlu1 %2926  ;;  %v3895_v23 = vsel %vm3870_vm9, %v3804_v47, 0.0 }
 0x2cd   :  { %v3514_v51 = vrot.slane %v2927_v17, %v5586_v40  ;;  %3896 = vadd.xlane.f32.xlu0 %v3895_v23 }
 0x2cf   :  { %v2960_v26 = vpop.xlane.xlu0 %2959  ;;  %v3805_v14 = vsel %vm3735_vm2, %v3518_v24, %v3514_v51 }
 0x2d0   :  { %v2939_v28 = vpop.xlane.xlu1 %2938  ;;  %v3806_v29 = vsel %vm3737_vm3, %v3522_v2, %v3805_v14  ;;  %v3558_v33 = vrot.slane %v2960_v26, %v5586_v40 }
 0x2d1   :  { %v3530_v8 = vrot.slane %v2939_v28, %v5586_v40  ;;  %v3807_v48 = vsel %vm3739_vm4, %v3526_v32, %v3806_v29 }
 0x2d3   :  { %v2954_v4 = vpop.xlane.xlu0 %2953  ;;  %v3808_v16 = vsel %vm3741_vm5, %v3530_v8, %v3807_v48 }
 0x2d4   :  { %v2948_v31 = vpop.xlane.xlu1 %2947  ;;  %v3550_v49 = vrot.slane %v2954_v4, %v5586_v40 }
 0x2d5   :  { %v3542_v57 = vrot.slane %v2948_v31, %v5586_v40 }
 0x2d7   :  { %v2969_v36 = vpop.xlane.xlu0 %2968 }
 0x2d8   :  { %v2942_v34 = vpop.xlane.xlu1 %2941  ;;  %v3570_v5 = vrot.slane %v2969_v36, %v5586_v40 }
 0x2d9   :  { %v3534_v18 = vrot.slane %v2942_v34, %v5586_v40 }
 0x2db   :  { %v3809_v45 = vsel %vm3743_vm6, %v3534_v18, %v3808_v16  ;;  %v2963_v46 = vpop.xlane.xlu0 %2962 }
 0x2dc   :  { %v2957_v61 = vpop.xlane.xlu1 %2956  ;;  %v3810_v50 = vsel %vm3745_vm7, %v3538_v38, %v3809_v45  ;;  %v3562_v62 = vrot.slane %v2963_v46, %v5586_v40 }
 0x2dd   :  { %v3811_v41 = vsel %vm3747_vm8, %v3542_v57, %v3810_v50  ;;  %v3554_v27 = vrot.slane %v2957_v61, %v5586_v40 }
 0x2de   :  { %v3898_v15 = vsel %vm3870_vm9, %v3811_v41, 0.0 }
 0x2df   :  { %3899 = vadd.xlane.f32.xlu1 %v3898_v15  ;;  %v2975_v30 = vpop.xlane.xlu0 %2974 }
 0x2e0   :  { %v2951_v43 = vpop.xlane.xlu1 %2950  ;;  %v3578_v56 = vrot.slane %v2975_v30, %v5586_v40 }
 0x2e1   :  { %v3546_v7 = vrot.slane %v2951_v43, %v5586_v40 }
 0x2e3   :  { %v3812_v53 = vsel %vm3735_vm2, %v3550_v49, %v3546_v7  ;;  %v2993_v63 = vpop.xlane.xlu0 %2992 }
 0x2e4   :  { %v3813_v54 = vsel %vm3737_vm3, %v3554_v27, %v3812_v53  ;;  %v2972_v25 = vpop.xlane.xlu1 %2971  ;;  %v3602_v14 = vrot.slane %v2993_v63, %v5586_v40 }
 0x2e5   :  { %v3814_v0 = vsel %vm3739_vm4, %v3558_v33, %v3813_v54  ;;  %v3574_v6 = vrot.slane %v2972_v25, %v5586_v40 }
 0x2e6   :  { %v3815_v59 = vsel %vm3741_vm5, %v3562_v62, %v3814_v0 }
 0x2e7   :  { %v2987_v11 = vpop.xlane.xlu0 %2986 }
 0x2e8   :  { %v2966_v1 = vpop.xlane.xlu1 %2965  ;;  %v3594_v51 = vrot.slane %v2987_v11, %v5586_v40 }
 0x2e9   :  { %v3566_v37 = vrot.slane %v2966_v1, %v5586_v40 }
 0x2eb   :  { %v3816_v60 = vsel %vm3743_vm6, %v3566_v37, %v3815_v59  ;;  %v3005_v35 = vpop.xlane.xlu0 %3004 }
 0x2ec   :  { %v2981_v21 = vpop.xlane.xlu1 %2980  ;;  %v3817_v55 = vsel %vm3745_vm7, %v3570_v5, %v3816_v60  ;;  %v3618_v57 = vrot.slane %v3005_v35, %v5586_v40 }
 0x2ed   :  { %v3818_v3 = vsel %vm3747_vm8, %v3574_v6, %v3817_v55  ;;  %v3586_v22 = vrot.slane %v2981_v21, %v5586_v40 }
 0x2ee   :  { %v3901_v12 = vsel %vm3870_vm9, %v3818_v3, 0.0 }
 0x2ef   :  { %3902 = vadd.xlane.f32.xlu0 %v3901_v12  ;;  %v2999_v58 = vpop.xlane.xlu0 %2998 }
 0x2f0   :  { %v2984_v13 = vpop.xlane.xlu1 %2983  ;;  %v3610_v38 = vrot.slane %v2999_v58, %v5586_v40 }
 0x2f1   :  { %v3590_v17 = vrot.slane %v2984_v13, %v5586_v40 }
 0x2f3   :  { %v3017_v19 = vpop.xlane.xlu0 %3016 }
 0x2f4   :  { %v2978_v44 = vpop.xlane.xlu1 %2977  ;;  %v3634_v49 = vrot.slane %v3017_v19, %v5586_v40 }
 0x2f5   :  { %v3582_v10 = vrot.slane %v2978_v44, %v5586_v40 }
 0x2f7   :  { %v3819_v42 = vsel %vm3735_vm2, %v3582_v10, %v3578_v56  ;;  %v3011_v9 = vpop.xlane.xlu0 %3010 }
 0x2f8   :  { %v3820_v39 = vsel %vm3737_vm3, %v3586_v22, %v3819_v42  ;;  %v2996_v47 = vpop.xlane.xlu1 %2995  ;;  %v3626_v46 = vrot.slane %v3011_v9, %v5586_v40 }
 0x2f9   :  { %v3821_v23 = vsel %vm3739_vm4, %v3590_v17, %v3820_v39  ;;  %v3606_v29 = vrot.slane %v2996_v47, %v5586_v40 }
 0x2fa   :  { %v3822_v2 = vsel %vm3741_vm5, %v3594_v51, %v3821_v23 }
 0x2fb   :  { %v3020_v28 = vpop.xlane.xlu0 %3019 }
 0x2fc   :  { %v2990_v24 = vpop.xlane.xlu1 %2989  ;;  %v3638_v27 = vrot.slane %v3020_v28, %v5586_v40 }
 0x2fd   :  { %v3598_v26 = vrot.slane %v2990_v24, %v5586_v40 }
 0x2ff   :  { %v3823_v31 = vsel %vm3743_vm6, %v3598_v26, %v3822_v2  ;;  %v3029_v32 = vpop.xlane.xlu0 %3028 }
 0x300   :  { %v3008_v4 = vpop.xlane.xlu1 %3007  ;;  %v3824_v8 = vsel %vm3745_vm7, %v3602_v14, %v3823_v31  ;;  %v3650_v6 = vrot.slane %v3029_v32, %v5586_v40 }
 0x301   :  { %v3825_v48 = vsel %vm3747_vm8, %v3606_v29, %v3824_v8  ;;  %v3622_v45 = vrot.slane %v3008_v4, %v5586_v40 }
 0x302   :  { %v3904_v34 = vsel %vm3870_vm9, %v3825_v48, 0.0 }
 0x303   :  { %3905 = vadd.xlane.f32.xlu1 %v3904_v34  ;;  %v3026_v18 = vpop.xlane.xlu0 %3025 }
 0x304   :  { %v3002_v36 = vpop.xlane.xlu1 %3001  ;;  %v3646_v37 = vrot.slane %v3026_v18, %v5586_v40 }
 0x305   :  { %v3614_v16 = vrot.slane %v3002_v36, %v5586_v40 }
 0x307   :  { %v3826_v61 = vsel %vm3735_vm2, %v3614_v16, %v3610_v38  ;;  %v3035_v15 = vpop.xlane.xlu0 %3034 }
 0x308   :  { %v3827_v50 = vsel %vm3737_vm3, %v3618_v57, %v3826_v61  ;;  %v3014_v41 = vpop.xlane.xlu1 %3013  ;;  %v3658_v3 = vrot.slane %v3035_v15, %v5586_v40 }
 0x309   :  { %v3828_v43 = vsel %vm3739_vm4, %v3622_v45, %v3827_v50  ;;  %v3630_v30 = vrot.slane %v3014_v41, %v5586_v40 }
 0x30a   :  { %v3829_v7 = vsel %vm3741_vm5, %v3626_v46, %v3828_v43 }
 0x30b   :  { %v3830_v53 = vsel %vm3743_vm6, %v3630_v30, %v3829_v7  ;;  %v3044_v25 = vpop.xlane.xlu0 %3043 }
 0x30c   :  { %v3023_v54 = vpop.xlane.xlu1 %3022  ;;  %v3831_v63 = vsel %vm3745_vm7, %v3634_v49, %v3830_v53  ;;  %v3670_v56 = vrot.slane %v3044_v25, %v5586_v40 }
 0x30d   :  { %v3832_v33 = vsel %vm3747_vm8, %v3638_v27, %v3831_v63  ;;  %v3642_v62 = vrot.slane %v3023_v54, %v5586_v40 }
 0x30e   :  { %v3907_v0 = vsel %vm3870_vm9, %v3832_v33, 0.0 }
 0x30f   :  { %3908 = vadd.xlane.f32.xlu0 %v3907_v0  ;;  %v3053_v11 = vpop.xlane.xlu0 %3052  ;;  %v3833_v5 = vsel %vm3735_vm2, %v3646_v37, %v3642_v62 }
 0x310   :  { %v3032_v1 = vpop.xlane.xlu1 %3031  ;;  %v3834_v35 = vsel %vm3737_vm3, %v3650_v6, %v3833_v5  ;;  %v3682_v24 = vrot.slane %v3053_v11, %v5586_v40 }
 0x311   :  { %v3654_v59 = vrot.slane %v3032_v1, %v5586_v40 }
 0x313   :  { %v3050_v21 = vpop.xlane.xlu0 %3049  ;;  %v3835_v55 = vsel %vm3739_vm4, %v3654_v59, %v3834_v35 }
 0x314   :  { %v3041_v60 = vpop.xlane.xlu1 %3040  ;;  %v3836_v19 = vsel %vm3741_vm5, %v3658_v3, %v3835_v55  ;;  %v3678_v39 = vrot.slane %v3050_v21, %v5586_v40  ;;  %v3939_v55 = vadd.s32 4294967288, %v5565_v52 }
 0x315   :  { %v3666_v44 = vrot.slane %v3041_v60, %v5586_v40 }
 0x317   :  { %v3059_v13 = vpop.xlane.xlu0 %3058 }
 0x318   :  { %v3038_v12 = vpop.xlane.xlu1 %3037  ;;  %v3690_v14 = vrot.slane %v3059_v13, %v5586_v40  ;;  %v3953_v13 = vadd.s32 4294967272, %v5565_v52 }
 0x319   :  { %v3662_v58 = vrot.slane %v3038_v12, %v5586_v40  ;;  %v3942_v12 = vsub.s32 %v3939_v55, %v5567_v20 }
 0x31b   :  { %v3837_v10 = vsel %vm3743_vm6, %v3662_v58, %v3836_v19  ;;  %v3062_v17 = vpop.xlane.xlu0 %3061  ;;  %v3946_v58 = vadd.s32 4294967280, %v5565_v52 }
 0x31c   :  { %v3047_v22 = vpop.xlane.xlu1 %3046  ;;  %v3838_v42 = vsel %vm3745_vm7, %v3666_v44, %v3837_v10  ;;  %v3694_v8 = vrot.slane %v3062_v17, %v5586_v40  ;;  %v3956_v10 = vsub.s32 %v3953_v13, %v5567_v20 }
 0x31d   :  { %v3674_v47 = vrot.slane %v3047_v22, %v5586_v40  ;;  %v3839_v9 = vsel %vm3747_vm8, %v3670_v56, %v3838_v42  ;;  %v3967_v22 = vadd.s32 4294967256, %v5565_v52  ;;  %v3949_v42 = vsub.s32 %v3946_v58, %v5567_v20 }
 0x31e   :  { %v3910_v23 = vsel %vm3870_vm9, %v3839_v9, 0.0  ;;  %v3974_v9 = vadd.s32 4294967248, %v5565_v52 }
 0x31f   :  { %v3840_v51 = vsel %vm3735_vm2, %v3678_v39, %v3674_v47  ;;  %3911 = vadd.xlane.f32.xlu1 %v3910_v23  ;;  %v3077_v4 = vpop.xlane.xlu0 %3076  ;;  %v3960_v39 = vadd.s32 4294967264, %v5565_v52 }
 0x320   :  { %v3056_v28 = vpop.xlane.xlu1 %3055  ;;  %v3841_v2 = vsel %vm3737_vm3, %v3682_v24, %v3840_v51  ;;  %v3714_v49 = vrot.slane %v3077_v4, %v5586_v40  ;;  %v3970_v24 = vsub.s32 %v3967_v22, %v5567_v20 }
 0x321   :  { %v3686_v26 = vrot.slane %v3056_v28, %v5586_v40  ;;  %v3981_v28 = vadd.s32 4294967240, %v5565_v52 }
 0x323   :  { %v3842_v29 = vsel %vm3739_vm4, %v3686_v26, %v3841_v2  ;;  %v3074_v38 = vpop.xlane.xlu0 %3073  ;;  %v3963_v2 = vsub.s32 %v3960_v39, %v5567_v20 }
 0x324   :  { %v3843_v31 = vsel %vm3741_vm5, %v3690_v14, %v3842_v29  ;;  %v3065_v32 = vpop.xlane.xlu1 %3064  ;;  %v3710_v41 = vrot.slane %v3074_v38, %v5586_v40  ;;  %v3988_v29 = vadd.s32 4294967232, %v5565_v52  ;;  %v4009_v38 = vadd.s32 4294967208, %v5565_v52 }
 0x325   :  { %v3698_v48 = vrot.slane %v3065_v32, %v5586_v40  ;;  %v3844_v34 = vsel %vm3743_vm6, %v3694_v8, %v3843_v31  ;;  %v3995_v31 = vadd.s32 4294967224, %v5565_v52  ;;  %v4002_v8 = vadd.s32 4294967216, %v5565_v52 }
 0x327   :  { %v3845_v16 = vsel %vm3745_vm7, %v3698_v48, %v3844_v34 }
 0x328   :  { %v3068_v36 = vpop.xlane.xlu1 %3067 }
 0x329   :  { %v3702_v18 = vrot.slane %v3068_v36, %v5586_v40  ;;  %v3086_v46 = vpop.xlane.xlu0 %3085  ;;  %v3984_v36 = vsub.s32 %v3981_v28, %v5567_v20 }
 0x32a   :  { %v3726_v25 = vrot.slane %v3086_v46, %v5586_v40  ;;  %v4023_v46 = vadd.s32 4294967192, %v5565_v52 }
 0x32b   :  { %v3846_v57 = vsel %vm3747_vm8, %v3702_v18, %v3845_v16 }
 0x32c   :  { %v3071_v45 = vpop.xlane.xlu1 %3070  ;;  %v3913_v61 = vsel %vm3870_vm9, %v3846_v57, 0.0  ;;  %v3991_v57 = vsub.s32 %v3988_v29, %v5567_v20 }
 0x32d   :  { %3914 = vadd.xlane.f32.xlu0 %v3913_v61  ;;  %v3706_v50 = vrot.slane %v3071_v45, %v5586_v40  ;;  %v3089_v7 = vpop.xlane.xlu0 %3088  ;;  %v4016_v45 = vadd.s32 4294967200, %v5565_v52  ;;  %v3998_v61 = vsub.s32 %v3995_v31, %v5567_v20 }
 0x32e   :  { %v3730_v33 = vrot.slane %v3089_v7, %v5586_v40  ;;  %v4012_v7 = vsub.s32 %v4009_v38, %v5567_v20 }
 0x32f   :  { %v3847_v43 = vsel %vm3735_vm2, %v3710_v41, %v3706_v50  ;;  %v4005_v41 = vsub.s32 %v4002_v8, %v5567_v20  ;;  %vm4000_vm2 = vcmask 654912  }
 0x330   :  { %v3080_v15 = vpop.xlane.xlu1 %3079  ;;  %v3848_v53 = vsel %vm3737_vm3, %v3714_v49, %v3847_v43  ;;  %v4030_v43 = vadd.s32 4294967184, %v5565_v52  ;;  %vm4007_vm3 = vcmask 720512  }
 0x331   :  { %v3718_v30 = vrot.slane %v3080_v15, %v5586_v40  ;;  %v3873_v6 = vpop.xlane.xlu0 %3872 }
 0x332   :  { %v3938_v47 = vrot.slane %v3873_v6, %v5586_v40 }
 0x333   :  { %v3849_v63 = vsel %vm3739_vm4, %v3718_v30, %v3848_v53  ;;  %vm4014_vm4 = vcmask 786112  }
 0x334   :  { %v3083_v27 = vpop.xlane.xlu1 %3082 }
 0x335   :  { %v3722_v54 = vrot.slane %v3083_v27, %v5586_v40  ;;  %v3879_v21 = vpop.xlane.xlu0 %3878 }
 0x336   :  { %v3950_v14 = vrot.slane %v3879_v21, %v3949_v42 }
 0x337   :  { %v3850_v0 = vsel %vm3741_vm5, %v3722_v54, %v3849_v63  ;;  %vm4021_vm5 = vcmask 851712  }
 0x338   :  { %v3092_v62 = vpop.xlane.xlu1 %3091  ;;  %v3851_v1 = vsel %vm3743_vm6, %v3726_v25, %v3850_v0  ;;  %v4019_v25 = vsub.s32 %v4016_v45, %v5567_v20  ;;  %v4037_v0 = vadd.s32 4294967176, %v5565_v52  ;;  %vm4028_vm6 = vcmask 917312  }
 0x339   :  { %v3734_v11 = vrot.slane %v3092_v62, %v5586_v40  ;;  %v3852_v37 = vsel %vm3745_vm7, %v3730_v33, %v3851_v1  ;;  %v3885_v3 = vpop.xlane.xlu0 %3884  ;;  %v3977_v40 = vsub.s32 %v3974_v9, %v5567_v20  ;;  %v4026_v33 = vsub.s32 %v4023_v46, %v5567_v20 }
 0x33a   :  { %v3964_v16 = vrot.slane %v3885_v3, %v3963_v2  ;;  %v4040_v3 = vsub.s32 %v4037_v0, %v5567_v20  ;;  %vm4035_vm7 = vcmask 982912  }
 0x33b   :  { %v3853_v5 = vsel %vm3747_vm8, %v3734_v11, %v3852_v37  ;;  %v4033_v37 = vsub.s32 %v4030_v43, %v5567_v20  ;;  %vm4042_vm8 = vcmask 1048512  }
 0x33c   :  { %v3916_v59 = vsel %vm3870_vm9, %v3853_v5, 0.0  ;;  %v3876_v60 = vpop.xlane.xlu1 %3875 }
 0x33d   :  { %3917 = vadd.xlane.f32.xlu1 %v3916_v59  ;;  %v3943_v19 = vrot.slane %v3876_v60, %v3942_v12  ;;  %v3891_v56 = vpop.xlane.xlu0 %3890 }
 0x33e   :  { %v3978_v53 = vrot.slane %v3891_v56, %v3977_v40 }
 0x33f   :  { %v3945_v23 = vsel %vm3944_vm10, %v3943_v19, %v3938_v47 }
 0x340   :  { %v3882_v35 = vpop.xlane.xlu1 %3881  ;;  %v3952_v4 = vsel %vm3951_vm11, %v3950_v14, %v3945_v23 }
 0x341   :  { %v3957_v51 = vrot.slane %v3882_v35, %v3956_v10 }
 0x343   :  { %v3959_v48 = vsel %vm3958_vm12, %v3957_v51, %v3952_v4 }
 0x344   :  { %v3888_v44 = vpop.xlane.xlu1 %3887  ;;  %v3966_v50 = vsel %vm3965_vm13, %v3964_v16, %v3959_v48 }
 0x345   :  { %v3971_v34 = vrot.slane %v3888_v44, %v3970_v24 }
 0x347   :  { %v3973_v30 = vsel %vm3972_vm14, %v3971_v34, %v3966_v50 }
 0x348   :  { %v3894_v17 = vpop.xlane.xlu1 %3893  ;;  %v3980_v62 = vsel %vm3979_vm15, %v3978_v53, %v3973_v30 }
 0x349   :  { %v3985_v49 = vrot.slane %v3894_v17, %v3984_v36 }
 0x34b   :  { %v3987_v5 = vsel %vm3986_vm0, %v3985_v49, %v3980_v62 }
 0x356   :  { %v3897_v26 = vpop.xlane.xlu0 %3896 }
 0x357   :  { %v3992_v54 = vrot.slane %v3897_v26, %v3991_v57 }
 0x359   :  { %v3994_v60 = vsel %vm3993_vm1, %v3992_v54, %v3987_v5 }
 0x368   :  { %v3900_v32 = vpop.xlane.xlu1 %3899 }
 0x369   :  { %v3999_v63 = vrot.slane %v3900_v32, %v3998_v61 }
 0x36b   :  { %v4001_v35 = vsel %vm4000_vm2, %v3999_v63, %v3994_v60 }
 0x378   :  { %v3903_v18 = vpop.xlane.xlu0 %3902 }
 0x379   :  { %v4006_v1 = vrot.slane %v3903_v18, %v4005_v41 }
 0x37b   :  { %v4008_v12 = vsel %vm4007_vm3, %v4006_v1, %v4001_v35 }
 0x38c   :  { %v3906_v15 = vpop.xlane.xlu1 %3905 }
 0x38d   :  { %v4013_v59 = vrot.slane %v3906_v15, %v4012_v7 }
 0x38f   :  { %v4015_v13 = vsel %vm4014_vm4, %v4013_v59, %v4008_v12 }
 0x398   :  { %v3909_v27 = vpop.xlane.xlu0 %3908 }
 0x399   :  { %v4020_v21 = vrot.slane %v3909_v27, %v4019_v25 }
 0x39b   :  { %v4022_v58 = vsel %vm4021_vm5, %v4020_v21, %v4015_v13 }
 0x3a8   :  { %v3912_v11 = vpop.xlane.xlu1 %3911 }
 0x3a9   :  { %v4027_v55 = vrot.slane %v3912_v11, %v4026_v33 }
 0x3ab   :  { %v4029_v19 = vsel %vm4028_vm6, %v4027_v55, %v4022_v58 }
 0x3b6   :  { %v3915_v6 = vpop.xlane.xlu0 %3914 }
 0x3b7   :  { %v4034_v52 = vrot.slane %v3915_v6, %v4033_v37 }
 0x3b9   :  { %v4036_v10 = vsel %vm4035_vm7, %v4034_v52, %v4029_v19 }
 0x3c6   :  { %v3918_v44 = vpop.xlane.xlu1 %3917 }
 0x3c7   :  { %v4041_v56 = vrot.slane %v3918_v44, %v4040_v3 }
 0x3c9   :  { %v4043_v22 = vsel %vm4042_vm8, %v4041_v56, %v4036_v10 }
 0x3ca   :  { %4045 = vst [vmem:[#allocation2] sm:$0x1] %v4043_v22 }
 0x3cb   :  { %4741 = shalt.err (!%p4738_p4)
}
 0x3cc   :  { %4055 = dma.vmem_to_hbm [thread:$0]  %s4053_s24, 16, %s6245_s7, [#allocation3]  }
 0x3cd   :  { %4750 = dma.done.wait [#allocation3], 16  }
 0x3ce   :  { %4751 = vsyncadd [#allocation3], 4294967280 }
 0x3cf   :  { %4059 = vsyncpa [#allocation3], 1 }

</bundles_post_ra>
